<compile_context>
chip_gen: v7x
topology: tpu7x:2x2x1
jax: 0.10.0
libtpu: 0.0.40
codegen_flags: <defaults>
</compile_context>

<pallas_src>
import jax
import jax.numpy as jnp
import numpy as np
from jax import lax
from jax.experimental import pallas as pl
from jax.experimental.pallas import tpu as pltpu

NUM_INPUTS = 4
NUM_FILTS = 128
NUM_RES = 4


def _round_up(x, m):
    return ((x + m - 1) // m) * m


def fcnet_kernel(x_ref, w0_ref, b0_ref, w1_ref, b1_ref, w2_ref, b2_ref, o_ref):
    # x_ref:  (TM, NUM_INPUTS)                f32
    # w0_ref: (NUM_INPUTS, NUM_FILTS)         f32   (VPU input layer)
    # b0_ref: (1, NUM_FILTS)                  f32
    # w1_ref: (NUM_RES, NUM_FILTS, NUM_FILTS) bf16  (MXU operands)
    # b1_ref: (NUM_RES, 1, NUM_FILTS)         f32
    # w2_ref: (NUM_RES, NUM_FILTS, NUM_FILTS) bf16  (MXU operands)
    # b2_ref: (NUM_RES, 1, NUM_FILTS)         f32
    # o_ref:  (TM, NUM_FILTS)                 f32
    x = x_ref[...]
    w0 = w0_ref[...]

    # Input layer: (TM,4) @ (4,128) as 4 broadcast FMAs on the VPU.  K=4 would
    # waste an MXU pass and leave 124/128 lanes of the LHS vreg empty; the VPU
    # work hides under the MXU-bound residual matmuls.
    h = b0_ref[...] + x[:, 0:1] * w0[0:1, :]
    for k in range(1, NUM_INPUTS):  # static unroll, NUM_INPUTS = 4
        h = h + x[:, k:k + 1] * w0[k:k + 1, :]
    h = jnp.maximum(h, 0.0)  # f32 (TM, 128)

    # 4 residual layers, statically unrolled.  MXU matmuls take bf16 operands
    # with f32 accumulation; bias / ReLU / residual stay in f32.
    for i in range(NUM_RES):  # static unroll, NUM_RES = 4
        y = jnp.dot(h.astype(jnp.bfloat16), w1_ref[i],
                    preferred_element_type=jnp.float32) + b1_ref[i]
        y = jnp.maximum(y, 0.0)
        # nn.Dropout() is identity in eval/inference mode.
        y = jnp.dot(y.astype(jnp.bfloat16), w2_ref[i],
                    preferred_element_type=jnp.float32) + b2_ref[i]
        y = jnp.maximum(y, 0.0)
        h = h + y

    o_ref[...] = h


def prepare_params(params):
    """One-time conversion of PyTorch-layout params into kernel-ready arrays.

    Call ONCE per model, not per forward call: (out,in) -> (in,out) transposes,
    bf16 cast of the 128x128 MXU weights, and bias reshapes happen here so the
    per-call wrapper does zero weight re-layout work.
    """
    w0_t = jnp.asarray(params["w0"], jnp.float32).T                        # (4, 128) f32
    b0 = jnp.asarray(params["b0"], jnp.float32).reshape(1, NUM_FILTS)      # (1, 128) f32
    w1_t = jnp.transpose(jnp.asarray(params["w1"]), (0, 2, 1)).astype(jnp.bfloat16)
    b1 = jnp.asarray(params["b1"], jnp.float32).reshape(NUM_RES, 1, NUM_FILTS)
    w2_t = jnp.transpose(jnp.asarray(params["w2"]), (0, 2, 1)).astype(jnp.bfloat16)
    b2 = jnp.asarray(params["b2"], jnp.float32).reshape(NUM_RES, 1, NUM_FILTS)
    return w0_t, b0, w1_t, b1, w2_t, b2


def fcnet_forward(x, kernel_params, tm=None):
    """feats path.  x: (N, NUM_INPUTS) f32 -> (N, NUM_FILTS) f32."""
    w0_t, b0, w1_t, b1, w2_t, b2 = kernel_params
    N = x.shape[0]

    # Tile choice: big tiles amortize the ~0.35us/grid-step overhead and fill
    # the MXU M dimension.  Per-tile VMEM is tm*(4+128)*4 B plus ~0.3 MiB of
    # resident weights, so 512 rows (double-buffered) is far under 64 MiB
    # (v7x) and 128 MiB (v5e/v6e).  For large N keep >= 2 grid steps so both
    # v7x TensorCores get work via dimension_semantics=("parallel",).
    if tm is None:
        if N <= 512:
            tm = _round_up(N, 8)
        else:
            tm = min(512, _round_up((N + 1) // 2, 8))
    tm = max(8, _round_up(tm, 8))

    # Arbitrary batch sizes: pad to a multiple of the tile, slice the result.
    n_pad = _round_up(N, tm)
    if n_pad != N:
        x = jnp.pad(x, ((0, n_pad - N), (0, 0)))

    grid = (n_pad // tm,)
    out = pl.pallas_call(
        fcnet_kernel,
        out_shape=jax.ShapeDtypeStruct((n_pad, NUM_FILTS), jnp.float32),
        grid_spec=pltpu.PrefetchScalarGridSpec(
            num_scalar_prefetch=0,
            grid=grid,
            in_specs=[
                pl.BlockSpec((tm, NUM_INPUTS), lambda i: (i, 0)),
                # Weights/biases: constant index_map -> fetched once and kept
                # resident in VMEM for the whole grid.  Total weight footprint
                # is ~0.27 MiB in bf16, so even default double-buffering costs
                # nothing against the VMEM budget (no need for pl.Buffered(1)).
                pl.BlockSpec((NUM_INPUTS, NUM_FILTS), lambda i: (0, 0)),
                pl.BlockSpec((1, NUM_FILTS), lambda i: (0, 0)),
                pl.BlockSpec((NUM_RES, NUM_FILTS, NUM_FILTS), lambda i: (0, 0, 0)),
                pl.BlockSpec((NUM_RES, 1, NUM_FILTS), lambda i: (0, 0, 0)),
                pl.BlockSpec((NUM_RES, NUM_FILTS, NUM_FILTS), lambda i: (0, 0, 0)),
                pl.BlockSpec((NUM_RES, 1, NUM_FILTS), lambda i: (0, 0, 0)),
            ],
            out_specs=pl.BlockSpec((tm, NUM_FILTS), lambda i: (i, 0)),
        ),
        compiler_params=pltpu.CompilerParams(
            dimension_semantics=("parallel",),
        ),
    )(x, w0_t, b0, w1_t, b1, w2_t, b2)

    return out[:N] if n_pad != N else out


def init_params(key):
    """Deterministic init, PyTorch-Linear-style uniform(-1/sqrt(fan_in), +)."""
    ks = jax.random.split(key, 2 + 4 * NUM_RES)
    s0 = 1.0 / float(np.sqrt(NUM_INPUTS))
    sf = 1.0 / float(np.sqrt(NUM_FILTS))
    w0 = jax.random.uniform(ks[0], (NUM_FILTS, NUM_INPUTS), jnp.float32, -s0, s0)
    b0 = jax.random.uniform(ks[1], (NUM_FILTS,), jnp.float32, -s0, s0)
    w1, b1, w2, b2 = [], [], [], []
    for i in range(NUM_RES):
        k = ks[2 + 4 * i: 2 + 4 * (i + 1)]
        w1.append(jax.random.uniform(k[0], (NUM_FILTS, NUM_FILTS), jnp.float32, -sf, sf))
        b1.append(jax.random.uniform(k[1], (NUM_FILTS,), jnp.float32, -sf, sf))
        w2.append(jax.random.uniform(k[2], (NUM_FILTS, NUM_FILTS), jnp.float32, -sf, sf))
        b2.append(jax.random.uniform(k[3], (NUM_FILTS,), jnp.float32, -sf, sf))
    return {
        "w0": w0, "b0": b0,
        "w1": jnp.stack(w1), "b1": jnp.stack(b1),
        "w2": jnp.stack(w2), "b2": jnp.stack(b2),
    }


def fcnet_ref(x, p, bf16_dots=False):
    """Plain-JAX reference mirroring the PyTorch forward (eval mode).

    bf16_dots=True mirrors the kernel's MXU precision (bf16 operands, f32
    accumulation) for the 128x128 res-layer matmuls; False is pure f32.
    """
    def rdot(h, wt):
        if bf16_dots:
            return jnp.dot(h.astype(jnp.bfloat16), wt.astype(jnp.bfloat16),
                           preferred_element_type=jnp.float32)
        return jnp.dot(h, wt, precision=lax.Precision.HIGHEST)

    h = jnp.dot(x, p["w0"].T, precision=lax.Precision.HIGHEST) + p["b0"]
    h = jnp.maximum(h, 0.0)
    for i in range(NUM_RES):
        y = jnp.maximum(rdot(h, p["w1"][i].T) + p["b1"][i], 0.0)
        y = jnp.maximum(rdot(y, p["w2"][i].T) + p["b2"][i], 0.0)
        h = h + y
    return h


if __name__ == "__main__":
    key = jax.random.PRNGKey(0)
    kx, kp = jax.random.split(key)
    N = 203  # deliberately NOT a multiple of the tile -> exercises padding path
    x = jax.random.normal(kx, (N, NUM_INPUTS), jnp.float32)
    params = init_params(kp)
    kparams = prepare_params(params)  # one-time transpose / bf16 cast of weights

    out_a = jax.block_until_ready(fcnet_forward(x, kparams))           # single-tile grid
    out_b = jax.block_until_ready(fcnet_forward(x, kparams, tm=64))    # 4-step grid + padded tail

    ref_bf16 = fcnet_ref(x, params, bf16_dots=True)   # kernel-precision reference
    ref_f32 = fcnet_ref(x, params, bf16_dots=False)   # PyTorch-equivalent f32 reference
    for out in (out_a, out_b):
        o = np.asarray(out)
        # Tight check vs. a reference using the same bf16-operand / f32-accum dots.
        np.testing.assert_allclose(o, np.asarray(ref_bf16), atol=1e-2, rtol=1e-2)
        # Loose check vs. pure f32 (bounds the bf16 drift of the MXU path).
        np.testing.assert_allclose(o, np.asarray(ref_f32), atol=1e-1, rtol=1e-1)
    print("KERNEL_OK")
</pallas_src>

<mosaic_0001>
module attributes {stable_mosaic.version = 11 : i64} {
  func.func @fcnet_kernel(%arg0: i32, %arg1: memref<208x4xf32, #tpu.memory_space<vmem>>, %arg2: memref<4x128xf32, #tpu.memory_space<vmem>>, %arg3: memref<1x128xf32, #tpu.memory_space<vmem>>, %arg4: memref<4x128x128xbf16, #tpu.memory_space<vmem>>, %arg5: memref<4x1x128xf32, #tpu.memory_space<vmem>>, %arg6: memref<4x128x128xbf16, #tpu.memory_space<vmem>>, %arg7: memref<4x1x128xf32, #tpu.memory_space<vmem>>, %arg8: memref<208x128xf32, #tpu.memory_space<vmem>>) attributes {dimension_semantics = [#tpu.dimension_semantics<parallel>], iteration_bounds = array<i64: 1>, scalar_prefetch = 0 : i64, scratch_operands = 0 : i64, tpu.core_type = #tpu.core_type<tc>, window_params = [{transform_indices = @transform_0, window_bounds = array<i64: 208, 4>}, {pipeline_mode = #tpu.pipeline_mode<synchronous>, transform_indices = @transform_1, window_bounds = array<i64: 4, 128>}, {pipeline_mode = #tpu.pipeline_mode<synchronous>, transform_indices = @transform_2, window_bounds = array<i64: 1, 128>}, {pipeline_mode = #tpu.pipeline_mode<synchronous>, transform_indices = @transform_3, window_bounds = array<i64: 4, 128, 128>}, {pipeline_mode = #tpu.pipeline_mode<synchronous>, transform_indices = @transform_4, window_bounds = array<i64: 4, 1, 128>}, {pipeline_mode = #tpu.pipeline_mode<synchronous>, transform_indices = @transform_5, window_bounds = array<i64: 4, 128, 128>}, {pipeline_mode = #tpu.pipeline_mode<synchronous>, transform_indices = @transform_6, window_bounds = array<i64: 4, 1, 128>}, {transform_indices = @transform_7, window_bounds = array<i64: 208, 128>}]} {
    %c0 = arith.constant 0 : index
    %c0_0 = arith.constant 0 : index
    %0 = vector.load %arg1[%c0, %c0_0] : memref<208x4xf32, #tpu.memory_space<vmem>>, vector<208x4xf32>
    %c0_1 = arith.constant 0 : index
    %c0_2 = arith.constant 0 : index
    %1 = vector.load %arg2[%c0_1, %c0_2] : memref<4x128xf32, #tpu.memory_space<vmem>>, vector<4x128xf32>
    %c0_3 = arith.constant 0 : index
    %c0_4 = arith.constant 0 : index
    %2 = vector.load %arg3[%c0_3, %c0_4] : memref<1x128xf32, #tpu.memory_space<vmem>>, vector<1x128xf32>
    %3 = vector.extract_strided_slice %0 {offsets = [0, 0], sizes = [208, 1], strides = [1, 1]} : vector<208x4xf32> to vector<208x1xf32>
    %4 = vector.extract_strided_slice %1 {offsets = [0, 0], sizes = [1, 128], strides = [1, 1]} : vector<4x128xf32> to vector<1x128xf32>
    %5 = vector.broadcast %3 : vector<208x1xf32> to vector<208x128xf32>
    %6 = vector.broadcast %4 : vector<1x128xf32> to vector<208x128xf32>
    %7 = arith.mulf %5, %6 : vector<208x128xf32>
    %8 = vector.broadcast %2 : vector<1x128xf32> to vector<208x128xf32>
    %9 = arith.addf %8, %7 : vector<208x128xf32>
    %10 = vector.extract_strided_slice %0 {offsets = [0, 1], sizes = [208, 1], strides = [1, 1]} : vector<208x4xf32> to vector<208x1xf32>
    %11 = vector.extract_strided_slice %1 {offsets = [1, 0], sizes = [1, 128], strides = [1, 1]} : vector<4x128xf32> to vector<1x128xf32>
    %12 = vector.broadcast %10 : vector<208x1xf32> to vector<208x128xf32>
    %13 = vector.broadcast %11 : vector<1x128xf32> to vector<208x128xf32>
    %14 = arith.mulf %12, %13 : vector<208x128xf32>
    %15 = arith.addf %9, %14 : vector<208x128xf32>
    %16 = vector.extract_strided_slice %0 {offsets = [0, 2], sizes = [208, 1], strides = [1, 1]} : vector<208x4xf32> to vector<208x1xf32>
    %17 = vector.extract_strided_slice %1 {offsets = [2, 0], sizes = [1, 128], strides = [1, 1]} : vector<4x128xf32> to vector<1x128xf32>
    %18 = vector.broadcast %16 : vector<208x1xf32> to vector<208x128xf32>
    %19 = vector.broadcast %17 : vector<1x128xf32> to vector<208x128xf32>
    %20 = arith.mulf %18, %19 : vector<208x128xf32>
    %21 = arith.addf %15, %20 : vector<208x128xf32>
    %22 = vector.extract_strided_slice %0 {offsets = [0, 3], sizes = [208, 1], strides = [1, 1]} : vector<208x4xf32> to vector<208x1xf32>
    %23 = vector.extract_strided_slice %1 {offsets = [3, 0], sizes = [1, 128], strides = [1, 1]} : vector<4x128xf32> to vector<1x128xf32>
    %24 = vector.broadcast %22 : vector<208x1xf32> to vector<208x128xf32>
    %25 = vector.broadcast %23 : vector<1x128xf32> to vector<208x128xf32>
    %26 = arith.mulf %24, %25 : vector<208x128xf32>
    %27 = arith.addf %21, %26 : vector<208x128xf32>
    %cst = arith.constant 0.000000e+00 : f32
    %28 = vector.broadcast %cst : f32 to vector<208x128xf32>
    %29 = arith.maximumf %27, %28 : vector<208x128xf32>
    %30 = arith.truncf %29 : vector<208x128xf32> to vector<208x128xbf16>
    %c0_5 = arith.constant 0 : index
    %c0_6 = arith.constant 0 : index
    %c0_7 = arith.constant 0 : index
    %31 = vector.load %arg4[%c0_5, %c0_6, %c0_7] : memref<4x128x128xbf16, #tpu.memory_space<vmem>>, vector<1x128x128xbf16>
    %32 = vector.shape_cast %31 : vector<1x128x128xbf16> to vector<128x128xbf16>
    %cst_8 = arith.constant dense<0.000000e+00> : vector<208x128xf32>
    %33 = tpu.matmul %30, %32, %cst_8 {dimension_numbers = #tpu.dot_dimension_numbers<[1], [0], [0], [1], [0, 0, 1, 1], [], []>} : vector<208x128xbf16>, vector<128x128xbf16>, vector<208x128xf32> -> vector<208x128xf32>
    %c0_9 = arith.constant 0 : index
    %c0_10 = arith.constant 0 : index
    %c0_11 = arith.constant 0 : index
    %34 = vector.load %arg5[%c0_9, %c0_10, %c0_11] : memref<4x1x128xf32, #tpu.memory_space<vmem>>, vector<1x1x128xf32>
    %35 = vector.shape_cast %34 : vector<1x1x128xf32> to vector<1x128xf32>
    %36 = vector.broadcast %35 : vector<1x128xf32> to vector<208x128xf32>
    %37 = arith.addf %33, %36 : vector<208x128xf32>
    %cst_12 = arith.constant 0.000000e+00 : f32
    %38 = vector.broadcast %cst_12 : f32 to vector<208x128xf32>
    %39 = arith.maximumf %37, %38 : vector<208x128xf32>
    %40 = arith.truncf %39 : vector<208x128xf32> to vector<208x128xbf16>
    %c0_13 = arith.constant 0 : index
    %c0_14 = arith.constant 0 : index
    %c0_15 = arith.constant 0 : index
    %41 = vector.load %arg6[%c0_13, %c0_14, %c0_15] : memref<4x128x128xbf16, #tpu.memory_space<vmem>>, vector<1x128x128xbf16>
    %42 = vector.shape_cast %41 : vector<1x128x128xbf16> to vector<128x128xbf16>
    %cst_16 = arith.constant dense<0.000000e+00> : vector<208x128xf32>
    %43 = tpu.matmul %40, %42, %cst_16 {dimension_numbers = #tpu.dot_dimension_numbers<[1], [0], [0], [1], [0, 0, 1, 1], [], []>} : vector<208x128xbf16>, vector<128x128xbf16>, vector<208x128xf32> -> vector<208x128xf32>
    %c0_17 = arith.constant 0 : index
    %c0_18 = arith.constant 0 : index
    %c0_19 = arith.constant 0 : index
    %44 = vector.load %arg7[%c0_17, %c0_18, %c0_19] : memref<4x1x128xf32, #tpu.memory_space<vmem>>, vector<1x1x128xf32>
    %45 = vector.shape_cast %44 : vector<1x1x128xf32> to vector<1x128xf32>
    %46 = vector.broadcast %45 : vector<1x128xf32> to vector<208x128xf32>
    %47 = arith.addf %43, %46 : vector<208x128xf32>
    %cst_20 = arith.constant 0.000000e+00 : f32
    %48 = vector.broadcast %cst_20 : f32 to vector<208x128xf32>
    %49 = arith.maximumf %47, %48 : vector<208x128xf32>
    %50 = arith.addf %29, %49 : vector<208x128xf32>
    %51 = arith.truncf %50 : vector<208x128xf32> to vector<208x128xbf16>
    %c1 = arith.constant 1 : index
    %c0_21 = arith.constant 0 : index
    %c0_22 = arith.constant 0 : index
    %52 = vector.load %arg4[%c1, %c0_21, %c0_22] : memref<4x128x128xbf16, #tpu.memory_space<vmem>>, vector<1x128x128xbf16>
    %53 = vector.shape_cast %52 : vector<1x128x128xbf16> to vector<128x128xbf16>
    %cst_23 = arith.constant dense<0.000000e+00> : vector<208x128xf32>
    %54 = tpu.matmul %51, %53, %cst_23 {dimension_numbers = #tpu.dot_dimension_numbers<[1], [0], [0], [1], [0, 0, 1, 1], [], []>} : vector<208x128xbf16>, vector<128x128xbf16>, vector<208x128xf32> -> vector<208x128xf32>
    %c1_24 = arith.constant 1 : index
    %c0_25 = arith.constant 0 : index
    %c0_26 = arith.constant 0 : index
    %55 = vector.load %arg5[%c1_24, %c0_25, %c0_26] : memref<4x1x128xf32, #tpu.memory_space<vmem>>, vector<1x1x128xf32>
    %56 = vector.shape_cast %55 : vector<1x1x128xf32> to vector<1x128xf32>
    %57 = vector.broadcast %56 : vector<1x128xf32> to vector<208x128xf32>
    %58 = arith.addf %54, %57 : vector<208x128xf32>
    %cst_27 = arith.constant 0.000000e+00 : f32
    %59 = vector.broadcast %cst_27 : f32 to vector<208x128xf32>
    %60 = arith.maximumf %58, %59 : vector<208x128xf32>
    %61 = arith.truncf %60 : vector<208x128xf32> to vector<208x128xbf16>
    %c1_28 = arith.constant 1 : index
    %c0_29 = arith.constant 0 : index
    %c0_30 = arith.constant 0 : index
    %62 = vector.load %arg6[%c1_28, %c0_29, %c0_30] : memref<4x128x128xbf16, #tpu.memory_space<vmem>>, vector<1x128x128xbf16>
    %63 = vector.shape_cast %62 : vector<1x128x128xbf16> to vector<128x128xbf16>
    %cst_31 = arith.constant dense<0.000000e+00> : vector<208x128xf32>
    %64 = tpu.matmul %61, %63, %cst_31 {dimension_numbers = #tpu.dot_dimension_numbers<[1], [0], [0], [1], [0, 0, 1, 1], [], []>} : vector<208x128xbf16>, vector<128x128xbf16>, vector<208x128xf32> -> vector<208x128xf32>
    %c1_32 = arith.constant 1 : index
    %c0_33 = arith.constant 0 : index
    %c0_34 = arith.constant 0 : index
    %65 = vector.load %arg7[%c1_32, %c0_33, %c0_34] : memref<4x1x128xf32, #tpu.memory_space<vmem>>, vector<1x1x128xf32>
    %66 = vector.shape_cast %65 : vector<1x1x128xf32> to vector<1x128xf32>
    %67 = vector.broadcast %66 : vector<1x128xf32> to vector<208x128xf32>
    %68 = arith.addf %64, %67 : vector<208x128xf32>
    %cst_35 = arith.constant 0.000000e+00 : f32
    %69 = vector.broadcast %cst_35 : f32 to vector<208x128xf32>
    %70 = arith.maximumf %68, %69 : vector<208x128xf32>
    %71 = arith.addf %50, %70 : vector<208x128xf32>
    %72 = arith.truncf %71 : vector<208x128xf32> to vector<208x128xbf16>
    %c2 = arith.constant 2 : index
    %c0_36 = arith.constant 0 : index
    %c0_37 = arith.constant 0 : index
    %73 = vector.load %arg4[%c2, %c0_36, %c0_37] : memref<4x128x128xbf16, #tpu.memory_space<vmem>>, vector<1x128x128xbf16>
    %74 = vector.shape_cast %73 : vector<1x128x128xbf16> to vector<128x128xbf16>
    %cst_38 = arith.constant dense<0.000000e+00> : vector<208x128xf32>
    %75 = tpu.matmul %72, %74, %cst_38 {dimension_numbers = #tpu.dot_dimension_numbers<[1], [0], [0], [1], [0, 0, 1, 1], [], []>} : vector<208x128xbf16>, vector<128x128xbf16>, vector<208x128xf32> -> vector<208x128xf32>
    %c2_39 = arith.constant 2 : index
    %c0_40 = arith.constant 0 : index
    %c0_41 = arith.constant 0 : index
    %76 = vector.load %arg5[%c2_39, %c0_40, %c0_41] : memref<4x1x128xf32, #tpu.memory_space<vmem>>, vector<1x1x128xf32>
    %77 = vector.shape_cast %76 : vector<1x1x128xf32> to vector<1x128xf32>
    %78 = vector.broadcast %77 : vector<1x128xf32> to vector<208x128xf32>
    %79 = arith.addf %75, %78 : vector<208x128xf32>
    %cst_42 = arith.constant 0.000000e+00 : f32
    %80 = vector.broadcast %cst_42 : f32 to vector<208x128xf32>
    %81 = arith.maximumf %79, %80 : vector<208x128xf32>
    %82 = arith.truncf %81 : vector<208x128xf32> to vector<208x128xbf16>
    %c2_43 = arith.constant 2 : index
    %c0_44 = arith.constant 0 : index
    %c0_45 = arith.constant 0 : index
    %83 = vector.load %arg6[%c2_43, %c0_44, %c0_45] : memref<4x128x128xbf16, #tpu.memory_space<vmem>>, vector<1x128x128xbf16>
    %84 = vector.shape_cast %83 : vector<1x128x128xbf16> to vector<128x128xbf16>
    %cst_46 = arith.constant dense<0.000000e+00> : vector<208x128xf32>
    %85 = tpu.matmul %82, %84, %cst_46 {dimension_numbers = #tpu.dot_dimension_numbers<[1], [0], [0], [1], [0, 0, 1, 1], [], []>} : vector<208x128xbf16>, vector<128x128xbf16>, vector<208x128xf32> -> vector<208x128xf32>
    %c2_47 = arith.constant 2 : index
    %c0_48 = arith.constant 0 : index
    %c0_49 = arith.constant 0 : index
    %86 = vector.load %arg7[%c2_47, %c0_48, %c0_49] : memref<4x1x128xf32, #tpu.memory_space<vmem>>, vector<1x1x128xf32>
    %87 = vector.shape_cast %86 : vector<1x1x128xf32> to vector<1x128xf32>
    %88 = vector.broadcast %87 : vector<1x128xf32> to vector<208x128xf32>
    %89 = arith.addf %85, %88 : vector<208x128xf32>
    %cst_50 = arith.constant 0.000000e+00 : f32
    %90 = vector.broadcast %cst_50 : f32 to vector<208x128xf32>
    %91 = arith.maximumf %89, %90 : vector<208x128xf32>
    %92 = arith.addf %71, %91 : vector<208x128xf32>
    %93 = arith.truncf %92 : vector<208x128xf32> to vector<208x128xbf16>
    %c3 = arith.constant 3 : index
    %c0_51 = arith.constant 0 : index
    %c0_52 = arith.constant 0 : index
    %94 = vector.load %arg4[%c3, %c0_51, %c0_52] : memref<4x128x128xbf16, #tpu.memory_space<vmem>>, vector<1x128x128xbf16>
    %95 = vector.shape_cast %94 : vector<1x128x128xbf16> to vector<128x128xbf16>
    %cst_53 = arith.constant dense<0.000000e+00> : vector<208x128xf32>
    %96 = tpu.matmul %93, %95, %cst_53 {dimension_numbers = #tpu.dot_dimension_numbers<[1], [0], [0], [1], [0, 0, 1, 1], [], []>} : vector<208x128xbf16>, vector<128x128xbf16>, vector<208x128xf32> -> vector<208x128xf32>
    %c3_54 = arith.constant 3 : index
    %c0_55 = arith.constant 0 : index
    %c0_56 = arith.constant 0 : index
    %97 = vector.load %arg5[%c3_54, %c0_55, %c0_56] : memref<4x1x128xf32, #tpu.memory_space<vmem>>, vector<1x1x128xf32>
    %98 = vector.shape_cast %97 : vector<1x1x128xf32> to vector<1x128xf32>
    %99 = vector.broadcast %98 : vector<1x128xf32> to vector<208x128xf32>
    %100 = arith.addf %96, %99 : vector<208x128xf32>
    %cst_57 = arith.constant 0.000000e+00 : f32
    %101 = vector.broadcast %cst_57 : f32 to vector<208x128xf32>
    %102 = arith.maximumf %100, %101 : vector<208x128xf32>
    %103 = arith.truncf %102 : vector<208x128xf32> to vector<208x128xbf16>
    %c3_58 = arith.constant 3 : index
    %c0_59 = arith.constant 0 : index
    %c0_60 = arith.constant 0 : index
    %104 = vector.load %arg6[%c3_58, %c0_59, %c0_60] : memref<4x128x128xbf16, #tpu.memory_space<vmem>>, vector<1x128x128xbf16>
    %105 = vector.shape_cast %104 : vector<1x128x128xbf16> to vector<128x128xbf16>
    %cst_61 = arith.constant dense<0.000000e+00> : vector<208x128xf32>
    %106 = tpu.matmul %103, %105, %cst_61 {dimension_numbers = #tpu.dot_dimension_numbers<[1], [0], [0], [1], [0, 0, 1, 1], [], []>} : vector<208x128xbf16>, vector<128x128xbf16>, vector<208x128xf32> -> vector<208x128xf32>
    %c3_62 = arith.constant 3 : index
    %c0_63 = arith.constant 0 : index
    %c0_64 = arith.constant 0 : index
    %107 = vector.load %arg7[%c3_62, %c0_63, %c0_64] : memref<4x1x128xf32, #tpu.memory_space<vmem>>, vector<1x1x128xf32>
    %108 = vector.shape_cast %107 : vector<1x1x128xf32> to vector<1x128xf32>
    %109 = vector.broadcast %108 : vector<1x128xf32> to vector<208x128xf32>
    %110 = arith.addf %106, %109 : vector<208x128xf32>
    %cst_65 = arith.constant 0.000000e+00 : f32
    %111 = vector.broadcast %cst_65 : f32 to vector<208x128xf32>
    %112 = arith.maximumf %110, %111 : vector<208x128xf32>
    %113 = arith.addf %92, %112 : vector<208x128xf32>
    %c0_66 = arith.constant 0 : index
    %c0_67 = arith.constant 0 : index
    %114 = vector.load %arg8[%c0_66, %c0_67] : memref<208x128xf32, #tpu.memory_space<vmem>>, vector<208x128xf32>
    tpu.vector_store %arg8[%c0_66, %c0_67], %113 {strides = array<i32>} : memref<208x128xf32, #tpu.memory_space<vmem>>, vector<208x128xf32>,
    return
  }
  func.func @transform_0(%arg0: i32) -> (i32, i32) {
    %c0_i32 = arith.constant 0 : i32
    %c0_i32_0 = arith.constant 0 : i32
    return %arg0, %c0_i32 : i32, i32
  }
  func.func @transform_1(%arg0: i32) -> (i32, i32) {
    %c0_i32 = arith.constant 0 : i32
    %c0_i32_0 = arith.constant 0 : i32
    %c0_i32_1 = arith.constant 0 : i32
    return %c0_i32, %c0_i32_0 : i32, i32
  }
  func.func @transform_2(%arg0: i32) -> (i32, i32) {
    %c0_i32 = arith.constant 0 : i32
    %c0_i32_0 = arith.constant 0 : i32
    %c0_i32_1 = arith.constant 0 : i32
    return %c0_i32, %c0_i32_0 : i32, i32
  }
  func.func @transform_3(%arg0: i32) -> (i32, i32, i32) {
    %c0_i32 = arith.constant 0 : i32
    %c0_i32_0 = arith.constant 0 : i32
    %c0_i32_1 = arith.constant 0 : i32
    %c0_i32_2 = arith.constant 0 : i32
    return %c0_i32, %c0_i32_0, %c0_i32_1 : i32, i32, i32
  }
  func.func @transform_4(%arg0: i32) -> (i32, i32, i32) {
    %c0_i32 = arith.constant 0 : i32
    %c0_i32_0 = arith.constant 0 : i32
    %c0_i32_1 = arith.constant 0 : i32
    %c0_i32_2 = arith.constant 0 : i32
    return %c0_i32, %c0_i32_0, %c0_i32_1 : i32, i32, i32
  }
  func.func @transform_5(%arg0: i32) -> (i32, i32, i32) {
    %c0_i32 = arith.constant 0 : i32
    %c0_i32_0 = arith.constant 0 : i32
    %c0_i32_1 = arith.constant 0 : i32
    %c0_i32_2 = arith.constant 0 : i32
    return %c0_i32, %c0_i32_0, %c0_i32_1 : i32, i32, i32
  }
  func.func @transform_6(%arg0: i32) -> (i32, i32, i32) {
    %c0_i32 = arith.constant 0 : i32
    %c0_i32_0 = arith.constant 0 : i32
    %c0_i32_1 = arith.constant 0 : i32
    %c0_i32_2 = arith.constant 0 : i32
    return %c0_i32, %c0_i32_0, %c0_i32_1 : i32, i32, i32
  }
  func.func @transform_7(%arg0: i32) -> (i32, i32) {
    %c0_i32 = arith.constant 0 : i32
    %c0_i32_0 = arith.constant 0 : i32
    return %arg0, %c0_i32 : i32, i32
  }
}

</mosaic_0001>

<bundles_post_ra>
// kernel: tpu_custom_call.1
= control target key start
LH: loop header
LB: loop body
LE: loop exit
PB: predicated region body
PF: predicated region fallthrough
CT: control target
= control target key end

     0   :  { %12 = vsyncpa [#allocation3], 0  ;;  %s5490_s0 = inlined_call_operand.vmem [shape: f32[208,4], index: 0, kind: input, shape index: {}]   ;;  %s5491_s1 = inlined_call_operand.vmem [shape: f32[4,128], index: 1, kind: input, shape index: {}]   ;;  %s5492_s2 = inlined_call_operand.vmem [shape: f32[1,128], index: 2, kind: input, shape index: {}]   ;;  %s5493_s3 = inlined_call_operand.hbm [shape: bf16[4,128,128], index: 3, kind: input, shape index: {}]   ;;  %s5494_s4 = inlined_call_operand.vmem [shape: f32[4,1,128], index: 4, kind: input, shape index: {}]   ;;  %s5495_s5 = inlined_call_operand.hbm [shape: bf16[4,128,128], index: 5, kind: input, shape index: {}]   ;;  %s5496_s6 = inlined_call_operand.vmem [shape: f32[4,1,128], index: 6, kind: input, shape index: {}]   ;;  %s5497_s7 = inlined_call_operand.hbm [shape: f32[208,128], index: 7, kind: output, shape index: {}]  }
   0x1   :  { %13 = vsyncpa [#allocation6], 0 }
   0x2   :  { %14 = vsyncpa [#allocation4], 0  ;;  %s3919_s24 = smov [#allocation2]   ;;  %s3847_s28 = scalar_lea.hbm %s5493_s3, 4096 }
   0x3   :  { %s26_s25 = sshll.u32 %s3919_s24, 4  ;;  %p3848_p0 = scmp.ne.s32.totalorder %s5493_s3, %s3847_s28  ;;  %s27_s25 = int_to_ptr.vmem [resolvable:$true] %s26_s25 }
   0x4   :  { %p3851_p1 = scmp.lt.u32.totalorder %s3847_s28, %s5493_s3 }
   0x6   :  { %p3853_p2 = pnand %p3851_p1, %p3848_p0 }
   0x8   :  { %3856 = shalt.err (!%p3853_p2)
}
   0x9   :  { %s3857_s10 = scalar_lea.vmem %s27_s25, 4096  ;;  %p3862_p4 = scmp.lt.s32.totalorder %s27_s25, %s27_s25 }
   0xa   :  { %p3858_p3 = scmp.ne.s32.totalorder %s27_s25, %s3857_s10  ;;  %p3863_p5 = scmp.lt.s32.totalorder %s3857_s10, %s3857_s10 }
   0xc   :  { %p3864_p6 = por %p3863_p5, %p3862_p4 }
   0xe   :  { %p3865_p7 = pnand %p3864_p6, %p3858_p3 }
  0x10   :  { %3868 = shalt.err (!%p3865_p7)
}
  0x11   :  { %s3920_s11 = smov 64   ;;  %s3921_s12 = smov 4  }
  0x12   :  { %32 = dma.hbm_to_vmem [thread:$0]  %s5493_s3, 4096, %s27_s25, [#allocation3], %s3920_s11, %s3920_s11, %s3921_s12  }
  0x13   :  { %s3922_s15 = smov [#allocation5]   ;;  %s3869_s19 = scalar_lea.hbm %s5495_s5, 4096 }
  0x14   :  { %s40_s16 = sshll.u32 %s3922_s15, 4  ;;  %p3870_p8 = scmp.ne.s32.totalorder %s5495_s5, %s3869_s19  ;;  %s41_s16 = int_to_ptr.vmem [resolvable:$true] %s40_s16 }
  0x15   :  { %p3873_p9 = scmp.lt.u32.totalorder %s3869_s19, %s5495_s5 }
  0x17   :  { %p3875_p10 = pnand %p3873_p9, %p3870_p8 }
  0x19   :  { %3878 = shalt.err (!%p3875_p10)
}
  0x1a   :  { %s3879_s24 = scalar_lea.vmem %s41_s16, 4096  ;;  %p3884_p12 = scmp.lt.s32.totalorder %s41_s16, %s41_s16 }
  0x1b   :  { %p3880_p11 = scmp.ne.s32.totalorder %s41_s16, %s3879_s24  ;;  %p3885_p13 = scmp.lt.s32.totalorder %s3879_s24, %s3879_s24 }
  0x1d   :  { %p3886_p0 = por %p3885_p13, %p3884_p12 }
  0x1f   :  { %p3887_p1 = pnand %p3886_p0, %p3880_p11 }
  0x21   :  { %3890 = shalt.err (!%p3887_p1)
}
  0x22   :  { %46 = dma.hbm_to_vmem [thread:$0]  %s5495_s5, 4096, %s41_s16, [#allocation6], %s3920_s11, %s3920_s11, %s3921_s12  }
  0x23   :  { %3913 = dma.done.wait [#allocation3], 4096  }
  0x24   :  { %3914 = vsyncadd [#allocation3], 4294963200 }
  0x25   :  { %3915 = dma.done.wait [#allocation6], 4096  }
  0x26   :  { %3916 = vsyncadd [#allocation6], 4294963200  ;;  %v3923_v0 = vmov 2   ;;  %v3924_v1 = vmov 1   ;;  %v56_v2 = vld [vmem:[%s5490_s0] sm:$0xff]  ;;  %v57_v3 = vld [vmem:[%s5490_s0 + $0x8] sm:$0xff]  ;;  %v214_v49 = vlaneseq }
  0x27   :  { %3723 = vset.pattern.permute.xlu0 %v3923_v0  ;;  %3722 = vset.pattern.permute.xlu1 %v3924_v1  ;;  %v58_v4 = vld [vmem:[%s5490_s0 + $0x10] sm:$0xff]  ;;  %v4011_v5 = vld [vmem:[%s5490_s0 + $0x28] sm:$0xff]  ;;  %v4018_v6 = vld [vmem:[%s5490_s0 + $0x40] sm:$0xff]  ;;  %v3925_v7 = vmov 3   ;;  %v3926_v9 = vmov 0   ;;  %v3927_v14 = vmov 0.0  }
  0x28   :  { %437 = vperm.xlu0 %3723, %v56_v2   ;;  %277 = vperm.xlu1 %3722, %v56_v2   ;;  %v60_v8 = vld [vmem:[%s5490_s0 + $0x20] sm:$0xff]  ;;  %v4030_v10 = vld [vmem:[%s5490_s0 + $0x18] sm:$0xff]  ;;  %v4041_v13 = vld [vmem:[%s5490_s0 + $0x50] sm:$0xff]  ;;  %vm3928_vm0 = vmmov 0   ;;  %v215_v52 = vshrl.u32 %v214_v49, 7 }
  0x29   :  { %v4035_v11 = vld [vmem:[%s5490_s0 + $0x38] sm:$0xff]  ;;  %v3783_v12 = vld [vmem:[#allocation2] sm:$0xff]   ;;  %3165 = vmatprep.subr.bf16.mxu0 %v3927_v14  ;;  %3233 = vmatprep.subr.bf16.mxu1 %v3927_v14  ;;  %v3784_v15 = vld [vmem:[#allocation2 + $0x8] sm:$0xff]  }
  0x2a   :  { %3166 = vmatpush3.bf16.msra.mxu0 %v3783_v12  ;;  %v4052_v16 = vld [vmem:[%s5490_s0 + $0x68] sm:$0xff]  ;;  %v3785_v17 = vld [vmem:[#allocation2 + $0x10] sm:$0xff]   ;;  %v3786_v18 = vld [vmem:[#allocation2 + $0x18] sm:$0xff]   ;;  %3181 = vmatprep.mubr.msk.bf16.mxu0 %vm3928_vm0, %v3927_v14  ;;  %v382_v55 = vsub.s32 1, %v215_v52  ;;  %v216_v56 = vsub.s32 0, %v215_v52  ;;  %v542_v59 = vsub.s32 2, %v215_v52 }
  0x2b   :  { %3167 = vmatprep.subr.bf16.mxu0 %v3927_v14  ;;  %v3787_v19 = vld [vmem:[#allocation2 + $0x20] sm:$0xff]   ;;  %v3788_v20 = vld [vmem:[#allocation2 + $0x28] sm:$0xff]   ;;  %v3789_v21 = vld [vmem:[#allocation2 + $0x30] sm:$0xff]   ;;  %3249 = vmatprep.mubr.msk.bf16.mxu1 %vm3928_vm0, %v3927_v14 }
  0x2c   :  { %3727 = vset.pattern.permute.xlu0 %v3924_v1  ;;  %281 = vperm.xlu1 %3722, %v57_v3   ;;  %v3790_v22 = vld [vmem:[#allocation2 + $0x38] sm:$0xff]   ;;  %v4081_v23 = vld [vmem:[%s5490_s0 + $0x80] sm:$0xff]  ;;  %v62_v25 = vld [vmem:[%s5490_s0 + $0x30] sm:$0xff] }
  0x2d   :  { %285 = vperm.xlu0 %3727, %v58_v4   ;;  %v4088_v24 = vld [vmem:[%s5490_s0 + $0x98] sm:$0xff]  ;;  %v65_v26 = vld [vmem:[%s5490_s0 + $0x48] sm:$0xff]  ;;  %v4107_v27 = vld [vmem:[%s5490_s0 + $0x60] sm:$0xff] }
  0x2e   :  { %3168 = vmatpush3.bf16.msra.mxu0 %v3784_v15  ;;  %v4115_v28 = vld [vmem:[%s5490_s0 + $0x78] sm:$0xff]  ;;  %v4122_v29 = vld [vmem:[%s5490_s0 + $0x90] sm:$0xff]  ;;  %v4128_v30 = vld [vmem:[%s5490_s0 + $0xa8] sm:$0xff] }
  0x2f   :  { %3169 = vmatprep.subr.bf16.mxu0 %v3927_v14  ;;  %v67_v31 = vld [vmem:[%s5490_s0 + $0x58] sm:$0xff]  ;;  %v4141_v32 = vld [vmem:[%s5490_s0 + $0x70] sm:$0xff]  ;;  %v4147_v33 = vld [vmem:[%s5490_s0 + $0x88] sm:$0xff] }
  0x30   :  { %3724 = vset.pattern.permute.xlu1 %v3923_v0  ;;  %v4155_v34 = vld [vmem:[%s5490_s0 + $0xa0] sm:$0xff]  ;;  %v4163_v35 = vld [vmem:[%s5490_s0 + $0xb8] sm:$0xff]  ;;  %v4184_v44 = vld [vmem:[%s5490_s0 + $0xb0] sm:$0xff] }
  0x31   :  { %297 = vperm.xlu0 %3727, %v4011_v5   ;;  %441 = vperm.xlu1 %3724, %v57_v3   ;;  %v82_v58 = vld [vmem:[%s5491_s1] sm:$0xf] }
  0x32   :  { %3170 = vmatpush3.bf16.msra.mxu0 %v3785_v17  ;;  %v4215_v60 = vrot.slane %v82_v58, %v382_v55  ;;  %v4217_v61 = vrot.slane %v82_v58, %v216_v56  ;;  %v4244_v17 = vld [vmem:[%s5490_s0 + $0xc8] sm:$0xff] }
  0x33   :  { %3171 = vmatprep.subr.bf16.mxu0 %v3927_v14 }
  0x35   :  { %309 = vperm.xlu0 %3727, %v4018_v6   ;;  %3725 = vset.pattern.permute.xlu1 %v3925_v7 }
  0x36   :  { %597 = vperm.xlu1 %3725, %v56_v2   ;;  %3172 = vmatpush3.bf16.msra.mxu0 %v3786_v18 }
  0x37   :  { %3173 = vmatprep.subr.bf16.mxu0 %v3927_v14 }
  0x39   :  { %3740 = vset.pattern.permute.xlu0 %v3925_v7 }
  0x3a   :  { %601 = vperm.xlu0 %3740, %v57_v3   ;;  %3726 = vset.pattern.permute.xlu1 %v3926_v9 }
  0x3b   :  { %96 = vperm.xlu1 %3726, %v58_v4   ;;  %3174 = vmatpush3.bf16.msra.mxu0 %v3787_v19 }
  0x3c   :  { %3175 = vmatprep.subr.bf16.mxu0 %v3927_v14 }
  0x3e   :  { %613 = vperm.xlu0 %3740, %v60_v8  }
  0x3f   :  { %101 = vperm.xlu1 %3726, %v4030_v10   ;;  %3176 = vmatpush3.bf16.msra.mxu0 %v3788_v20 }
  0x40   :  { %3177 = vmatprep.subr.bf16.mxu0 %v3927_v14 }
  0x42   :  { %625 = vperm.xlu0 %3740, %v4035_v11  }
  0x43   :  { %3728 = vset.pattern.permute.xlu1 %v3924_v1  ;;  %3178 = vmatpush3.bf16.msra.mxu0 %v3789_v21 }
  0x44   :  { %289 = vperm.xlu1 %3728, %v4030_v10   ;;  %3179 = vmatprep.subr.bf16.mxu0 %v3927_v14 }
  0x46   :  { %637 = vperm.xlu0 %3740, %v4041_v13  }
  0x47   :  { %3180 = vmatpush3.bf16.msra.mxu0 %v3790_v22 }
  0x48   :  { %3729 = vset.pattern.permute.xlu1 %v3923_v0  ;;  %3301 = vmatprep.subr.bf16.mxu0 %v3927_v14 }
  0x49   :  { %445 = vperm.xlu1 %3729, %v58_v4  }
  0x4a   :  { %649 = vperm.xlu0 %3740, %v4052_v16  }
  0x4d   :  { %3730 = vset.pattern.permute.xlu1 %v3925_v7 }
  0x4e   :  { %3752 = vset.pattern.permute.xlu0 %v3926_v9  ;;  %605 = vperm.xlu1 %3730, %v58_v4  }
  0x4f   :  { %86 = vperm.xlu0 %3752, %v56_v2   ;;  %v4223_v2 = vrot.slane %v82_v58, %v542_v59 }
  0x52   :  { %609 = vperm.xlu1 %3730, %v4030_v10  }
  0x53   :  { %91 = vperm.xlu0 %3752, %v57_v3   ;;  %v702_v3 = vsub.s32 3, %v215_v52 }
  0x56   :  { %3731 = vset.pattern.permute.xlu1 %v3926_v9 }
  0x57   :  { %106 = vperm.xlu0 %3752, %v60_v8   ;;  %111 = vperm.xlu1 %3731, %v4011_v5  }
  0x5b   :  { %121 = vperm.xlu0 %3752, %v4035_v11   ;;  %3732 = vset.pattern.permute.xlu1 %v3924_v1 }
  0x5c   :  { %293 = vperm.xlu1 %3732, %v60_v8  }
  0x5f   :  { %136 = vperm.xlu0 %3752, %v4041_v13  }
  0x60   :  { %3733 = vset.pattern.permute.xlu1 %v3923_v0 }
  0x61   :  { %453 = vperm.xlu1 %3733, %v60_v8  }
  0x63   :  { %151 = vperm.xlu0 %3752, %v4052_v16  }
  0x65   :  { %457 = vperm.xlu1 %3733, %v4011_v5  }
  0x67   :  { %166 = vperm.xlu0 %3752, %v4081_v23  }
  0x69   :  { %3734 = vset.pattern.permute.xlu1 %v3925_v7 }
  0x6a   :  { %617 = vperm.xlu1 %3734, %v4011_v5   ;;  %v4229_v5 = vld [vmem:[%s5492_s2] ss:$0 sm:$0xff] }
  0x6b   :  { %181 = vperm.xlu0 %3752, %v4088_v24  }
  0x6e   :  { %3735 = vset.pattern.permute.xlu1 %v3926_v9 }
  0x6f   :  { %3762 = vset.pattern.permute.xlu0 %v3923_v0  ;;  %116 = vperm.xlu1 %3735, %v62_v25  }
  0x70   :  { %449 = vperm.xlu0 %3762, %v4030_v10  }
  0x73   :  { %3736 = vset.pattern.permute.xlu1 %v3924_v1 }
  0x74   :  { %301 = vperm.xlu1 %3736, %v62_v25   ;;  %461 = vperm.xlu0 %3762, %v62_v25  }
  0x78   :  { %305 = vperm.xlu1 %3736, %v4035_v11   ;;  %473 = vperm.xlu0 %3762, %v65_v26  }
  0x7c   :  { %3737 = vset.pattern.permute.xlu1 %v3923_v0  ;;  %485 = vperm.xlu0 %3762, %v4107_v27  }
  0x7d   :  { %465 = vperm.xlu1 %3737, %v4035_v11  }
  0x80   :  { %497 = vperm.xlu0 %3762, %v4115_v28  }
  0x81   :  { %3738 = vset.pattern.permute.xlu1 %v3925_v7 }
  0x82   :  { %621 = vperm.xlu1 %3738, %v62_v25  }
  0x84   :  { %509 = vperm.xlu0 %3762, %v4122_v29  }
  0x86   :  { %3739 = vset.pattern.permute.xlu1 %v3926_v9 }
  0x87   :  { %126 = vperm.xlu1 %3739, %v4018_v6  }
  0x88   :  { %521 = vperm.xlu0 %3762, %v4128_v30  }
  0x8b   :  { %131 = vperm.xlu1 %3739, %v65_v26  }
  0x8c   :  { %3769 = vset.pattern.permute.xlu0 %v3924_v1 }
  0x8d   :  { %321 = vperm.xlu0 %3769, %v67_v31  }
  0x8f   :  { %3741 = vset.pattern.permute.xlu1 %v3924_v1 }
  0x90   :  { %313 = vperm.xlu1 %3741, %v65_v26  }
  0x91   :  { %333 = vperm.xlu0 %3769, %v4141_v32  }
  0x94   :  { %3742 = vset.pattern.permute.xlu1 %v3923_v0 }
  0x95   :  { %469 = vperm.xlu1 %3742, %v4018_v6   ;;  %345 = vperm.xlu0 %3769, %v4147_v33  }
  0x99   :  { %3743 = vset.pattern.permute.xlu1 %v3925_v7  ;;  %357 = vperm.xlu0 %3769, %v4155_v34  }
  0x9a   :  { %629 = vperm.xlu1 %3743, %v4018_v6  }
  0x9d   :  { %369 = vperm.xlu0 %3769, %v4163_v35  }
  0x9e   :  { %633 = vperm.xlu1 %3743, %v65_v26  }
  0xa1   :  { %3773 = vset.pattern.permute.xlu0 %v3925_v7 }
  0xa2   :  { %3744 = vset.pattern.permute.xlu1 %v3926_v9  ;;  %661 = vperm.xlu0 %3773, %v4081_v23  }
  0xa3   :  { %141 = vperm.xlu1 %3744, %v67_v31  }
  0xa6   :  { %673 = vperm.xlu0 %3773, %v4088_v24  }
  0xa7   :  { %3745 = vset.pattern.permute.xlu1 %v3924_v1  ;;  %v278_v36 = vpop.permute.xlu1 %277  ;;  %v438_v37 = vpop.permute.xlu0 %437 }
  0xa8   :  { %317 = vperm.xlu1 %3745, %v4041_v13   ;;  %v384_v6 = vmul.f32 %v4215_v60, %v278_v36  ;;  %v544_v8 = vmul.f32 %v4223_v2, %v438_v37 }
  0xaa   :  { %685 = vperm.xlu0 %3773, %v4184_v44  }
  0xab   :  { %v282_v38 = vpop.permute.xlu1 %281 }
  0xac   :  { %3746 = vset.pattern.permute.xlu1 %v3923_v0  ;;  %v4173_v39 = vpop.permute.xlu0 %285  ;;  %v385_v18 = vmul.f32 %v4215_v60, %v282_v38  ;;  %v4258_v38 = vld [vmem:[%s5490_s0 + $0xc0] sm:$0xff] }
  0xad   :  { %477 = vperm.xlu1 %3746, %v4041_v13   ;;  %v4237_v13 = vrot.slane %v82_v58, %v702_v3 }
  0xae   :  { %3775 = vset.pattern.permute.xlu0 %v3926_v9 }
  0xaf   :  { %196 = vperm.xlu0 %3775, %v4184_v44  }
  0xb0   :  { %v442_v40 = vpop.permute.xlu1 %441  ;;  %v4176_v41 = vpop.permute.xlu0 %297 }
  0xb1   :  { %481 = vperm.xlu1 %3746, %v67_v31   ;;  %v545_v25 = vmul.f32 %v4223_v2, %v442_v40 }
  0xb3   :  { %211 = vperm.xlu0 %3775, %v4244_v17  }
  0xb4   :  { %v4178_v42 = vpop.permute.xlu0 %309 }
  0xb5   :  { %3747 = vset.pattern.permute.xlu1 %v3925_v7  ;;  %v598_v43 = vpop.permute.xlu1 %597 }
  0xb6   :  { %641 = vperm.xlu1 %3747, %v67_v31   ;;  %v704_v26 = vmul.f32 %v4237_v13, %v598_v43 }
  0xb7   :  { %3779 = vset.pattern.permute.xlu0 %v3923_v0 }
  0xb8   :  { %533 = vperm.xlu0 %3779, %v4258_v38  }
  0xb9   :  { %v602_v45 = vpop.permute.xlu0 %601 }
  0xba   :  { %3748 = vset.pattern.permute.xlu1 %v3926_v9  ;;  %v4188_v46 = vpop.permute.xlu1 %96 }
  0xbb   :  { %146 = vperm.xlu1 %3748, %v4107_v27   ;;  %v220_v3 = vmul.f32 %v4217_v61, %v4188_v46 }
  0xbc   :  { %3782 = vset.pattern.permute.xlu0 %v3925_v7 }
  0xbd   :  { %v4191_v47 = vpop.permute.xlu0 %613  ;;  %697 = vperm.xlu0 %3782, %v4244_v17  }
  0xbe   :  { %v4194_v48 = vpop.permute.xlu1 %101 }
  0xbf   :  { %3749 = vset.pattern.permute.xlu1 %v3924_v1 }
  0xc0   :  { %325 = vperm.xlu1 %3749, %v4107_v27  }
  0xc1   :  { %v4199_v50 = vpop.permute.xlu0 %625 }
  0xc3   :  { %v4201_v51 = vpop.permute.xlu1 %289 }
  0xc4   :  { %329 = vperm.xlu1 %3749, %v4052_v16   ;;  %v387_v46 = vmul.f32 %v4215_v60, %v4201_v51 }
  0xc5   :  { %v4204_v53 = vpop.permute.xlu0 %637 }
  0xc8   :  { %3750 = vset.pattern.permute.xlu1 %v3923_v0  ;;  %v4207_v54 = vpop.permute.xlu1 %445 }
  0xc9   :  { %489 = vperm.xlu1 %3750, %v4052_v16   ;;  %v4210_v57 = vpop.permute.xlu0 %649 }
  0xcd   :  { %3751 = vset.pattern.permute.xlu1 %v3925_v7  ;;  %v4220_v62 = vpop.permute.xlu1 %605 }
  0xce   :  { %v87_v63 = vpop.permute.xlu0 %86  ;;  %645 = vperm.xlu1 %3751, %v4107_v27   ;;  %v705_v27 = vmul.f32 %v4237_v13, %v602_v45 }
  0xcf   :  { %v218_v4 = vmul.f32 %v4217_v61, %v87_v63 }
  0xd1   :  { %v250_v10 = vadd.f32 %v4229_v5, %v218_v4  ;;  %v4234_v11 = vpop.permute.xlu1 %609 }
  0xd2   :  { %v92_v12 = vpop.permute.xlu0 %91  ;;  %3753 = vset.pattern.permute.xlu1 %v3926_v9 }
  0xd3   :  { %v410_v15 = vadd.f32 %v384_v6, %v250_v10  ;;  %v219_v16 = vmul.f32 %v4217_v61, %v92_v12  ;;  %156 = vperm.xlu1 %3753, %v4141_v32   ;;  %v386_v6 = vmul.f32 %v4215_v60, %v4173_v39  ;;  %v221_v10 = vmul.f32 %v4217_v61, %v4194_v48 }
  0xd4   :  { %v706_v48 = vmul.f32 %v4237_v13, %v4220_v62 }
  0xd5   :  { %v570_v19 = vadd.f32 %v544_v8, %v410_v15  ;;  %v251_v20 = vadd.f32 %v4229_v5, %v219_v16  ;;  %v252_v8 = vadd.f32 %v4229_v5, %v220_v3 }
  0xd6   :  { %v112_v21 = vpop.permute.xlu1 %111  ;;  %v107_v22 = vpop.permute.xlu0 %106 }
  0xd7   :  { %v411_v31 = vadd.f32 %v385_v18, %v251_v20  ;;  %161 = vperm.xlu1 %3753, %v4115_v28   ;;  %v4253_v37 = vadd.f32 %v704_v26, %v570_v19  ;;  %v223_v16 = vmul.f32 %v4217_v61, %v112_v21  ;;  %v222_v39 = vmul.f32 %v4217_v61, %v107_v22 }
  0xd8   :  { %v253_v18 = vadd.f32 %v4229_v5, %v221_v10  ;;  %v412_v19 = vadd.f32 %v386_v6, %v252_v8  ;;  %v389_v20 = vmul.f32 %v4215_v60, %v4176_v41 }
  0xd9   :  { %v571_v36 = vadd.f32 %v545_v25, %v411_v31  ;;  %v756_v45 = vmax.f32 %v4253_v37, 0.0  ;;  %v254_v21 = vadd.f32 %v4229_v5, %v222_v39  ;;  %v707_v31 = vmul.f32 %v4237_v13, %v4234_v11 }
  0xda   :  { %v122_v49 = vpop.permute.xlu0 %121  ;;  %v413_v51 = vadd.f32 %v387_v46, %v253_v18  ;;  %v708_v46 = vmul.f32 %v4237_v13, %v4191_v47 }
  0xdb   :  { %3754 = vset.pattern.permute.xlu1 %v3924_v1  ;;  %v294_v40 = vpop.permute.xlu1 %293  ;;  %v4263_v43 = vadd.f32 %v705_v27, %v571_v36  ;;  %v225_v11 = vmul.f32 %v4217_v61, %v122_v49 }
  0xdc   :  { %337 = vperm.xlu1 %3754, %v4115_v28   ;;  %v388_v22 = vmul.f32 %v4215_v60, %v294_v40 }
  0xdd   :  { %v757_v52 = vmax.f32 %v4263_v43, 0.0  ;;  %v257_v49 = vadd.f32 %v4229_v5, %v225_v11 }
  0xde   :  { %v4268_v55 = vpop.permute.xlu0 %136  ;;  %v414_v6 = vadd.f32 %v388_v22, %v254_v21 }
  0xdf   :  { %v782_v56 = vpack.c.bf16 %v757_v52, %v756_v45 }
  0xe0   :  { %3755 = vset.pattern.permute.xlu1 %v3923_v0  ;;  %v454_v58 = vpop.permute.xlu1 %453 }
  0xe1   :  { %493 = vperm.xlu1 %3755, %v4141_v32   ;;  %3182 = vmatmul.mubr.bf16.vlgmr.msra.gmra.mrb[0].mxu0 %v782_v56  ;;  %v548_v41 = vmul.f32 %v4223_v2, %v454_v58 }
  0xe2   :  { %v4278_v59 = vpop.permute.xlu0 %151  ;;  %3185 = vmatprep.mubr.msk.bf16.mxu0 %vm3928_vm0, %v3927_v14 }
  0xe4   :  { %v458_v63 = vpop.permute.xlu1 %457 }
  0xe5   :  { %3756 = vset.pattern.permute.xlu1 %v3925_v7  ;;  %v549_v36 = vmul.f32 %v4223_v2, %v458_v63  ;;  %v574_v63 = vadd.f32 %v548_v41, %v414_v6 }
  0xe6   :  { %653 = vperm.xlu1 %3756, %v4141_v32   ;;  %v4286_v4 = vpop.permute.xlu0 %166  ;;  %v546_v32 = vmul.f32 %v4223_v2, %v4207_v54  ;;  %v255_v54 = vadd.f32 %v4229_v5, %v223_v16 }
  0xe8   :  { %v572_v25 = vadd.f32 %v546_v32, %v412_v19  ;;  %v415_v8 = vadd.f32 %v389_v20, %v255_v54 }
  0xe9   :  { %v618_v12 = vpop.permute.xlu1 %617 }
  0xea   :  { %657 = vperm.xlu1 %3756, %v4115_v28   ;;  %v4294_v15 = vpop.permute.xlu0 %181  ;;  %v4313_v62 = vadd.f32 %v706_v48, %v572_v25  ;;  %v709_v10 = vmul.f32 %v4237_v13, %v618_v12  ;;  %v575_v32 = vadd.f32 %v549_v36, %v415_v8  ;;  %v4340_v48 = vadd.f32 %v708_v46, %v574_v63 }
  0xec   :  { %v758_v58 = vmax.f32 %v4313_v62, 0.0  ;;  %v4329_v18 = vadd.f32 %v709_v10, %v575_v32 }
  0xee   :  { %3757 = vset.pattern.permute.xlu1 %v3926_v9  ;;  %v117_v28 = vpop.permute.xlu1 %116 }
  0xef   :  { %v450_v26 = vpop.permute.xlu0 %449  ;;  %171 = vperm.xlu1 %3757, %v4147_v33   ;;  %v224_v12 = vmul.f32 %v4217_v61, %v117_v28  ;;  %v761_v28 = vmax.f32 %v4329_v18, 0.0 }
  0xf0   :  { %v547_v27 = vmul.f32 %v4223_v2, %v450_v26 }
  0xf1   :  { %v256_v25 = vadd.f32 %v4229_v5, %v224_v12 }
  0xf2   :  { %v573_v56 = vadd.f32 %v547_v27, %v413_v51 }
  0xf3   :  { %3758 = vset.pattern.permute.xlu1 %v3924_v1  ;;  %v302_v3 = vpop.permute.xlu1 %301  ;;  %v462_v51 = vpop.permute.xlu0 %461 }
  0xf4   :  { %v4321_v40 = vadd.f32 %v707_v31, %v573_v56  ;;  %341 = vperm.xlu1 %3758, %v4081_v23   ;;  %v390_v20 = vmul.f32 %v4215_v60, %v302_v3  ;;  %v550_v27 = vmul.f32 %v4223_v2, %v462_v51  ;;  %v760_v31 = vmax.f32 %v4340_v48, 0.0 }
  0xf6   :  { %v759_v16 = vmax.f32 %v4321_v40, 0.0  ;;  %v416_v22 = vadd.f32 %v390_v20, %v256_v25  ;;  %v784_v36 = vpack.c.bf16 %v761_v28, %v760_v31  ;;  %v392_v20 = vmul.f32 %v4215_v60, %v4178_v42 }
  0xf7   :  { %v306_v39 = vpop.permute.xlu1 %305 }
  0xf8   :  { %3759 = vset.pattern.permute.xlu1 %v3923_v0  ;;  %v783_v47 = vpack.c.bf16 %v759_v16, %v758_v58  ;;  %v391_v19 = vmul.f32 %v4215_v60, %v306_v39  ;;  %v576_v3 = vadd.f32 %v550_v27, %v416_v22  ;;  %v474_v39 = vpop.permute.xlu0 %473 }
  0xf9   :  { %501 = vperm.xlu1 %3759, %v4081_v23   ;;  %v711_v23 = vmul.f32 %v4237_v13, %v4199_v50  ;;  %v553_v22 = vmul.f32 %v4223_v2, %v474_v39 }
  0xfa   :  { %3186 = vmatmul.mubr.bf16.gmra.mrb[4].mxu0 %v783_v47  ;;  %v417_v54 = vadd.f32 %v391_v19, %v257_v49 }
  0xfb   :  { %3189 = vmatprep.mubr.msk.bf16.mxu0 %vm3928_vm0, %v3927_v14 }
  0xfc   :  { %v466_v26 = vpop.permute.xlu1 %465  ;;  %v4382_v19 = vpop.permute.xlu0 %485 }
  0xfd   :  { %v551_v21 = vmul.f32 %v4223_v2, %v466_v26  ;;  %505 = vperm.xlu1 %3759, %v4147_v33  }
  0xff   :  { %v577_v41 = vadd.f32 %v551_v21, %v417_v54 }
 0x100   :  { %v4395_v42 = vpop.permute.xlu0 %497 }
 0x101   :  { %3760 = vset.pattern.permute.xlu1 %v3925_v7  ;;  %v622_v56 = vpop.permute.xlu1 %621  ;;  %v4358_v6 = vadd.f32 %v711_v23, %v577_v41 }
 0x102   :  { %v710_v8 = vmul.f32 %v4237_v13, %v622_v56  ;;  %665 = vperm.xlu1 %3760, %v4147_v33   ;;  %3190 = vmatmul.mubr.bf16.gmra.mrb[8].mxu0 %v784_v36  ;;  %v3791_v36 = vld [vmem:[#allocation5] sm:$0xff]  }
 0x103   :  { %3193 = vmatprep.mubr.msk.bf16.mxu0 %vm3928_vm0, %v3927_v14  ;;  %v763_v11 = vmax.f32 %v4358_v6, 0.0  ;;  %3234 = vmatpush3.bf16.msra.mxu1 %v3791_v36 }
 0x104   :  { %v4364_v50 = vadd.f32 %v710_v8, %v576_v3  ;;  %3235 = vmatprep.subr.bf16.mxu1 %v3927_v14 }
 0x106   :  { %v762_v10 = vmax.f32 %v4364_v50, 0.0  ;;  %3761 = vset.pattern.permute.xlu1 %v3926_v9  ;;  %v127_v46 = vpop.permute.xlu1 %126 }
 0x107   :  { %176 = vperm.xlu1 %3761, %v4122_v29   ;;  %v226_v12 = vmul.f32 %v4217_v61, %v127_v46 }
 0x108   :  { %v785_v33 = vpack.c.bf16 %v763_v11, %v762_v10 }
 0x109   :  { %v258_v51 = vadd.f32 %v4229_v5, %v226_v12 }
 0x10a   :  { %3194 = vmatmul.mubr.bf16.gmra.mrb[12].mxu0 %v785_v33  ;;  %v132_v63 = vpop.permute.xlu1 %131 }
 0x10b   :  { %3763 = vset.pattern.permute.xlu1 %v3924_v1  ;;  %3197 = vmatprep.mubr.msk.bf16.mxu0 %vm3928_vm0, %v3927_v14  ;;  %v227_v47 = vmul.f32 %v4217_v61, %v132_v63  ;;  %v418_v27 = vadd.f32 %v392_v20, %v258_v51  ;;  %v4405_v63 = vpop.permute.xlu0 %509  ;;  %v228_v20 = vmul.f32 %v4217_v61, %v4268_v55 }
 0x10c   :  { %349 = vperm.xlu1 %3763, %v4122_v29  }
 0x10d   :  { %v259_v26 = vadd.f32 %v4229_v5, %v227_v47 }
 0x10f   :  { %v314_v32 = vpop.permute.xlu1 %313  ;;  %v4417_v51 = vpop.permute.xlu0 %521 }
 0x110   :  { %353 = vperm.xlu1 %3763, %v4088_v24   ;;  %v393_v25 = vmul.f32 %v4215_v60, %v314_v32 }
 0x112   :  { %v419_v23 = vadd.f32 %v393_v25, %v259_v26  ;;  %v3794_v26 = vld [vmem:[#allocation5 + $0x18] sm:$0xff]  }
 0x114   :  { %3764 = vset.pattern.permute.xlu1 %v3923_v0  ;;  %v470_v49 = vpop.permute.xlu1 %469  ;;  %v579_v3 = vadd.f32 %v553_v22, %v419_v23  ;;  %v3795_v22 = vld [vmem:[#allocation5 + $0x20] sm:$0xff]  }
 0x115   :  { %513 = vperm.xlu1 %3764, %v4088_v24   ;;  %v552_v54 = vmul.f32 %v4223_v2, %v470_v49  ;;  %v3793_v49 = vld [vmem:[#allocation5 + $0x10] sm:$0xff]  }
 0x117   :  { %v578_v41 = vadd.f32 %v552_v54, %v418_v27  ;;  %v260_v54 = vadd.f32 %v4229_v5, %v228_v20  ;;  %v714_v27 = vmul.f32 %v4237_v13, %v4204_v53  ;;  %v3797_v20 = vld [vmem:[#allocation5 + $0x30] sm:$0xff]  }
 0x119   :  { %3765 = vset.pattern.permute.xlu1 %v3925_v7  ;;  %v630_v21 = vpop.permute.xlu1 %629 }
 0x11a   :  { %v712_v24 = vmul.f32 %v4237_v13, %v630_v21  ;;  %669 = vperm.xlu1 %3765, %v4122_v29   ;;  %v3792_v29 = vld [vmem:[#allocation5 + $0x8] sm:$0xff]  }
 0x11b   :  { %3236 = vmatpush3.bf16.msra.mxu1 %v3792_v29 }
 0x11c   :  { %v4397_v8 = vadd.f32 %v712_v24, %v578_v41  ;;  %3237 = vmatprep.subr.bf16.mxu1 %v3927_v14  ;;  %v322_v24 = vpop.permute.xlu0 %321 }
 0x11d   :  { %v634_v56 = vpop.permute.xlu1 %633 }
 0x11e   :  { %v713_v46 = vmul.f32 %v4237_v13, %v634_v56  ;;  %3766 = vset.pattern.permute.xlu1 %v3926_v9  ;;  %v764_v32 = vmax.f32 %v4397_v8, 0.0  ;;  %v3811_v8 = vld [vmem:[#allocation5 + $0x60] sm:$0xff]  }
 0x11f   :  { %186 = vperm.xlu1 %3766, %v4155_v34   ;;  %3238 = vmatpush3.bf16.msra.mxu1 %v3793_v49 }
 0x120   :  { %v4403_v33 = vadd.f32 %v713_v46, %v579_v3  ;;  %3239 = vmatprep.subr.bf16.mxu1 %v3927_v14  ;;  %v395_v46 = vmul.f32 %v4215_v60, %v322_v24  ;;  %v231_v24 = vmul.f32 %v4217_v61, %v4278_v59 }
 0x122   :  { %v765_v39 = vmax.f32 %v4403_v33, 0.0  ;;  %v142_v12 = vpop.permute.xlu1 %141  ;;  %v3812_v33 = vld [vmem:[#allocation5 + $0x68] sm:$0xff]  }
 0x123   :  { %191 = vperm.xlu1 %3766, %v4128_v30   ;;  %3240 = vmatpush3.bf16.msra.mxu1 %v3794_v26  ;;  %v229_v55 = vmul.f32 %v4217_v61, %v142_v12  ;;  %v3796_v12 = vld [vmem:[#allocation5 + $0x28] sm:$0xff]  }
 0x124   :  { %v786_v47 = vpack.c.bf16 %v765_v39, %v764_v32  ;;  %3241 = vmatprep.subr.bf16.mxu1 %v3927_v14 }
 0x125   :  { %v261_v3 = vadd.f32 %v4229_v5, %v229_v55  ;;  %v3798_v55 = vld [vmem:[#allocation5 + $0x38] sm:$0xff]  }
 0x126   :  { %3198 = vmatmul.mubr.bf16.gmra.mrb[16].mxu0 %v786_v47 }
 0x127   :  { %3767 = vset.pattern.permute.xlu1 %v3924_v1  ;;  %v318_v25 = vpop.permute.xlu1 %317  ;;  %3201 = vmatprep.mubr.msk.bf16.mxu0 %vm3928_vm0, %v3927_v14  ;;  %v421_v49 = vadd.f32 %v395_v46, %v261_v3 }
 0x128   :  { %361 = vperm.xlu1 %3767, %v4128_v30   ;;  %v394_v21 = vmul.f32 %v4215_v60, %v318_v25  ;;  %3242 = vmatpush3.bf16.msra.mxu1 %v3795_v22 }
 0x129   :  { %3243 = vmatprep.subr.bf16.mxu1 %v3927_v14 }
 0x12a   :  { %v420_v41 = vadd.f32 %v394_v21, %v260_v54 }
 0x12c   :  { %3768 = vset.pattern.permute.xlu1 %v3923_v0  ;;  %v478_v23 = vpop.permute.xlu1 %477  ;;  %3244 = vmatpush3.bf16.msra.mxu1 %v3796_v12 }
 0x12d   :  { %v554_v36 = vmul.f32 %v4223_v2, %v478_v23  ;;  %517 = vperm.xlu1 %3768, %v4155_v34   ;;  %3245 = vmatprep.subr.bf16.mxu1 %v3927_v14 }
 0x12f   :  { %v580_v56 = vadd.f32 %v554_v36, %v420_v41 }
 0x130   :  { %v482_v29 = vpop.permute.xlu1 %481  ;;  %3246 = vmatpush3.bf16.msra.mxu1 %v3797_v20  ;;  %v556_v20 = vmul.f32 %v4223_v2, %v4382_v19 }
 0x131   :  { %v4436_v47 = vadd.f32 %v714_v27, %v580_v56  ;;  %3770 = vset.pattern.permute.xlu1 %v3925_v7  ;;  %v555_v53 = vmul.f32 %v4223_v2, %v482_v29  ;;  %3247 = vmatprep.subr.bf16.mxu1 %v3927_v14  ;;  %v263_v56 = vadd.f32 %v4229_v5, %v231_v24 }
 0x132   :  { %677 = vperm.xlu1 %3770, %v4155_v34  }
 0x133   :  { %v581_v26 = vadd.f32 %v555_v53, %v421_v49  ;;  %v766_v23 = vmax.f32 %v4436_v47, 0.0  ;;  %v717_v53 = vmul.f32 %v4237_v13, %v4210_v57 }
 0x134   :  { %3248 = vmatpush3.bf16.msra.mxu1 %v3798_v55 }
 0x135   :  { %v642_v25 = vpop.permute.xlu1 %641  ;;  %3369 = vmatprep.subr.bf16.mxu1 %v3927_v14 }
 0x136   :  { %v715_v54 = vmul.f32 %v4237_v13, %v642_v25  ;;  %681 = vperm.xlu1 %3770, %v4128_v30  }
 0x138   :  { %v4445_v21 = vadd.f32 %v715_v54, %v581_v26 }
 0x13a   :  { %v5510_v34 = vmax.f32 %v4445_v21, 0.0  ;;  %3771 = vset.pattern.permute.xlu1 %v3926_v9  ;;  %v147_v22 = vpop.permute.xlu1 %146 }
 0x13b   :  { %201 = vperm.xlu1 %3771, %v4163_v35   ;;  %v230_v36 = vmul.f32 %v4217_v61, %v147_v22 }
 0x13c   :  { %v787_v30 = vpack.c.bf16 %v5510_v34, %v766_v23 }
 0x13d   :  { %v262_v29 = vadd.f32 %v4229_v5, %v230_v36  ;;  %v334_v36 = vpop.permute.xlu0 %333 }
 0x13e   :  { %3202 = vmatmul.mubr.bf16.gmra.mrb[20].mxu0 %v787_v30 }
 0x13f   :  { %3772 = vset.pattern.permute.xlu1 %v3924_v1  ;;  %v326_v27 = vpop.permute.xlu1 %325  ;;  %3205 = vmatprep.mubr.msk.bf16.mxu0 %vm3928_vm0, %v3927_v14 }
 0x140   :  { %365 = vperm.xlu1 %3772, %v4184_v44   ;;  %v396_v46 = vmul.f32 %v4215_v60, %v326_v27 }
 0x142   :  { %v422_v25 = vadd.f32 %v396_v46, %v262_v29  ;;  %v398_v46 = vmul.f32 %v4215_v60, %v334_v36 }
 0x143   :  { %v330_v41 = vpop.permute.xlu1 %329 }
 0x144   :  { %3774 = vset.pattern.permute.xlu1 %v3923_v0  ;;  %v397_v3 = vmul.f32 %v4215_v60, %v330_v41  ;;  %v582_v55 = vadd.f32 %v556_v20, %v422_v25 }
 0x145   :  { %525 = vperm.xlu1 %3774, %v4184_v44  }
 0x146   :  { %v423_v59 = vadd.f32 %v397_v3, %v263_v56 }
 0x148   :  { %v490_v12 = vpop.permute.xlu1 %489 }
 0x149   :  { %v557_v49 = vmul.f32 %v4223_v2, %v490_v12  ;;  %529 = vperm.xlu1 %3774, %v4163_v35  }
 0x14b   :  { %v583_v26 = vadd.f32 %v557_v49, %v423_v59  ;;  %v559_v49 = vmul.f32 %v4223_v2, %v4395_v42 }
 0x14d   :  { %v4475_v54 = vadd.f32 %v717_v53, %v583_v26  ;;  %3776 = vset.pattern.permute.xlu1 %v3925_v7  ;;  %v646_v44 = vpop.permute.xlu1 %645 }
 0x14e   :  { %v716_v22 = vmul.f32 %v4237_v13, %v646_v44  ;;  %689 = vperm.xlu1 %3776, %v4163_v35   ;;  %v346_v44 = vpop.permute.xlu0 %345 }
 0x14f   :  { %v5508_v30 = vmax.f32 %v4475_v54, 0.0 }
 0x150   :  { %v4480_v57 = vadd.f32 %v716_v22, %v582_v55 }
 0x152   :  { %v5509_v27 = vmax.f32 %v4480_v57, 0.0  ;;  %3777 = vset.pattern.permute.xlu1 %v3926_v9  ;;  %v157_v19 = vpop.permute.xlu1 %156 }
 0x153   :  { %206 = vperm.xlu1 %3777, %v4258_v38   ;;  %v232_v9 = vmul.f32 %v4217_v61, %v157_v19 }
 0x154   :  { %v788_v24 = vpack.c.bf16 %v5508_v30, %v5509_v27 }
 0x156   :  { %3206 = vmatmul.mubr.bf16.gmra.mrb[24].mxu0 %v788_v24  ;;  %v162_v41 = vpop.permute.xlu1 %161 }
 0x157   :  { %3778 = vset.pattern.permute.xlu1 %v3924_v1  ;;  %3209 = vmatprep.mubr.msk.bf16.mxu0 %vm3928_vm0, %v3927_v14  ;;  %v233_v56 = vmul.f32 %v4217_v61, %v162_v41  ;;  %v264_v1 = vadd.f32 %v4229_v5, %v232_v9 }
 0x158   :  { %373 = vperm.xlu1 %3778, %v4258_v38  }
 0x159   :  { %v265_v12 = vadd.f32 %v4229_v5, %v233_v56  ;;  %v234_v56 = vmul.f32 %v4217_v61, %v4286_v4 }
 0x15b   :  { %v338_v35 = vpop.permute.xlu1 %337 }
 0x15c   :  { %377 = vperm.xlu1 %3778, %v4244_v17   ;;  %v399_v29 = vmul.f32 %v4215_v60, %v338_v35  ;;  %v4516_v35 = vpop.permute.xlu0 %357 }
 0x15e   :  { %v425_v20 = vadd.f32 %v399_v29, %v265_v12  ;;  %v266_v29 = vadd.f32 %v4229_v5, %v234_v56 }
 0x160   :  { %3780 = vset.pattern.permute.xlu1 %v3923_v0  ;;  %v494_v3 = vpop.permute.xlu1 %493  ;;  %v424_v0 = vadd.f32 %v398_v46, %v264_v1  ;;  %v585_v22 = vadd.f32 %v559_v49, %v425_v20  ;;  %v4524_v36 = vpop.permute.xlu0 %369 }
 0x161   :  { %537 = vperm.xlu1 %3780, %v4244_v17   ;;  %v558_v53 = vmul.f32 %v4223_v2, %v494_v3 }
 0x163   :  { %v584_v25 = vadd.f32 %v558_v53, %v424_v0 }
 0x164   :  { %v662_v53 = vpop.permute.xlu0 %661 }
 0x165   :  { %3781 = vset.pattern.permute.xlu1 %v3925_v7  ;;  %v654_v59 = vpop.permute.xlu1 %653 }
 0x166   :  { %v718_v17 = vmul.f32 %v4237_v13, %v654_v59  ;;  %693 = vperm.xlu1 %3781, %v4258_v38   ;;  %v401_v59 = vmul.f32 %v4215_v60, %v346_v44 }
 0x168   :  { %v4509_v55 = vadd.f32 %v718_v17, %v584_v25  ;;  %v720_v25 = vmul.f32 %v4237_v13, %v662_v53 }
 0x169   :  { %v658_v26 = vpop.permute.xlu1 %657 }
 0x16a   :  { %v719_v19 = vmul.f32 %v4237_v13, %v658_v26  ;;  %v5507_v7 = vmax.f32 %v4509_v55, 0.0 }
 0x16c   :  { %v4512_v24 = vadd.f32 %v719_v19, %v585_v22 }
 0x16e   :  { %v5504_v42 = vmax.f32 %v4512_v24, 0.0  ;;  %v172_v41 = vpop.permute.xlu1 %171 }
 0x16f   :  { %v235_v3 = vmul.f32 %v4217_v61, %v172_v41 }
 0x170   :  { %v789_v38 = vpack.c.bf16 %v5504_v42, %v5507_v7 }
 0x171   :  { %v267_v49 = vadd.f32 %v4229_v5, %v235_v3 }
 0x172   :  { %3210 = vmatmul.mubr.bf16.gmra.mrb[28].mxu0 %v789_v38 }
 0x173   :  { %v342_v9 = vpop.permute.xlu1 %341  ;;  %3213 = vmatprep.mubr.msk.bf16.mxu0 %vm3928_vm0, %v3927_v14  ;;  %v427_v26 = vadd.f32 %v401_v59, %v267_v49 }
 0x174   :  { %v400_v1 = vmul.f32 %v4215_v60, %v342_v9 }
 0x176   :  { %v426_v0 = vadd.f32 %v400_v1, %v266_v29  ;;  %v237_v29 = vmul.f32 %v4217_v61, %v4294_v15 }
 0x178   :  { %v502_v46 = vpop.permute.xlu1 %501 }
 0x179   :  { %v560_v12 = vmul.f32 %v4223_v2, %v502_v46 }
 0x17b   :  { %v586_v17 = vadd.f32 %v560_v12, %v426_v0  ;;  %v269_v0 = vadd.f32 %v4229_v5, %v237_v29 }
 0x17c   :  { %v506_v20 = vpop.permute.xlu1 %505 }
 0x17d   :  { %v561_v4 = vmul.f32 %v4223_v2, %v506_v20  ;;  %v4536_v19 = vadd.f32 %v720_v25, %v586_v17  ;;  %v674_v20 = vpop.permute.xlu0 %673 }
 0x17f   :  { %v587_v41 = vadd.f32 %v561_v4, %v427_v26  ;;  %v5501_v44 = vmax.f32 %v4536_v19, 0.0 }
 0x181   :  { %v666_v22 = vpop.permute.xlu1 %665 }
 0x182   :  { %v721_v38 = vmul.f32 %v4237_v13, %v666_v22 }
 0x184   :  { %v4539_v9 = vadd.f32 %v721_v38, %v587_v41  ;;  %v723_v41 = vmul.f32 %v4237_v13, %v674_v20  ;;  %v562_v38 = vmul.f32 %v4223_v2, %v4405_v63 }
 0x186   :  { %v5500_v56 = vmax.f32 %v4539_v9, 0.0  ;;  %v177_v3 = vpop.permute.xlu1 %176 }
 0x187   :  { %v236_v53 = vmul.f32 %v4217_v61, %v177_v3 }
 0x188   :  { %v790_v1 = vpack.c.bf16 %v5500_v56, %v5501_v44 }
 0x189   :  { %v268_v17 = vadd.f32 %v4229_v5, %v236_v53 }
 0x18a   :  { %3214 = vmatmul.mubr.bf16.gmra.mrb[32].mxu0 %v790_v1 }
 0x18b   :  { %v350_v46 = vpop.permute.xlu1 %349  ;;  %3217 = vmatprep.mubr.msk.bf16.mxu0 %vm3928_vm0, %v3927_v14 }
 0x18c   :  { %v402_v49 = vmul.f32 %v4215_v60, %v350_v46 }
 0x18e   :  { %v428_v22 = vadd.f32 %v402_v49, %v268_v17 }
 0x18f   :  { %v354_v12 = vpop.permute.xlu1 %353 }
 0x190   :  { %v403_v59 = vmul.f32 %v4215_v60, %v354_v12  ;;  %v588_v46 = vadd.f32 %v562_v38, %v428_v22 }
 0x192   :  { %v429_v4 = vadd.f32 %v403_v59, %v269_v0 }
 0x194   :  { %v514_v25 = vpop.permute.xlu1 %513 }
 0x195   :  { %v563_v26 = vmul.f32 %v4223_v2, %v514_v25 }
 0x197   :  { %v589_v15 = vadd.f32 %v563_v26, %v429_v4  ;;  %v404_v26 = vmul.f32 %v4215_v60, %v4516_v35  ;;  %v565_v35 = vmul.f32 %v4223_v2, %v4417_v51 }
 0x199   :  { %v670_v3 = vpop.permute.xlu1 %669  ;;  %v4560_v1 = vadd.f32 %v723_v41, %v589_v15 }
 0x19a   :  { %v722_v29 = vmul.f32 %v4237_v13, %v670_v3 }
 0x19b   :  { %v5498_v53 = vmax.f32 %v4560_v1, 0.0 }
 0x19c   :  { %v4563_v12 = vadd.f32 %v722_v29, %v588_v46 }
 0x19e   :  { %v5499_v59 = vmax.f32 %v4563_v12, 0.0  ;;  %v187_v0 = vpop.permute.xlu1 %186 }
 0x19f   :  { %v238_v17 = vmul.f32 %v4217_v61, %v187_v0  ;;  %v4585_v0 = vld [vmem:[%s5494_s4] ss:$0 sm:$0xff] }
 0x1a0   :  { %v791_v49 = vpack.c.bf16 %v5498_v53, %v5499_v59  ;;  %v686_v59 = vpop.permute.xlu0 %685 }
 0x1a1   :  { %v270_v22 = vadd.f32 %v4229_v5, %v238_v17 }
 0x1a2   :  { %3218 = vmatmul.mubr.bf16.gmra.mrb[36].mxu0 %v791_v49  ;;  %v192_v63 = vpop.permute.xlu1 %191 }
 0x1a3   :  { %3221 = vmatprep.mubr.msk.bf16.mxu0 %vm3928_vm0, %v3927_v14  ;;  %v239_v25 = vmul.f32 %v4217_v61, %v192_v63  ;;  %v430_v29 = vadd.f32 %v404_v26, %v270_v22 }
 0x1a5   :  { %v271_v15 = vadd.f32 %v4229_v5, %v239_v25 }
 0x1a7   :  { %v362_v20 = vpop.permute.xlu1 %361 }
 0x1a8   :  { %v405_v41 = vmul.f32 %v4215_v60, %v362_v20 }
 0x1aa   :  { %v431_v46 = vadd.f32 %v405_v41, %v271_v15 }
 0x1ac   :  { %v518_v4 = vpop.permute.xlu1 %517  ;;  %v591_v41 = vadd.f32 %v565_v35, %v431_v46  ;;  %v197_v46 = vpop.permute.xlu0 %196 }
 0x1ad   :  { %v564_v38 = vmul.f32 %v4223_v2, %v518_v4  ;;  %v240_v35 = vmul.f32 %v4217_v61, %v197_v46 }
 0x1af   :  { %v590_v63 = vadd.f32 %v564_v38, %v430_v29 }
 0x1b1   :  { %v678_v3 = vpop.permute.xlu1 %677 }
 0x1b2   :  { %v724_v49 = vmul.f32 %v4237_v13, %v678_v3 }
 0x1b4   :  { %v900_v17 = vpop.f32.mrb[0].mxu0  ;;  %v4590_v4 = vadd.f32 %v724_v49, %v590_v63 }
 0x1b5   :  { %v901_v20 = vadd.f32 %v4585_v0, %v900_v17  ;;  %v3183_v25 = vpop.f32.mrb[1].mxu0  ;;  %v682_v53 = vpop.permute.xlu1 %681 }
 0x1b6   :  { %v725_v26 = vmul.f32 %v4237_v13, %v682_v53  ;;  %v903_v22 = vpop.f32.mrb[2].mxu0  ;;  %v5503_v38 = vmax.f32 %v4590_v4, 0.0 }
 0x1b7   :  { %v904_v15 = vadd.f32 %v4585_v0, %v903_v22  ;;  %v3184_v3 = vpop.f32.mrb[3].mxu0  ;;  %v1003_v44 = vmax.f32 %v901_v20, 0.0 }
 0x1b8   :  { %v4594_v56 = vadd.f32 %v725_v26, %v591_v41 }
 0x1b9   :  { %v1004_v51 = vmax.f32 %v904_v15, 0.0 }
 0x1ba   :  { %v5502_v29 = vmax.f32 %v4594_v56, 0.0  ;;  %v202_v17 = vpop.permute.xlu1 %201 }
 0x1bb   :  { %v1029_v25 = vpack.c.bf16 %v1004_v51, %v1003_v44  ;;  %v241_v63 = vmul.f32 %v4217_v61, %v202_v17  ;;  %v272_v44 = vadd.f32 %v4229_v5, %v240_v35  ;;  %v407_v51 = vmul.f32 %v4215_v60, %v4524_v36 }
 0x1bc   :  { %v792_v53 = vpack.c.bf16 %v5502_v29, %v5503_v38 }
 0x1bd   :  { %3250 = vmatmul.mubr.bf16.vlgmr.msra.gmra.mrb[0].mxu1 %v1029_v25  ;;  %v273_v22 = vadd.f32 %v4229_v5, %v241_v63  ;;  %v726_v25 = vmul.f32 %v4237_v13, %v686_v59 }
 0x1be   :  { %3222 = vmatmul.mubr.bf16.gmra.mrb[40].mxu0 %v792_v53  ;;  %3253 = vmatprep.mubr.msk.bf16.mxu1 %vm3928_vm0, %v3927_v14 }
 0x1bf   :  { %v366_v49 = vpop.permute.xlu1 %365  ;;  %3225 = vmatprep.mubr.msk.bf16.mxu0 %vm3928_vm0, %v3927_v14  ;;  %v433_v17 = vadd.f32 %v407_v51, %v273_v22 }
 0x1c0   :  { %v406_v20 = vmul.f32 %v4215_v60, %v366_v49 }
 0x1c2   :  { %v432_v15 = vadd.f32 %v406_v20, %v272_v44 }
 0x1c4   :  { %v526_v41 = vpop.permute.xlu1 %525 }
 0x1c5   :  { %v566_v26 = vmul.f32 %v4223_v2, %v526_v41 }
 0x1c7   :  { %v592_v53 = vadd.f32 %v566_v26, %v432_v15 }
 0x1c8   :  { %v530_v3 = vpop.permute.xlu1 %529 }
 0x1c9   :  { %v567_v46 = vmul.f32 %v4223_v2, %v530_v3  ;;  %v4616_v38 = vadd.f32 %v726_v25, %v592_v53  ;;  %v212_v53 = vpop.permute.xlu0 %211 }
 0x1cb   :  { %v593_v49 = vadd.f32 %v567_v46, %v433_v17  ;;  %v5506_v26 = vmax.f32 %v4616_v38, 0.0 }
 0x1cd   :  { %v908_v29 = vpop.f32.mrb[4].mxu0  ;;  %v690_v35 = vpop.permute.xlu1 %689 }
 0x1ce   :  { %v909_v41 = vadd.f32 %v4585_v0, %v908_v29  ;;  %v727_v63 = vmul.f32 %v4237_v13, %v690_v35  ;;  %v3187_v44 = vpop.f32.mrb[5].mxu0 }
 0x1cf   :  { %v911_v20 = vpop.f32.mrb[6].mxu0 }
 0x1d0   :  { %v4620_v42 = vadd.f32 %v727_v63, %v593_v49  ;;  %v912_v36 = vadd.f32 %v4585_v0, %v911_v20  ;;  %v3188_v59 = vpop.f32.mrb[7].mxu0  ;;  %v1005_v15 = vmax.f32 %v909_v41, 0.0 }
 0x1d1   :  { %v243_v59 = vmul.f32 %v4217_v61, %v212_v53 }
 0x1d2   :  { %v5505_v22 = vmax.f32 %v4620_v42, 0.0  ;;  %v1006_v3 = vmax.f32 %v912_v36, 0.0  ;;  %v207_v51 = vpop.permute.xlu1 %206 }
 0x1d4   :  { %v1030_v25 = vpack.c.bf16 %v1006_v3, %v1005_v15  ;;  %v793_v29 = vpack.c.bf16 %v5505_v22, %v5506_v26  ;;  %v534_v15 = vpop.permute.xlu0 %533 }
 0x1d5   :  { %v916_v46 = vpop.f32.mrb[8].mxu0 }
 0x1d6   :  { %v917_v17 = vadd.f32 %v4585_v0, %v916_v46  ;;  %v3191_v35 = vpop.f32.mrb[9].mxu0  ;;  %3226 = vmatmul.mubr.bf16.gmra.mrb[44].mxu0 %v793_v29  ;;  %3254 = vmatmul.mubr.bf16.gmra.mrb[4].mxu1 %v1030_v25  ;;  %v242_v29 = vmul.f32 %v4217_v61, %v207_v51 }
 0x1d7   :  { %v919_v49 = vpop.f32.mrb[10].mxu0  ;;  %v374_v63 = vpop.permute.xlu1 %373  ;;  %3257 = vmatprep.mubr.msk.bf16.mxu1 %vm3928_vm0, %v3927_v14  ;;  %3229 = vmatprep.mubr.msk.bf16.mxu0 %vm3928_vm0, %v3927_v14 }
 0x1d8   :  { %v920_v41 = vadd.f32 %v4585_v0, %v919_v49  ;;  %v3192_v44 = vpop.f32.mrb[11].mxu0  ;;  %v1007_v20 = vmax.f32 %v917_v17, 0.0  ;;  %v408_v22 = vmul.f32 %v4215_v60, %v374_v63  ;;  %v275_v49 = vadd.f32 %v4229_v5, %v243_v59 }
 0x1d9   :  { %v274_v53 = vadd.f32 %v4229_v5, %v242_v29 }
 0x1da   :  { %v1008_v36 = vmax.f32 %v920_v41, 0.0  ;;  %v698_v41 = vpop.permute.xlu0 %697 }
 0x1db   :  { %v378_v3 = vpop.permute.xlu1 %377  ;;  %v729_v59 = vmul.f32 %v4237_v13, %v698_v41 }
 0x1dc   :  { %v1031_v25 = vpack.c.bf16 %v1008_v36, %v1007_v20  ;;  %v409_v46 = vmul.f32 %v4215_v60, %v378_v3  ;;  %v568_v20 = vmul.f32 %v4223_v2, %v534_v15 }
 0x1dd   :  { %v924_v35 = vpop.f32.mrb[12].mxu0 }
 0x1de   :  { %v925_v26 = vadd.f32 %v4585_v0, %v924_v35  ;;  %v3195_v7 = vpop.f32.mrb[13].mxu0  ;;  %3258 = vmatmul.mubr.bf16.gmra.mrb[8].mxu1 %v1031_v25  ;;  %v435_v60 = vadd.f32 %v409_v46, %v275_v49  ;;  %v3799_v46 = vld [vmem:[#allocation2 + $0x40] sm:$0xff]  }
 0x1df   :  { %v927_v17 = vpop.f32.mrb[14].mxu0  ;;  %3261 = vmatprep.mubr.msk.bf16.mxu1 %vm3928_vm0, %v3927_v14  ;;  %v434_v7 = vadd.f32 %v408_v22, %v274_v53  ;;  %3302 = vmatpush3.bf16.msra.mxu0 %v3799_v46 }
 0x1e0   :  { %v928_v61 = vadd.f32 %v4585_v0, %v927_v17  ;;  %v3196_v51 = vpop.f32.mrb[15].mxu0  ;;  %v538_v44 = vpop.permute.xlu1 %537  ;;  %v1009_v36 = vmax.f32 %v925_v26, 0.0  ;;  %3303 = vmatprep.subr.bf16.mxu0 %v3927_v14 }
 0x1e1   :  { %v569_v63 = vmul.f32 %v4223_v2, %v538_v44  ;;  %v594_v27 = vadd.f32 %v568_v20, %v434_v7  ;;  %v3801_v44 = vld [vmem:[#allocation2 + $0x50] sm:$0xff]   ;;  %v3802_v20 = vld [vmem:[#allocation2 + $0x58] sm:$0xff]  }
 0x1e2   :  { %v1010_v3 = vmax.f32 %v928_v61, 0.0  ;;  %v3800_v61 = vld [vmem:[#allocation2 + $0x48] sm:$0xff]  }
 0x1e3   :  { %v595_v25 = vadd.f32 %v569_v63, %v435_v60  ;;  %3304 = vmatpush3.bf16.msra.mxu0 %v3800_v61  ;;  %v3803_v60 = vld [vmem:[#allocation2 + $0x60] sm:$0xff]   ;;  %v3804_v63 = vld [vmem:[#allocation2 + $0x68] sm:$0xff]  }
 0x1e4   :  { %v1032_v35 = vpack.c.bf16 %v1010_v3, %v1009_v36  ;;  %3305 = vmatprep.subr.bf16.mxu0 %v3927_v14 }
 0x1e5   :  { %v694_v30 = vpop.permute.xlu1 %693  ;;  %v4648_v34 = vadd.f32 %v729_v59, %v595_v25  ;;  %v3805_v59 = vld [vmem:[#allocation2 + $0x70] sm:$0xff]  }
 0x1e6   :  { %v728_v5 = vmul.f32 %v4237_v13, %v694_v30  ;;  %3262 = vmatmul.mubr.bf16.gmra.mrb[12].mxu1 %v1032_v35 }
 0x1e7   :  { %3265 = vmatprep.mubr.msk.bf16.mxu1 %vm3928_vm0, %v3927_v14  ;;  %v781_v2 = vmax.f32 %v4648_v34, 0.0  ;;  %3306 = vmatpush3.bf16.msra.mxu0 %v3801_v44 }
 0x1e8   :  { %v4653_v15 = vadd.f32 %v728_v5, %v594_v27  ;;  %3307 = vmatprep.subr.bf16.mxu0 %v3927_v14 }
 0x1ea   :  { %v780_v26 = vmax.f32 %v4653_v15, 0.0 }
 0x1eb   :  { %3308 = vmatpush3.bf16.msra.mxu0 %v3802_v20 }
 0x1ec   :  { %v794_v22 = vpack.c.bf16 %v781_v2, %v780_v26  ;;  %3309 = vmatprep.subr.bf16.mxu0 %v3927_v14 }
 0x1ee   :  { %3230 = vmatmul.mubr.bf16.gmra.mrb[48].mxu0 %v794_v22 }
 0x1ef   :  { %3317 = vmatprep.mubr.msk.bf16.mxu0 %vm3928_vm0, %v3927_v14  ;;  %3310 = vmatpush3.bf16.msra.mxu0 %v3803_v60 }
 0x1f0   :  { %3311 = vmatprep.subr.bf16.mxu0 %v3927_v14 }
 0x1f3   :  { %3312 = vmatpush3.bf16.msra.mxu0 %v3804_v63 }
 0x1f4   :  { %3313 = vmatprep.subr.bf16.mxu0 %v3927_v14 }
 0x1f7   :  { %3314 = vmatpush3.bf16.msra.mxu0 %v3805_v59 }
 0x1f8   :  { %3315 = vmatprep.subr.bf16.mxu0 %v3927_v14 }
 0x1f9   :  { %v932_v13 = vpop.f32.mrb[16].mxu0 }
 0x1fa   :  { %v933_v30 = vadd.f32 %v4585_v0, %v932_v13  ;;  %v3199_v29 = vpop.f32.mrb[17].mxu0 }
 0x1fb   :  { %v935_v27 = vpop.f32.mrb[18].mxu0 }
 0x1fc   :  { %v936_v49 = vadd.f32 %v4585_v0, %v935_v27  ;;  %v3200_v17 = vpop.f32.mrb[19].mxu0  ;;  %v1011_v41 = vmax.f32 %v933_v30, 0.0  ;;  %v3806_v30 = vld [vmem:[#allocation2 + $0x78] sm:$0xff]  }
 0x1fd   :  { %3316 = vmatpush3.bf16.msra.mxu0 %v3806_v30 }
 0x1fe   :  { %v1012_v53 = vmax.f32 %v936_v49, 0.0  ;;  %3437 = vmatprep.subr.bf16.mxu0 %v3927_v14 }
 0x200   :  { %v1033_v51 = vpack.c.bf16 %v1012_v53, %v1011_v41 }
 0x202   :  { %3266 = vmatmul.mubr.bf16.gmra.mrb[16].mxu1 %v1033_v51 }
 0x203   :  { %3269 = vmatprep.mubr.msk.bf16.mxu1 %vm3928_vm0, %v3927_v14 }
 0x211   :  { %v940_v7 = vpop.f32.mrb[20].mxu0 }
 0x212   :  { %v941_v36 = vadd.f32 %v4585_v0, %v940_v7  ;;  %v3203_v3 = vpop.f32.mrb[21].mxu0 }
 0x213   :  { %v943_v25 = vpop.f32.mrb[22].mxu0 }
 0x214   :  { %v944_v35 = vadd.f32 %v4585_v0, %v943_v25  ;;  %v3204_v5 = vpop.f32.mrb[23].mxu0  ;;  %v1013_v22 = vmax.f32 %v941_v36, 0.0 }
 0x216   :  { %v1014_v13 = vmax.f32 %v944_v35, 0.0 }
 0x218   :  { %v1034_v29 = vpack.c.bf16 %v1014_v13, %v1013_v22 }
 0x21a   :  { %3270 = vmatmul.mubr.bf16.gmra.mrb[20].mxu1 %v1034_v29 }
 0x21b   :  { %3273 = vmatprep.mubr.msk.bf16.mxu1 %vm3928_vm0, %v3927_v14 }
 0x229   :  { %v948_v46 = vpop.f32.mrb[24].mxu0 }
 0x22a   :  { %v949_v27 = vadd.f32 %v4585_v0, %v948_v46  ;;  %v3207_v49 = vpop.f32.mrb[25].mxu0 }
 0x22b   :  { %v951_v17 = vpop.f32.mrb[26].mxu0 }
 0x22c   :  { %v952_v41 = vadd.f32 %v4585_v0, %v951_v17  ;;  %v3208_v53 = vpop.f32.mrb[27].mxu0  ;;  %v1015_v61 = vmax.f32 %v949_v27, 0.0 }
 0x22e   :  { %v1016_v51 = vmax.f32 %v952_v41, 0.0 }
 0x230   :  { %v1035_v44 = vpack.c.bf16 %v1016_v51, %v1015_v61 }
 0x232   :  { %3274 = vmatmul.mubr.bf16.gmra.mrb[24].mxu1 %v1035_v44 }
 0x233   :  { %3277 = vmatprep.mubr.msk.bf16.mxu1 %vm3928_vm0, %v3927_v14 }
 0x245   :  { %v956_v20 = vpop.f32.mrb[28].mxu0 }
 0x246   :  { %v957_v60 = vadd.f32 %v4585_v0, %v956_v20  ;;  %v3211_v63 = vpop.f32.mrb[29].mxu0 }
 0x247   :  { %v959_v7 = vpop.f32.mrb[30].mxu0 }
 0x248   :  { %v960_v36 = vadd.f32 %v4585_v0, %v959_v7  ;;  %v3212_v3 = vpop.f32.mrb[31].mxu0  ;;  %v1017_v59 = vmax.f32 %v957_v60, 0.0 }
 0x24a   :  { %v1018_v25 = vmax.f32 %v960_v36, 0.0  ;;  %v4698_v36 = vld [vmem:[%s5496_s6] ss:$0 sm:$0xff] }
 0x24c   :  { %v1036_v35 = vpack.c.bf16 %v1018_v25, %v1017_v59 }
 0x24e   :  { %3278 = vmatmul.mubr.bf16.gmra.mrb[28].mxu1 %v1036_v35 }
 0x24f   :  { %3281 = vmatprep.mubr.msk.bf16.mxu1 %vm3928_vm0, %v3927_v14 }
 0x25d   :  { %v964_v5 = vpop.f32.mrb[32].mxu0 }
 0x25e   :  { %v965_v22 = vadd.f32 %v4585_v0, %v964_v5  ;;  %v3215_v13 = vpop.f32.mrb[33].mxu0 }
 0x25f   :  { %v967_v30 = vpop.f32.mrb[34].mxu0 }
 0x260   :  { %v968_v29 = vadd.f32 %v4585_v0, %v967_v30  ;;  %v3216_v46 = vpop.f32.mrb[35].mxu0  ;;  %v1019_v27 = vmax.f32 %v965_v22, 0.0 }
 0x262   :  { %v1020_v49 = vmax.f32 %v968_v29, 0.0 }
 0x264   :  { %v1037_v17 = vpack.c.bf16 %v1020_v49, %v1019_v27 }
 0x266   :  { %3282 = vmatmul.mubr.bf16.gmra.mrb[32].mxu1 %v1037_v17 }
 0x267   :  { %3285 = vmatprep.mubr.msk.bf16.mxu1 %vm3928_vm0, %v3927_v14 }
 0x275   :  { %v972_v41 = vpop.f32.mrb[36].mxu0 }
 0x276   :  { %v973_v53 = vadd.f32 %v4585_v0, %v972_v41  ;;  %v3219_v61 = vpop.f32.mrb[37].mxu0 }
 0x277   :  { %v975_v51 = vpop.f32.mrb[38].mxu0 }
 0x278   :  { %v976_v44 = vadd.f32 %v4585_v0, %v975_v51  ;;  %v3220_v20 = vpop.f32.mrb[39].mxu0  ;;  %v1021_v60 = vmax.f32 %v973_v53, 0.0 }
 0x27a   :  { %v1022_v63 = vmax.f32 %v976_v44, 0.0 }
 0x27c   :  { %v1038_v7 = vpack.c.bf16 %v1022_v63, %v1021_v60 }
 0x27e   :  { %3286 = vmatmul.mubr.bf16.gmra.mrb[36].mxu1 %v1038_v7 }
 0x27f   :  { %3289 = vmatprep.mubr.msk.bf16.mxu1 %vm3928_vm0, %v3927_v14 }
 0x290   :  { %v1147_v3 = vpop.f32.mrb[0].mxu1 }
 0x291   :  { %v1148_v59 = vadd.f32 %v4698_v36, %v1147_v3  ;;  %v980_v25 = vpop.f32.mrb[40].mxu0  ;;  %v3251_v35 = vpop.f32.mrb[1].mxu1 }
 0x292   :  { %v981_v5 = vadd.f32 %v4585_v0, %v980_v25  ;;  %v3223_v22 = vpop.f32.mrb[41].mxu0  ;;  %v1150_v13 = vpop.f32.mrb[2].mxu1 }
 0x293   :  { %v1250_v30 = vmax.f32 %v1148_v59, 0.0  ;;  %v1151_v29 = vadd.f32 %v4698_v36, %v1150_v13  ;;  %v983_v46 = vpop.f32.mrb[42].mxu0  ;;  %v3252_v27 = vpop.f32.mrb[3].mxu1 }
 0x294   :  { %v984_v49 = vadd.f32 %v4585_v0, %v983_v46  ;;  %v3224_v17 = vpop.f32.mrb[43].mxu0  ;;  %v1023_v53 = vmax.f32 %v981_v5, 0.0 }
 0x295   :  { %v1251_v41 = vmax.f32 %v1151_v29, 0.0  ;;  %v4706_v51 = vadd.f32 %v1250_v30, %v756_v45 }
 0x296   :  { %v1024_v61 = vmax.f32 %v984_v49, 0.0 }
 0x297   :  { %v4710_v44 = vadd.f32 %v1251_v41, %v757_v52 }
 0x298   :  { %v1039_v20 = vpack.c.bf16 %v1024_v61, %v1023_v53 }
 0x299   :  { %v1302_v60 = vpack.c.bf16 %v4710_v44, %v4706_v51 }
 0x29a   :  { %3290 = vmatmul.mubr.bf16.gmra.mrb[40].mxu1 %v1039_v20 }
 0x29b   :  { %3318 = vmatmul.mubr.bf16.vlgmr.msra.gmra.mrb[52].mxu0 %v1302_v60  ;;  %3293 = vmatprep.mubr.msk.bf16.mxu1 %vm3928_vm0, %v3927_v14 }
 0x29c   :  { %3321 = vmatprep.mubr.msk.bf16.mxu0 %vm3928_vm0, %v3927_v14 }
 0x2a9   :  { %v988_v63 = vpop.f32.mrb[44].mxu0  ;;  %v1155_v37 = vpop.f32.mrb[4].mxu1 }
 0x2aa   :  { %v989_v45 = vadd.f32 %v4585_v0, %v988_v63  ;;  %v1156_v43 = vadd.f32 %v4698_v36, %v1155_v37  ;;  %v3227_v52 = vpop.f32.mrb[45].mxu0  ;;  %v3255_v7 = vpop.f32.mrb[5].mxu1 }
 0x2ab   :  { %v991_v3 = vpop.f32.mrb[46].mxu0  ;;  %v1158_v59 = vpop.f32.mrb[6].mxu1 }
 0x2ac   :  { %v1252_v25 = vmax.f32 %v1156_v43, 0.0  ;;  %v992_v35 = vadd.f32 %v4585_v0, %v991_v3  ;;  %v1159_v5 = vadd.f32 %v4698_v36, %v1158_v59  ;;  %v3228_v22 = vpop.f32.mrb[47].mxu0  ;;  %v3256_v13 = vpop.f32.mrb[7].mxu1  ;;  %v1025_v30 = vmax.f32 %v989_v45, 0.0 }
 0x2ae   :  { %v1026_v29 = vmax.f32 %v992_v35, 0.0  ;;  %v1253_v46 = vmax.f32 %v1159_v5, 0.0  ;;  %v4724_v27 = vadd.f32 %v1252_v25, %v758_v58 }
 0x2b0   :  { %v1040_v49 = vpack.c.bf16 %v1026_v29, %v1025_v30  ;;  %v4728_v17 = vadd.f32 %v1253_v46, %v759_v16 }
 0x2b1   :  { %v1163_v41 = vpop.f32.mrb[8].mxu1 }
 0x2b2   :  { %v1164_v53 = vadd.f32 %v4698_v36, %v1163_v41  ;;  %v3259_v61 = vpop.f32.mrb[9].mxu1  ;;  %3294 = vmatmul.mubr.bf16.gmra.mrb[44].mxu1 %v1040_v49  ;;  %v1303_v20 = vpack.c.bf16 %v4728_v17, %v4724_v27 }
 0x2b3   :  { %v1166_v60 = vpop.f32.mrb[10].mxu1  ;;  %3297 = vmatprep.mubr.msk.bf16.mxu1 %vm3928_vm0, %v3927_v14 }
 0x2b4   :  { %v1254_v62 = vmax.f32 %v1164_v53, 0.0  ;;  %v1167_v58 = vadd.f32 %v4698_v36, %v1166_v60  ;;  %v3260_v63 = vpop.f32.mrb[11].mxu1  ;;  %3322 = vmatmul.mubr.bf16.gmra.mrb[56].mxu0 %v1303_v20  ;;  %v3807_v53 = vld [vmem:[#allocation5 + $0x40] sm:$0xff]  }
 0x2b5   :  { %3325 = vmatprep.mubr.msk.bf16.mxu0 %vm3928_vm0, %v3927_v14  ;;  %3370 = vmatpush3.bf16.msra.mxu1 %v3807_v53  ;;  %v5513_v53 = vmax.f32 %v4475_v54, 0.0  ;;  %v5514_v54 = vmax.f32 %v4509_v55, 0.0 }
 0x2b6   :  { %v1255_v40 = vmax.f32 %v1167_v58, 0.0  ;;  %v4740_v16 = vadd.f32 %v1254_v62, %v760_v31  ;;  %3371 = vmatprep.subr.bf16.mxu1 %v3927_v14  ;;  %v3808_v58 = vld [vmem:[#allocation5 + $0x48] sm:$0xff]  }
 0x2b8   :  { %v4744_v37 = vadd.f32 %v1255_v40, %v761_v28 }
 0x2b9   :  { %v1171_v45 = vpop.f32.mrb[12].mxu1  ;;  %3372 = vmatpush3.bf16.msra.mxu1 %v3808_v58 }
 0x2ba   :  { %v1172_v43 = vadd.f32 %v4698_v36, %v1171_v45  ;;  %v3263_v52 = vpop.f32.mrb[13].mxu1  ;;  %v1304_v7 = vpack.c.bf16 %v4744_v37, %v4740_v16  ;;  %v3809_v45 = vld [vmem:[#allocation5 + $0x50] sm:$0xff]   ;;  %3373 = vmatprep.subr.bf16.mxu1 %v3927_v14 }
 0x2bb   :  { %v1174_v3 = vpop.f32.mrb[14].mxu1  ;;  %v3810_v52 = vld [vmem:[#allocation5 + $0x58] sm:$0xff]  }
 0x2bc   :  { %v1256_v59 = vmax.f32 %v1172_v43, 0.0  ;;  %v1175_v25 = vadd.f32 %v4698_v36, %v1174_v3  ;;  %v3264_v35 = vpop.f32.mrb[15].mxu1  ;;  %3326 = vmatmul.mubr.bf16.gmra.mrb[60].mxu0 %v1304_v7  ;;  %v3813_v3 = vld [vmem:[#allocation5 + $0x70] sm:$0xff]  }
 0x2bd   :  { %3329 = vmatprep.mubr.msk.bf16.mxu0 %vm3928_vm0, %v3927_v14  ;;  %3374 = vmatpush3.bf16.msra.mxu1 %v3809_v45 }
 0x2be   :  { %v1257_v48 = vmax.f32 %v1175_v25, 0.0  ;;  %v4754_v18 = vadd.f32 %v1256_v59, %v762_v10  ;;  %3375 = vmatprep.subr.bf16.mxu1 %v3927_v14 }
 0x2c0   :  { %v4758_v28 = vadd.f32 %v1257_v48, %v763_v11 }
 0x2c1   :  { %v996_v31 = vpop.f32.mrb[48].mxu0  ;;  %3376 = vmatpush3.bf16.msra.mxu1 %v3810_v52 }
 0x2c2   :  { %v997_v5 = vadd.f32 %v4585_v0, %v996_v31  ;;  %v3231_v22 = vpop.f32.mrb[49].mxu0  ;;  %v1305_v13 = vpack.c.bf16 %v4758_v28, %v4754_v18  ;;  %3377 = vmatprep.subr.bf16.mxu1 %v3927_v14 }
 0x2c3   :  { %v999_v30 = vpop.f32.mrb[50].mxu0 }
 0x2c4   :  { %v1000_v29 = vadd.f32 %v4585_v0, %v999_v30  ;;  %v3232_v46 = vpop.f32.mrb[51].mxu0  ;;  %3330 = vmatmul.mubr.bf16.gmra.mrb[64].mxu0 %v1305_v13  ;;  %v1027_v50 = vmax.f32 %v997_v5, 0.0  ;;  %v3814_v5 = vld [vmem:[#allocation5 + $0x78] sm:$0xff]   ;;  %v5511_v13 = vmax.f32 %v4445_v21, 0.0 }
 0x2c5   :  { %3333 = vmatprep.mubr.msk.bf16.mxu0 %vm3928_vm0, %v3927_v14  ;;  %3378 = vmatpush3.bf16.msra.mxu1 %v3811_v8 }
 0x2c6   :  { %v1028_v10 = vmax.f32 %v1000_v29, 0.0  ;;  %3379 = vmatprep.subr.bf16.mxu1 %v3927_v14 }
 0x2c8   :  { %v1041_v6 = vpack.c.bf16 %v1028_v10, %v1027_v50 }
 0x2c9   :  { %3380 = vmatpush3.bf16.msra.mxu1 %v3812_v33  ;;  %v5515_v33 = vmax.f32 %v4512_v24, 0.0  ;;  %v5516_v24 = vmax.f32 %v4536_v19, 0.0 }
 0x2ca   :  { %3298 = vmatmul.mubr.bf16.gmra.mrb[48].mxu1 %v1041_v6  ;;  %3381 = vmatprep.subr.bf16.mxu1 %v3927_v14 }
 0x2cb   :  { %3385 = vmatprep.mubr.msk.bf16.mxu1 %vm3928_vm0, %v3927_v14 }
 0x2cd   :  { %3382 = vmatpush3.bf16.msra.mxu1 %v3813_v3 }
 0x2ce   :  { %3383 = vmatprep.subr.bf16.mxu1 %v3927_v14 }
 0x2d1   :  { %3384 = vmatpush3.bf16.msra.mxu1 %v3814_v5 }
 0x2d2   :  { %3505 = vmatprep.subr.bf16.mxu1 %v3927_v14 }
 0x2d5   :  { %v1179_v11 = vpop.f32.mrb[16].mxu1 }
 0x2d6   :  { %v1180_v49 = vadd.f32 %v4698_v36, %v1179_v11  ;;  %v3267_v41 = vpop.f32.mrb[17].mxu1 }
 0x2d7   :  { %v1182_v61 = vpop.f32.mrb[18].mxu1 }
 0x2d8   :  { %v1258_v20 = vmax.f32 %v1180_v49, 0.0  ;;  %v1183_v0 = vadd.f32 %v4698_v36, %v1182_v61  ;;  %v3268_v60 = vpop.f32.mrb[19].mxu1  ;;  %v5512_v49 = vmax.f32 %v4480_v57, 0.0 }
 0x2da   :  { %v1259_v62 = vmax.f32 %v1183_v0, 0.0  ;;  %v4773_v63 = vadd.f32 %v1258_v20, %v764_v32 }
 0x2dc   :  { %v4777_v40 = vadd.f32 %v1259_v62, %v765_v39 }
 0x2de   :  { %v1306_v43 = vpack.c.bf16 %v4777_v40, %v4773_v63 }
 0x2e0   :  { %3334 = vmatmul.mubr.bf16.gmra.mrb[68].mxu0 %v1306_v43 }
 0x2e1   :  { %3337 = vmatprep.mubr.msk.bf16.mxu0 %vm3928_vm0, %v3927_v14 }
 0x2ed   :  { %v1187_v32 = vpop.f32.mrb[20].mxu1 }
 0x2ee   :  { %v1188_v39 = vadd.f32 %v4698_v36, %v1187_v32  ;;  %v3271_v7 = vpop.f32.mrb[21].mxu1 }
 0x2ef   :  { %v1190_v59 = vpop.f32.mrb[22].mxu1 }
 0x2f0   :  { %v1260_v25 = vmax.f32 %v1188_v39, 0.0  ;;  %v1191_v35 = vadd.f32 %v4698_v36, %v1190_v59  ;;  %v3272_v48 = vpop.f32.mrb[23].mxu1 }
 0x2f2   :  { %v1261_v31 = vmax.f32 %v1191_v35, 0.0  ;;  %v4793_v22 = vadd.f32 %v1260_v25, %v766_v23 }
 0x2f4   :  { %v4797_v30 = vadd.f32 %v1261_v31, %v5511_v13  ;;  %v5517_v13 = vmax.f32 %v4539_v9, 0.0  ;;  %v5518_v9 = vmax.f32 %v4563_v12, 0.0 }
 0x2f6   :  { %v1307_v29 = vpack.c.bf16 %v4797_v30, %v4793_v22 }
 0x2f8   :  { %3338 = vmatmul.mubr.bf16.gmra.mrb[72].mxu0 %v1307_v29 }
 0x2f9   :  { %3341 = vmatprep.mubr.msk.bf16.mxu0 %vm3928_vm0, %v3927_v14 }
 0x305   :  { %v1195_v46 = vpop.f32.mrb[24].mxu1 }
 0x306   :  { %v1196_v50 = vadd.f32 %v4698_v36, %v1195_v46  ;;  %v3275_v47 = vpop.f32.mrb[25].mxu1 }
 0x307   :  { %v1198_v23 = vpop.f32.mrb[26].mxu1 }
 0x308   :  { %v1262_v10 = vmax.f32 %v1196_v50, 0.0  ;;  %v1199_v21 = vadd.f32 %v4698_v36, %v1198_v23  ;;  %v3276_v6 = vpop.f32.mrb[27].mxu1 }
 0x30a   :  { %v1263_v11 = vmax.f32 %v1199_v21, 0.0  ;;  %v4808_v41 = vadd.f32 %v1262_v10, %v5512_v49 }
 0x30c   :  { %v4812_v61 = vadd.f32 %v1263_v11, %v5513_v53  ;;  %v5519_v53 = vmax.f32 %v4560_v1, 0.0 }
 0x30e   :  { %v1308_v20 = vpack.c.bf16 %v4812_v61, %v4808_v41 }
 0x310   :  { %3342 = vmatmul.mubr.bf16.gmra.mrb[76].mxu0 %v1308_v20 }
 0x311   :  { %3345 = vmatprep.mubr.msk.bf16.mxu0 %vm3928_vm0, %v3927_v14 }
 0x321   :  { %v1203_v0 = vpop.f32.mrb[28].mxu1 }
 0x322   :  { %v1204_v60 = vadd.f32 %v4698_v36, %v1203_v0  ;;  %v3279_v62 = vpop.f32.mrb[29].mxu1 }
 0x323   :  { %v1206_v58 = vpop.f32.mrb[30].mxu1 }
 0x324   :  { %v1264_v45 = vmax.f32 %v1204_v60, 0.0  ;;  %v1207_v57 = vadd.f32 %v4698_v36, %v1206_v58  ;;  %v3280_v43 = vpop.f32.mrb[31].mxu1  ;;  %v4863_v60 = vld [vmem:[%s5494_s4 + $0x1] ss:$0 sm:$0xff] }
 0x326   :  { %v1265_v52 = vmax.f32 %v1207_v57, 0.0  ;;  %v4822_v8 = vadd.f32 %v1264_v45, %v5514_v54 }
 0x328   :  { %v4826_v32 = vadd.f32 %v1265_v52, %v5515_v33 }
 0x32a   :  { %v1309_v39 = vpack.c.bf16 %v4826_v32, %v4822_v8 }
 0x32c   :  { %3346 = vmatmul.mubr.bf16.gmra.mrb[80].mxu0 %v1309_v39 }
 0x32d   :  { %3349 = vmatprep.mubr.msk.bf16.mxu0 %vm3928_vm0, %v3927_v14 }
 0x339   :  { %v1211_v7 = vpop.f32.mrb[32].mxu1 }
 0x33a   :  { %v1212_v3 = vadd.f32 %v4698_v36, %v1211_v7  ;;  %v3283_v59 = vpop.f32.mrb[33].mxu1 }
 0x33b   :  { %v1214_v25 = vpop.f32.mrb[34].mxu1 }
 0x33c   :  { %v1266_v35 = vmax.f32 %v1212_v3, 0.0  ;;  %v1215_v55 = vadd.f32 %v4698_v36, %v1214_v25  ;;  %v3284_v48 = vpop.f32.mrb[35].mxu1 }
 0x33e   :  { %v1267_v31 = vmax.f32 %v1215_v55, 0.0  ;;  %v4836_v5 = vadd.f32 %v1266_v35, %v5516_v24  ;;  %v5520_v55 = vmax.f32 %v4590_v4, 0.0 }
 0x340   :  { %v4840_v29 = vadd.f32 %v1267_v31, %v5517_v13  ;;  %v5521_v31 = vmax.f32 %v4594_v56, 0.0 }
 0x342   :  { %v1310_v46 = vpack.c.bf16 %v4840_v29, %v4836_v5 }
 0x344   :  { %3350 = vmatmul.mubr.bf16.gmra.mrb[84].mxu0 %v1310_v46 }
 0x345   :  { %3353 = vmatprep.mubr.msk.bf16.mxu0 %vm3928_vm0, %v3927_v14 }
 0x351   :  { %v1219_v50 = vpop.f32.mrb[36].mxu1 }
 0x352   :  { %v1220_v47 = vadd.f32 %v4698_v36, %v1219_v50  ;;  %v3287_v23 = vpop.f32.mrb[37].mxu1 }
 0x353   :  { %v1222_v10 = vpop.f32.mrb[38].mxu1 }
 0x354   :  { %v1268_v21 = vmax.f32 %v1220_v47, 0.0  ;;  %v1223_v19 = vadd.f32 %v4698_v36, %v1222_v10  ;;  %v3288_v6 = vpop.f32.mrb[39].mxu1 }
 0x356   :  { %v1269_v11 = vmax.f32 %v1223_v19, 0.0  ;;  %v4850_v49 = vadd.f32 %v1268_v21, %v5518_v9 }
 0x358   :  { %v4854_v20 = vadd.f32 %v1269_v11, %v5519_v53 }
 0x35a   :  { %v1311_v0 = vpack.c.bf16 %v4854_v20, %v4850_v49 }
 0x35c   :  { %3354 = vmatmul.mubr.bf16.gmra.mrb[88].mxu0 %v1311_v0 }
 0x35d   :  { %3357 = vmatprep.mubr.msk.bf16.mxu0 %vm3928_vm0, %v3927_v14 }
 0x36d   :  { %v1227_v62 = vpop.f32.mrb[40].mxu1 }
 0x36e   :  { %v1228_v12 = vadd.f32 %v4698_v36, %v1227_v62  ;;  %v3291_v58 = vpop.f32.mrb[41].mxu1  ;;  %v1422_v45 = vpop.f32.mrb[52].mxu0 }
 0x36f   :  { %v1423_v1 = vadd.f32 %v4863_v60, %v1422_v45  ;;  %v1230_v57 = vpop.f32.mrb[42].mxu1  ;;  %v3319_v43 = vpop.f32.mrb[53].mxu0  ;;  %v5523_v45 = vmax.f32 %v4620_v42, 0.0 }
 0x370   :  { %v1270_v52 = vmax.f32 %v1228_v12, 0.0  ;;  %v1231_v54 = vadd.f32 %v4698_v36, %v1230_v57  ;;  %v3292_v33 = vpop.f32.mrb[43].mxu1  ;;  %v1425_v39 = vpop.f32.mrb[54].mxu0  ;;  %v5522_v12 = vmax.f32 %v4616_v38, 0.0 }
 0x371   :  { %v1426_v7 = vadd.f32 %v4863_v60, %v1425_v39  ;;  %v3320_v3 = vpop.f32.mrb[55].mxu0  ;;  %v1525_v25 = vmax.f32 %v1423_v1, 0.0 }
 0x372   :  { %v1271_v59 = vmax.f32 %v1231_v54, 0.0  ;;  %v4871_v48 = vadd.f32 %v1270_v52, %v5520_v55 }
 0x373   :  { %v1526_v35 = vmax.f32 %v1426_v7, 0.0 }
 0x374   :  { %v4875_v24 = vadd.f32 %v1271_v59, %v5521_v31 }
 0x375   :  { %v1551_v13 = vpack.c.bf16 %v1526_v35, %v1525_v25 }
 0x376   :  { %v1312_v46 = vpack.c.bf16 %v4875_v24, %v4871_v48 }
 0x377   :  { %3386 = vmatmul.mubr.bf16.vlgmr.msra.gmra.mrb[52].mxu1 %v1551_v13 }
 0x378   :  { %3358 = vmatmul.mubr.bf16.gmra.mrb[92].mxu0 %v1312_v46  ;;  %3389 = vmatprep.mubr.msk.bf16.mxu1 %vm3928_vm0, %v3927_v14 }
 0x379   :  { %3361 = vmatprep.mubr.msk.bf16.mxu0 %vm3928_vm0, %v3927_v14 }
 0x385   :  { %v1235_v50 = vpop.f32.mrb[44].mxu1 }
 0x386   :  { %v1236_v4 = vadd.f32 %v4698_v36, %v1235_v50  ;;  %v3295_v47 = vpop.f32.mrb[45].mxu1 }
 0x387   :  { %v1238_v23 = vpop.f32.mrb[46].mxu1  ;;  %v1430_v56 = vpop.f32.mrb[56].mxu0 }
 0x388   :  { %v1272_v10 = vmax.f32 %v1236_v4, 0.0  ;;  %v1239_v21 = vadd.f32 %v4698_v36, %v1238_v23  ;;  %v1431_v19 = vadd.f32 %v4863_v60, %v1430_v56  ;;  %v3296_v6 = vpop.f32.mrb[47].mxu1  ;;  %v3323_v11 = vpop.f32.mrb[57].mxu0 }
 0x389   :  { %v1433_v9 = vpop.f32.mrb[58].mxu0 }
 0x38a   :  { %v1273_v53 = vmax.f32 %v1239_v21, 0.0  ;;  %v1434_v0 = vadd.f32 %v4863_v60, %v1433_v9  ;;  %v3324_v62 = vpop.f32.mrb[59].mxu0  ;;  %v4889_v58 = vadd.f32 %v1272_v10, %v5522_v12  ;;  %v1527_v57 = vmax.f32 %v1431_v19, 0.0 }
 0x38c   :  { %v4893_v1 = vadd.f32 %v1273_v53, %v5523_v45  ;;  %v1528_v43 = vmax.f32 %v1434_v0, 0.0 }
 0x38e   :  { %v1552_v52 = vpack.c.bf16 %v1528_v43, %v1527_v57  ;;  %v1313_v54 = vpack.c.bf16 %v4893_v1, %v4889_v58 }
 0x38f   :  { %v1438_v33 = vpop.f32.mrb[60].mxu0 }
 0x390   :  { %v1439_v39 = vadd.f32 %v4863_v60, %v1438_v33  ;;  %v3327_v7 = vpop.f32.mrb[61].mxu0  ;;  %3362 = vmatmul.mubr.bf16.gmra.mrb[96].mxu0 %v1313_v54  ;;  %3390 = vmatmul.mubr.bf16.gmra.mrb[56].mxu1 %v1552_v52  ;;  %v3815_v52 = vld [vmem:[#allocation2 + $0x80] sm:$0xff]   ;;  %v3816_v33 = vld [vmem:[#allocation2 + $0x88] sm:$0xff]  }
 0x391   :  { %v1441_v3 = vpop.f32.mrb[62].mxu0  ;;  %3393 = vmatprep.mubr.msk.bf16.mxu1 %vm3928_vm0, %v3927_v14  ;;  %3365 = vmatprep.mubr.msk.bf16.mxu0 %vm3928_vm0, %v3927_v14  ;;  %v3817_v7 = vld [vmem:[#allocation2 + $0x90] sm:$0xff]  }
 0x392   :  { %v1442_v42 = vadd.f32 %v4863_v60, %v1441_v3  ;;  %v3328_v38 = vpop.f32.mrb[63].mxu0  ;;  %v1529_v59 = vmax.f32 %v1439_v39, 0.0  ;;  %3438 = vmatpush3.bf16.msra.mxu0 %v3815_v52  ;;  %v3818_v3 = vld [vmem:[#allocation2 + $0x98] sm:$0xff]  }
 0x393   :  { %3439 = vmatprep.subr.bf16.mxu0 %v3927_v14  ;;  %v3820_v38 = vld [vmem:[#allocation2 + $0xa8] sm:$0xff]  }
 0x394   :  { %v1530_v25 = vmax.f32 %v1442_v42, 0.0  ;;  %v3819_v42 = vld [vmem:[#allocation2 + $0xa0] sm:$0xff]  }
 0x396   :  { %v1553_v35 = vpack.c.bf16 %v1530_v25, %v1529_v59  ;;  %3440 = vmatpush3.bf16.msra.mxu0 %v3816_v33 }
 0x397   :  { %v1446_v55 = vpop.f32.mrb[64].mxu0  ;;  %3441 = vmatprep.subr.bf16.mxu0 %v3927_v14 }
 0x398   :  { %v1447_v31 = vadd.f32 %v4863_v60, %v1446_v55  ;;  %v3331_v13 = vpop.f32.mrb[65].mxu0  ;;  %3394 = vmatmul.mubr.bf16.gmra.mrb[60].mxu1 %v1553_v35  ;;  %v3821_v55 = vld [vmem:[#allocation2 + $0xb0] sm:$0xff]  }
 0x399   :  { %v1449_v46 = vpop.f32.mrb[66].mxu0  ;;  %3397 = vmatprep.mubr.msk.bf16.mxu1 %vm3928_vm0, %v3927_v14 }
 0x39a   :  { %v1450_v50 = vadd.f32 %v4863_v60, %v1449_v46  ;;  %v3332_v4 = vpop.f32.mrb[67].mxu0  ;;  %v1531_v47 = vmax.f32 %v1447_v31, 0.0  ;;  %3442 = vmatpush3.bf16.msra.mxu0 %v3817_v7 }
 0x39b   :  { %3443 = vmatprep.subr.bf16.mxu0 %v3927_v14 }
 0x39c   :  { %v1532_v23 = vmax.f32 %v1450_v50, 0.0 }
 0x39d   :  { %v1243_v56 = vpop.f32.mrb[48].mxu1 }
 0x39e   :  { %v1554_v10 = vpack.c.bf16 %v1532_v23, %v1531_v47  ;;  %v1244_v21 = vadd.f32 %v4698_v36, %v1243_v56  ;;  %v3299_v19 = vpop.f32.mrb[49].mxu1  ;;  %3444 = vmatpush3.bf16.msra.mxu0 %v3818_v3  ;;  %v3822_v47 = vld [vmem:[#allocation2 + $0xb8] sm:$0xff]  }
 0x39f   :  { %v1246_v6 = vpop.f32.mrb[50].mxu1  ;;  %3445 = vmatprep.subr.bf16.mxu0 %v3927_v14 }
 0x3a0   :  { %v1274_v11 = vmax.f32 %v1244_v21, 0.0  ;;  %v1247_v9 = vadd.f32 %v4698_v36, %v1246_v6  ;;  %v3300_v53 = vpop.f32.mrb[51].mxu1  ;;  %3398 = vmatmul.mubr.bf16.gmra.mrb[64].mxu1 %v1554_v10 }
 0x3a1   :  { %3401 = vmatprep.mubr.msk.bf16.mxu1 %vm3928_vm0, %v3927_v14 }
 0x3a2   :  { %v1275_v0 = vmax.f32 %v1247_v9, 0.0  ;;  %v4913_v62 = vadd.f32 %v1274_v11, %v780_v26  ;;  %3446 = vmatpush3.bf16.msra.mxu0 %v3819_v42 }
 0x3a3   :  { %3447 = vmatprep.subr.bf16.mxu0 %v3927_v14 }
 0x3a4   :  { %v4917_v12 = vadd.f32 %v1275_v0, %v781_v2 }
 0x3a6   :  { %v1314_v45 = vpack.c.bf16 %v4917_v12, %v4913_v62  ;;  %3448 = vmatpush3.bf16.msra.mxu0 %v3820_v38 }
 0x3a7   :  { %3449 = vmatprep.subr.bf16.mxu0 %v3927_v14 }
 0x3a8   :  { %3366 = vmatmul.mubr.bf16.gmra.mrb[100].mxu0 %v1314_v45 }
 0x3a9   :  { %3453 = vmatprep.mubr.msk.bf16.mxu0 %vm3928_vm0, %v3927_v14 }
 0x3aa   :  { %3450 = vmatpush3.bf16.msra.mxu0 %v3821_v55 }
 0x3ab   :  { %3451 = vmatprep.subr.bf16.mxu0 %v3927_v14 }
 0x3ae   :  { %3452 = vmatpush3.bf16.msra.mxu0 %v3822_v47 }
 0x3af   :  { %3573 = vmatprep.subr.bf16.mxu0 %v3927_v14 }
 0x3b3   :  { %v1454_v36 = vpop.f32.mrb[68].mxu0 }
 0x3b4   :  { %v1455_v57 = vadd.f32 %v4863_v60, %v1454_v36  ;;  %v3335_v43 = vpop.f32.mrb[69].mxu0 }
 0x3b5   :  { %v1457_v54 = vpop.f32.mrb[70].mxu0 }
 0x3b6   :  { %v1458_v15 = vadd.f32 %v4863_v60, %v1457_v54  ;;  %v3336_v26 = vpop.f32.mrb[71].mxu0  ;;  %v1533_v34 = vmax.f32 %v1455_v57, 0.0 }
 0x3b8   :  { %v1534_v2 = vmax.f32 %v1458_v15, 0.0 }
 0x3ba   :  { %v1555_v39 = vpack.c.bf16 %v1534_v2, %v1533_v34 }
 0x3bc   :  { %3402 = vmatmul.mubr.bf16.gmra.mrb[68].mxu1 %v1555_v39 }
 0x3bd   :  { %3405 = vmatprep.mubr.msk.bf16.mxu1 %vm3928_vm0, %v3927_v14 }
 0x3cb   :  { %v1462_v59 = vpop.f32.mrb[72].mxu0 }
 0x3cc   :  { %v1463_v25 = vadd.f32 %v4863_v60, %v1462_v59  ;;  %v3339_v35 = vpop.f32.mrb[73].mxu0 }
 0x3cd   :  { %v1465_v31 = vpop.f32.mrb[74].mxu0 }
 0x3ce   :  { %v1466_v13 = vadd.f32 %v4863_v60, %v1465_v31  ;;  %v3340_v46 = vpop.f32.mrb[75].mxu0  ;;  %v1535_v50 = vmax.f32 %v1463_v25, 0.0 }
 0x3d0   :  { %v1536_v4 = vmax.f32 %v1466_v13, 0.0 }
 0x3d2   :  { %v1556_v23 = vpack.c.bf16 %v1536_v4, %v1535_v50 }
 0x3d4   :  { %3406 = vmatmul.mubr.bf16.gmra.mrb[72].mxu1 %v1556_v23 }
 0x3d5   :  { %3409 = vmatprep.mubr.msk.bf16.mxu1 %vm3928_vm0, %v3927_v14 }
 0x3e3   :  { %v1470_v56 = vpop.f32.mrb[76].mxu0 }
 0x3e4   :  { %v1471_v10 = vadd.f32 %v4863_v60, %v1470_v56  ;;  %v3343_v21 = vpop.f32.mrb[77].mxu0  ;;  %v4958_v56 = vld [vmem:[%s5496_s6 + $0x1] ss:$0 sm:$0xff] }
 0x3e5   :  { %v1473_v19 = vpop.f32.mrb[78].mxu0 }
 0x3e6   :  { %v1474_v6 = vadd.f32 %v4863_v60, %v1473_v19  ;;  %v3344_v11 = vpop.f32.mrb[79].mxu0  ;;  %v1537_v9 = vmax.f32 %v1471_v10, 0.0 }
 0x3e8   :  { %v1538_v53 = vmax.f32 %v1474_v6, 0.0 }
 0x3ea   :  { %v1557_v0 = vpack.c.bf16 %v1538_v53, %v1537_v9 }
 0x3ec   :  { %3410 = vmatmul.mubr.bf16.gmra.mrb[76].mxu1 %v1557_v0 }
 0x3ed   :  { %3413 = vmatprep.mubr.msk.bf16.mxu1 %vm3928_vm0, %v3927_v14 }
 0x3ff   :  { %v1478_v45 = vpop.f32.mrb[80].mxu0 }
 0x400   :  { %v1479_v36 = vadd.f32 %v4863_v60, %v1478_v45  ;;  %v3347_v57 = vpop.f32.mrb[81].mxu0 }
 0x401   :  { %v1481_v43 = vpop.f32.mrb[82].mxu0 }
 0x402   :  { %v1482_v52 = vadd.f32 %v4863_v60, %v1481_v43  ;;  %v3348_v54 = vpop.f32.mrb[83].mxu0  ;;  %v1539_v15 = vmax.f32 %v1479_v36, 0.0 }
 0x404   :  { %v1540_v26 = vmax.f32 %v1482_v52, 0.0 }
 0x406   :  { %v1558_v34 = vpack.c.bf16 %v1540_v26, %v1539_v15 }
 0x408   :  { %3414 = vmatmul.mubr.bf16.gmra.mrb[80].mxu1 %v1558_v34 }
 0x409   :  { %3417 = vmatprep.mubr.msk.bf16.mxu1 %vm3928_vm0, %v3927_v14 }
 0x417   :  { %v1486_v2 = vpop.f32.mrb[84].mxu0 }
 0x418   :  { %v1487_v33 = vadd.f32 %v4863_v60, %v1486_v2  ;;  %v3351_v39 = vpop.f32.mrb[85].mxu0 }
 0x419   :  { %v1489_v7 = vpop.f32.mrb[86].mxu0 }
 0x41a   :  { %v1490_v3 = vadd.f32 %v4863_v60, %v1489_v7  ;;  %v3352_v42 = vpop.f32.mrb[87].mxu0  ;;  %v1541_v38 = vmax.f32 %v1487_v33, 0.0 }
 0x41c   :  { %v1542_v59 = vmax.f32 %v1490_v3, 0.0 }
 0x41e   :  { %v1559_v25 = vpack.c.bf16 %v1542_v59, %v1541_v38 }
 0x420   :  { %3418 = vmatmul.mubr.bf16.gmra.mrb[84].mxu1 %v1559_v25 }
 0x421   :  { %3421 = vmatprep.mubr.msk.bf16.mxu1 %vm3928_vm0, %v3927_v14 }
 0x42f   :  { %v1494_v35 = vpop.f32.mrb[88].mxu0 }
 0x430   :  { %v1495_v55 = vadd.f32 %v4863_v60, %v1494_v35  ;;  %v3355_v31 = vpop.f32.mrb[89].mxu0 }
 0x431   :  { %v1497_v13 = vpop.f32.mrb[90].mxu0 }
 0x432   :  { %v1498_v46 = vadd.f32 %v4863_v60, %v1497_v13  ;;  %v3356_v50 = vpop.f32.mrb[91].mxu0  ;;  %v1543_v4 = vmax.f32 %v1495_v55, 0.0 }
 0x434   :  { %v1544_v47 = vmax.f32 %v1498_v46, 0.0 }
 0x436   :  { %v1560_v23 = vpack.c.bf16 %v1544_v47, %v1543_v4 }
 0x438   :  { %3422 = vmatmul.mubr.bf16.gmra.mrb[88].mxu1 %v1560_v23 }
 0x439   :  { %3425 = vmatprep.mubr.msk.bf16.mxu1 %vm3928_vm0, %v3927_v14 }
 0x44a   :  { %v1671_v10 = vpop.f32.mrb[52].mxu1 }
 0x44b   :  { %v1672_v21 = vadd.f32 %v4958_v56, %v1671_v10  ;;  %v1502_v19 = vpop.f32.mrb[92].mxu0  ;;  %v3387_v6 = vpop.f32.mrb[53].mxu1 }
 0x44c   :  { %v1503_v11 = vadd.f32 %v4863_v60, %v1502_v19  ;;  %v3359_v9 = vpop.f32.mrb[93].mxu0  ;;  %v1674_v53 = vpop.f32.mrb[54].mxu1 }
 0x44d   :  { %v1774_v0 = vmax.f32 %v1672_v21, 0.0  ;;  %v1675_v45 = vadd.f32 %v4958_v56, %v1674_v53  ;;  %v1505_v36 = vpop.f32.mrb[94].mxu0  ;;  %v3388_v57 = vpop.f32.mrb[55].mxu1 }
 0x44e   :  { %v1506_v43 = vadd.f32 %v4863_v60, %v1505_v36  ;;  %v3360_v52 = vpop.f32.mrb[95].mxu0  ;;  %v1545_v15 = vmax.f32 %v1503_v11, 0.0 }
 0x44f   :  { %v1775_v54 = vmax.f32 %v1675_v45, 0.0  ;;  %v4965_v34 = vadd.f32 %v1774_v0, %v4706_v51 }
 0x450   :  { %v1546_v26 = vmax.f32 %v1506_v43, 0.0 }
 0x451   :  { %v4968_v2 = vadd.f32 %v1775_v54, %v4710_v44 }
 0x452   :  { %v1561_v33 = vpack.c.bf16 %v1546_v26, %v1545_v15 }
 0x453   :  { %v1826_v39 = vpack.c.bf16 %v4968_v2, %v4965_v34 }
 0x454   :  { %3426 = vmatmul.mubr.bf16.gmra.mrb[92].mxu1 %v1561_v33 }
 0x455   :  { %3454 = vmatmul.mubr.bf16.vlgmr.msra.gmra.mrb[104].mxu0 %v1826_v39  ;;  %3429 = vmatprep.mubr.msk.bf16.mxu1 %vm3928_vm0, %v3927_v14 }
 0x456   :  { %3457 = vmatprep.mubr.msk.bf16.mxu0 %vm3928_vm0, %v3927_v14 }
 0x463   :  { %v1510_v7 = vpop.f32.mrb[96].mxu0  ;;  %v1679_v3 = vpop.f32.mrb[56].mxu1 }
 0x464   :  { %v1511_v51 = vadd.f32 %v4863_v60, %v1510_v7  ;;  %v1680_v42 = vadd.f32 %v4958_v56, %v1679_v3  ;;  %v3363_v44 = vpop.f32.mrb[97].mxu0  ;;  %v3391_v38 = vpop.f32.mrb[57].mxu1 }
 0x465   :  { %v1513_v59 = vpop.f32.mrb[98].mxu0  ;;  %v1682_v25 = vpop.f32.mrb[58].mxu1 }
 0x466   :  { %v1776_v35 = vmax.f32 %v1680_v42, 0.0  ;;  %v1514_v55 = vadd.f32 %v4863_v60, %v1513_v59  ;;  %v1683_v31 = vadd.f32 %v4958_v56, %v1682_v25  ;;  %v3364_v13 = vpop.f32.mrb[99].mxu0  ;;  %v3392_v46 = vpop.f32.mrb[59].mxu1  ;;  %v1547_v50 = vmax.f32 %v1511_v51, 0.0 }
 0x468   :  { %v1548_v4 = vmax.f32 %v1514_v55, 0.0  ;;  %v1777_v47 = vmax.f32 %v1683_v31, 0.0  ;;  %v4981_v23 = vadd.f32 %v1776_v35, %v4724_v27 }
 0x46a   :  { %v1562_v10 = vpack.c.bf16 %v1548_v4, %v1547_v50  ;;  %v4984_v21 = vadd.f32 %v1777_v47, %v4728_v17  ;;  %v3823_v50 = vld [vmem:[#allocation5 + $0x80] sm:$0xff]  }
 0x46b   :  { %v1687_v19 = vpop.f32.mrb[60].mxu1  ;;  %3506 = vmatpush3.bf16.msra.mxu1 %v3823_v50 }
 0x46c   :  { %v1688_v6 = vadd.f32 %v4958_v56, %v1687_v19  ;;  %v3395_v11 = vpop.f32.mrb[61].mxu1  ;;  %3430 = vmatmul.mubr.bf16.gmra.mrb[96].mxu1 %v1562_v10  ;;  %v1827_v9 = vpack.c.bf16 %v4984_v21, %v4981_v23  ;;  %3507 = vmatprep.subr.bf16.mxu1 %v3927_v14 }
 0x46d   :  { %v1690_v53 = vpop.f32.mrb[62].mxu1  ;;  %3433 = vmatprep.mubr.msk.bf16.mxu1 %vm3928_vm0, %v3927_v14 }
 0x46e   :  { %v1778_v0 = vmax.f32 %v1688_v6, 0.0  ;;  %v1691_v27 = vadd.f32 %v4958_v56, %v1690_v53  ;;  %v3396_v45 = vpop.f32.mrb[63].mxu1  ;;  %3458 = vmatmul.mubr.bf16.gmra.mrb[108].mxu0 %v1827_v9  ;;  %v3824_v6 = vld [vmem:[#allocation5 + $0x88] sm:$0xff]   ;;  %v3825_v53 = vld [vmem:[#allocation5 + $0x90] sm:$0xff]  }
 0x46f   :  { %3461 = vmatprep.mubr.msk.bf16.mxu0 %vm3928_vm0, %v3927_v14  ;;  %3508 = vmatpush3.bf16.msra.mxu1 %v3824_v6 }
 0x470   :  { %v1779_v17 = vmax.f32 %v1691_v27, 0.0  ;;  %v4995_v36 = vadd.f32 %v1778_v0, %v4740_v16  ;;  %3509 = vmatprep.subr.bf16.mxu1 %v3927_v14  ;;  %v3826_v27 = vld [vmem:[#allocation5 + $0x98] sm:$0xff]  }
 0x472   :  { %v4998_v57 = vadd.f32 %v1779_v17, %v4744_v37 }
 0x473   :  { %v1695_v43 = vpop.f32.mrb[64].mxu1  ;;  %3510 = vmatpush3.bf16.msra.mxu1 %v3825_v53 }
 0x474   :  { %v1696_v52 = vadd.f32 %v4958_v56, %v1695_v43  ;;  %v3399_v54 = vpop.f32.mrb[65].mxu1  ;;  %v1828_v15 = vpack.c.bf16 %v4998_v57, %v4995_v36  ;;  %3511 = vmatprep.subr.bf16.mxu1 %v3927_v14 }
 0x475   :  { %v1698_v26 = vpop.f32.mrb[66].mxu1 }
 0x476   :  { %v1780_v33 = vmax.f32 %v1696_v52, 0.0  ;;  %v1699_v39 = vadd.f32 %v4958_v56, %v1698_v26  ;;  %v3400_v7 = vpop.f32.mrb[67].mxu1  ;;  %3462 = vmatmul.mubr.bf16.gmra.mrb[112].mxu0 %v1828_v15  ;;  %v3829_v52 = vld [vmem:[#allocation5 + $0xb0] sm:$0xff]  }
 0x477   :  { %3465 = vmatprep.mubr.msk.bf16.mxu0 %vm3928_vm0, %v3927_v14  ;;  %3512 = vmatpush3.bf16.msra.mxu1 %v3826_v27  ;;  %v3830_v7 = vld [vmem:[#allocation5 + $0xb8] sm:$0xff]  }
 0x478   :  { %v1781_v16 = vmax.f32 %v1699_v39, 0.0  ;;  %v5007_v37 = vadd.f32 %v1780_v33, %v4754_v18  ;;  %3513 = vmatprep.subr.bf16.mxu1 %v3927_v14 }
 0x47a   :  { %v5010_v3 = vadd.f32 %v1781_v16, %v4758_v28 }
 0x47b   :  { %v1518_v51 = vpop.f32.mrb[100].mxu0 }
 0x47c   :  { %v1519_v42 = vadd.f32 %v4863_v60, %v1518_v51  ;;  %v3367_v44 = vpop.f32.mrb[101].mxu0  ;;  %v1829_v38 = vpack.c.bf16 %v5010_v3, %v5007_v37 }
 0x47d   :  { %v1521_v59 = vpop.f32.mrb[102].mxu0 }
 0x47e   :  { %v1522_v25 = vadd.f32 %v4863_v60, %v1521_v59  ;;  %v3368_v35 = vpop.f32.mrb[103].mxu0  ;;  %3466 = vmatmul.mubr.bf16.gmra.mrb[116].mxu0 %v1829_v38  ;;  %v1549_v18 = vmax.f32 %v1519_v42, 0.0 }
 0x47f   :  { %3469 = vmatprep.mubr.msk.bf16.mxu0 %vm3928_vm0, %v3927_v14 }
 0x480   :  { %v1550_v55 = vmax.f32 %v1522_v25, 0.0 }
 0x482   :  { %v1563_v31 = vpack.c.bf16 %v1550_v55, %v1549_v18 }
 0x484   :  { %3434 = vmatmul.mubr.bf16.gmra.mrb[100].mxu1 %v1563_v31 }
 0x485   :  { %3521 = vmatprep.mubr.msk.bf16.mxu1 %vm3928_vm0, %v3927_v14 }
 0x48f   :  { %v1703_v28 = vpop.f32.mrb[68].mxu1 }
 0x490   :  { %v1704_v13 = vadd.f32 %v4958_v56, %v1703_v28  ;;  %v3403_v46 = vpop.f32.mrb[69].mxu1 }
 0x491   :  { %v1706_v4 = vpop.f32.mrb[70].mxu1 }
 0x492   :  { %v1782_v47 = vmax.f32 %v1704_v13, 0.0  ;;  %v1707_v60 = vadd.f32 %v4958_v56, %v1706_v4  ;;  %v3404_v10 = vpop.f32.mrb[71].mxu1 }
 0x494   :  { %v1783_v19 = vmax.f32 %v1707_v60, 0.0  ;;  %v5024_v11 = vadd.f32 %v1782_v47, %v4773_v63  ;;  %v3827_v63 = vld [vmem:[#allocation5 + $0xa0] sm:$0xff]  }
 0x495   :  { %3514 = vmatpush3.bf16.msra.mxu1 %v3827_v63 }
 0x496   :  { %v5027_v9 = vadd.f32 %v1783_v19, %v4777_v40  ;;  %v3828_v40 = vld [vmem:[#allocation5 + $0xa8] sm:$0xff]   ;;  %3515 = vmatprep.subr.bf16.mxu1 %v3927_v14 }
 0x498   :  { %v1830_v0 = vpack.c.bf16 %v5027_v9, %v5024_v11 }
 0x499   :  { %3516 = vmatpush3.bf16.msra.mxu1 %v3828_v40 }
 0x49a   :  { %3470 = vmatmul.mubr.bf16.gmra.mrb[120].mxu0 %v1830_v0  ;;  %3517 = vmatprep.subr.bf16.mxu1 %v3927_v14 }
 0x49b   :  { %3473 = vmatprep.mubr.msk.bf16.mxu0 %vm3928_vm0, %v3927_v14 }
 0x49d   :  { %3518 = vmatpush3.bf16.msra.mxu1 %v3829_v52 }
 0x49e   :  { %3519 = vmatprep.subr.bf16.mxu1 %v3927_v14 }
 0x4a1   :  { %3520 = vmatpush3.bf16.msra.mxu1 %v3830_v7 }
 0x4a2   :  { %3641 = vmatprep.subr.bf16.mxu1 %v3927_v14 }
 0x4a7   :  { %v1711_v45 = vpop.f32.mrb[72].mxu1 }
 0x4a8   :  { %v1712_v17 = vadd.f32 %v4958_v56, %v1711_v45  ;;  %v3407_v43 = vpop.f32.mrb[73].mxu1 }
 0x4a9   :  { %v1714_v54 = vpop.f32.mrb[74].mxu1 }
 0x4aa   :  { %v1784_v15 = vmax.f32 %v1712_v17, 0.0  ;;  %v1715_v26 = vadd.f32 %v4958_v56, %v1714_v54  ;;  %v3408_v33 = vpop.f32.mrb[75].mxu1 }
 0x4ac   :  { %v1785_v39 = vmax.f32 %v1715_v26, 0.0  ;;  %v5042_v16 = vadd.f32 %v1784_v15, %v4793_v22 }
 0x4ae   :  { %v5045_v51 = vadd.f32 %v1785_v39, %v4797_v30 }
 0x4b0   :  { %v1831_v42 = vpack.c.bf16 %v5045_v51, %v5042_v16 }
 0x4b2   :  { %3474 = vmatmul.mubr.bf16.gmra.mrb[124].mxu0 %v1831_v42 }
 0x4b3   :  { %3477 = vmatprep.mubr.msk.bf16.mxu0 %vm3928_vm0, %v3927_v14 }
 0x4bf   :  { %v1719_v44 = vpop.f32.mrb[76].mxu1 }
 0x4c0   :  { %v1720_v38 = vadd.f32 %v4958_v56, %v1719_v44  ;;  %v3411_v59 = vpop.f32.mrb[77].mxu1 }
 0x4c1   :  { %v1722_v25 = vpop.f32.mrb[78].mxu1  ;;  %v5103_v59 = vld [vmem:[%s5494_s4 + $0x2] ss:$0 sm:$0xff] }
 0x4c2   :  { %v1786_v22 = vmax.f32 %v1720_v38, 0.0  ;;  %v1723_v35 = vadd.f32 %v4958_v56, %v1722_v25  ;;  %v3412_v30 = vpop.f32.mrb[79].mxu1 }
 0x4c4   :  { %v1787_v18 = vmax.f32 %v1723_v35, 0.0  ;;  %v5055_v55 = vadd.f32 %v1786_v22, %v4808_v41 }
 0x4c6   :  { %v5058_v31 = vadd.f32 %v1787_v18, %v4812_v61 }
 0x4c8   :  { %v1832_v28 = vpack.c.bf16 %v5058_v31, %v5055_v55 }
 0x4ca   :  { %3478 = vmatmul.mubr.bf16.gmra.mrb[128].mxu0 %v1832_v28 }
 0x4cb   :  { %3481 = vmatprep.mubr.msk.bf16.mxu0 %vm3928_vm0, %v3927_v14 }
 0x4db   :  { %v1727_v13 = vpop.f32.mrb[80].mxu1 }
 0x4dc   :  { %v1728_v46 = vadd.f32 %v4958_v56, %v1727_v13  ;;  %v3415_v50 = vpop.f32.mrb[81].mxu1 }
 0x4dd   :  { %v1730_v4 = vpop.f32.mrb[82].mxu1 }
 0x4de   :  { %v1788_v47 = vmax.f32 %v1728_v46, 0.0  ;;  %v1731_v60 = vadd.f32 %v4958_v56, %v1730_v4  ;;  %v3416_v41 = vpop.f32.mrb[83].mxu1 }
 0x4e0   :  { %v1789_v10 = vmax.f32 %v1731_v60, 0.0  ;;  %v5067_v61 = vadd.f32 %v1788_v47, %v4822_v8 }
 0x4e2   :  { %v5070_v19 = vadd.f32 %v1789_v10, %v4826_v32 }
 0x4e4   :  { %v1833_v6 = vpack.c.bf16 %v5070_v19, %v5067_v61 }
 0x4e6   :  { %3482 = vmatmul.mubr.bf16.gmra.mrb[132].mxu0 %v1833_v6 }
 0x4e7   :  { %3485 = vmatprep.mubr.msk.bf16.mxu0 %vm3928_vm0, %v3927_v14 }
 0x4f3   :  { %v1735_v53 = vpop.f32.mrb[84].mxu1 }
 0x4f4   :  { %v1736_v0 = vadd.f32 %v4958_v56, %v1735_v53  ;;  %v3419_v27 = vpop.f32.mrb[85].mxu1 }
 0x4f5   :  { %v1738_v63 = vpop.f32.mrb[86].mxu1 }
 0x4f6   :  { %v1790_v40 = vmax.f32 %v1736_v0, 0.0  ;;  %v1739_v45 = vadd.f32 %v4958_v56, %v1738_v63  ;;  %v3420_v8 = vpop.f32.mrb[87].mxu1 }
 0x4f8   :  { %v1791_v17 = vmax.f32 %v1739_v45, 0.0  ;;  %v5079_v32 = vadd.f32 %v1790_v40, %v4836_v5 }
 0x4fa   :  { %v5082_v43 = vadd.f32 %v1791_v17, %v4840_v29 }
 0x4fc   :  { %v1834_v52 = vpack.c.bf16 %v5082_v43, %v5079_v32 }
 0x4fe   :  { %3486 = vmatmul.mubr.bf16.gmra.mrb[136].mxu0 %v1834_v52 }
 0x4ff   :  { %3489 = vmatprep.mubr.msk.bf16.mxu0 %vm3928_vm0, %v3927_v14 }
 0x50b   :  { %v1743_v54 = vpop.f32.mrb[88].mxu1 }
 0x50c   :  { %v1744_v15 = vadd.f32 %v4958_v56, %v1743_v54  ;;  %v3423_v26 = vpop.f32.mrb[89].mxu1 }
 0x50d   :  { %v1746_v33 = vpop.f32.mrb[90].mxu1 }
 0x50e   :  { %v1792_v39 = vmax.f32 %v1744_v15, 0.0  ;;  %v1747_v7 = vadd.f32 %v4958_v56, %v1746_v33  ;;  %v3424_v5 = vpop.f32.mrb[91].mxu1 }
 0x510   :  { %v1793_v42 = vmax.f32 %v1747_v7, 0.0  ;;  %v5091_v29 = vadd.f32 %v1792_v39, %v4850_v49 }
 0x512   :  { %v5094_v44 = vadd.f32 %v1793_v42, %v4854_v20 }
 0x514   :  { %v1835_v38 = vpack.c.bf16 %v5094_v44, %v5091_v29 }
 0x516   :  { %3490 = vmatmul.mubr.bf16.gmra.mrb[140].mxu0 %v1835_v38 }
 0x517   :  { %3493 = vmatprep.mubr.msk.bf16.mxu0 %vm3928_vm0, %v3927_v14 }
 0x527   :  { %v1751_v25 = vpop.f32.mrb[92].mxu1 }
 0x528   :  { %v1752_v22 = vadd.f32 %v4958_v56, %v1751_v25  ;;  %v3427_v49 = vpop.f32.mrb[93].mxu1  ;;  %v1946_v35 = vpop.f32.mrb[104].mxu0 }
 0x529   :  { %v1947_v20 = vadd.f32 %v5103_v59, %v1946_v35  ;;  %v1754_v30 = vpop.f32.mrb[94].mxu1  ;;  %v3455_v18 = vpop.f32.mrb[105].mxu0 }
 0x52a   :  { %v1794_v28 = vmax.f32 %v1752_v22, 0.0  ;;  %v1755_v13 = vadd.f32 %v4958_v56, %v1754_v30  ;;  %v3428_v46 = vpop.f32.mrb[95].mxu1  ;;  %v1949_v50 = vpop.f32.mrb[106].mxu0 }
 0x52b   :  { %v1950_v4 = vadd.f32 %v5103_v59, %v1949_v50  ;;  %v3456_v47 = vpop.f32.mrb[107].mxu0  ;;  %v2049_v41 = vmax.f32 %v1947_v20, 0.0 }
 0x52c   :  { %v1795_v60 = vmax.f32 %v1755_v13, 0.0  ;;  %v5110_v6 = vadd.f32 %v1794_v28, %v4871_v48 }
 0x52d   :  { %v2050_v10 = vmax.f32 %v1950_v4, 0.0 }
 0x52e   :  { %v5113_v53 = vadd.f32 %v1795_v60, %v4875_v24 }
 0x52f   :  { %v2075_v0 = vpack.c.bf16 %v2050_v10, %v2049_v41 }
 0x530   :  { %v1836_v27 = vpack.c.bf16 %v5113_v53, %v5110_v6 }
 0x531   :  { %3522 = vmatmul.mubr.bf16.vlgmr.msra.gmra.mrb[104].mxu1 %v2075_v0 }
 0x532   :  { %3494 = vmatmul.mubr.bf16.gmra.mrb[144].mxu0 %v1836_v27  ;;  %3525 = vmatprep.mubr.msk.bf16.mxu1 %vm3928_vm0, %v3927_v14 }
 0x533   :  { %3497 = vmatprep.mubr.msk.bf16.mxu0 %vm3928_vm0, %v3927_v14 }
 0x53f   :  { %v1759_v63 = vpop.f32.mrb[96].mxu1 }
 0x540   :  { %v1760_v40 = vadd.f32 %v4958_v56, %v1759_v63  ;;  %v3431_v48 = vpop.f32.mrb[97].mxu1 }
 0x541   :  { %v1762_v45 = vpop.f32.mrb[98].mxu1  ;;  %v1954_v8 = vpop.f32.mrb[108].mxu0 }
 0x542   :  { %v1796_v24 = vmax.f32 %v1760_v40, 0.0  ;;  %v1763_v17 = vadd.f32 %v4958_v56, %v1762_v45  ;;  %v1955_v52 = vadd.f32 %v5103_v59, %v1954_v8  ;;  %v3432_v54 = vpop.f32.mrb[99].mxu1  ;;  %v3459_v15 = vpop.f32.mrb[109].mxu0 }
 0x543   :  { %v1957_v26 = vpop.f32.mrb[110].mxu0 }
 0x544   :  { %v1797_v33 = vmax.f32 %v1763_v17, 0.0  ;;  %v1958_v39 = vadd.f32 %v5103_v59, %v1957_v26  ;;  %v3460_v7 = vpop.f32.mrb[111].mxu0  ;;  %v5126_v5 = vadd.f32 %v1796_v24, %v4889_v58  ;;  %v2051_v38 = vmax.f32 %v1955_v52, 0.0 }
 0x546   :  { %v5129_v42 = vadd.f32 %v1797_v33, %v4893_v1  ;;  %v2052_v25 = vmax.f32 %v1958_v39, 0.0 }
 0x548   :  { %v2076_v22 = vpack.c.bf16 %v2052_v25, %v2051_v38  ;;  %v1837_v49 = vpack.c.bf16 %v5129_v42, %v5126_v5  ;;  %v3831_v38 = vld [vmem:[#allocation2 + $0xc0] sm:$0xff]  }
 0x549   :  { %v1962_v35 = vpop.f32.mrb[112].mxu0  ;;  %3574 = vmatpush3.bf16.msra.mxu0 %v3831_v38 }
 0x54a   :  { %v1963_v20 = vadd.f32 %v5103_v59, %v1962_v35  ;;  %v3463_v30 = vpop.f32.mrb[113].mxu0  ;;  %3498 = vmatmul.mubr.bf16.gmra.mrb[148].mxu0 %v1837_v49  ;;  %3526 = vmatmul.mubr.bf16.gmra.mrb[108].mxu1 %v2076_v22  ;;  %v3832_v35 = vld [vmem:[#allocation2 + $0xc8] sm:$0xff]  }
 0x54b   :  { %v1965_v18 = vpop.f32.mrb[114].mxu0  ;;  %3529 = vmatprep.mubr.msk.bf16.mxu1 %vm3928_vm0, %v3927_v14  ;;  %3501 = vmatprep.mubr.msk.bf16.mxu0 %vm3928_vm0, %v3927_v14  ;;  %v3833_v30 = vld [vmem:[#allocation2 + $0xd0] sm:$0xff]  }
 0x54c   :  { %v1966_v58 = vadd.f32 %v5103_v59, %v1965_v18  ;;  %v3464_v1 = vpop.f32.mrb[115].mxu0  ;;  %v2053_v28 = vmax.f32 %v1963_v20, 0.0  ;;  %3575 = vmatprep.subr.bf16.mxu0 %v3927_v14  ;;  %v3834_v18 = vld [vmem:[#allocation2 + $0xd8] sm:$0xff]  }
 0x54d   :  { %3576 = vmatpush3.bf16.msra.mxu0 %v3832_v35  ;;  %v3836_v1 = vld [vmem:[#allocation2 + $0xe8] sm:$0xff]  }
 0x54e   :  { %v2054_v13 = vmax.f32 %v1966_v58, 0.0  ;;  %3577 = vmatprep.subr.bf16.mxu0 %v3927_v14  ;;  %v3835_v58 = vld [vmem:[#allocation2 + $0xe0] sm:$0xff]  }
 0x550   :  { %v2077_v46 = vpack.c.bf16 %v2054_v13, %v2053_v28 }
 0x551   :  { %v1970_v50 = vpop.f32.mrb[116].mxu0  ;;  %3578 = vmatpush3.bf16.msra.mxu0 %v3833_v30 }
 0x552   :  { %v1971_v4 = vadd.f32 %v5103_v59, %v1970_v50  ;;  %v3467_v47 = vpop.f32.mrb[117].mxu0  ;;  %3530 = vmatmul.mubr.bf16.gmra.mrb[112].mxu1 %v2077_v46  ;;  %3579 = vmatprep.subr.bf16.mxu0 %v3927_v14  ;;  %v3837_v50 = vld [vmem:[#allocation2 + $0xf0] sm:$0xff]  }
 0x553   :  { %v1973_v60 = vpop.f32.mrb[118].mxu0  ;;  %3533 = vmatprep.mubr.msk.bf16.mxu1 %vm3928_vm0, %v3927_v14 }
 0x554   :  { %v1974_v41 = vadd.f32 %v5103_v59, %v1973_v60  ;;  %v3468_v10 = vpop.f32.mrb[119].mxu0  ;;  %v2055_v0 = vmax.f32 %v1971_v4, 0.0 }
 0x555   :  { %3580 = vmatpush3.bf16.msra.mxu0 %v3834_v18 }
 0x556   :  { %v2056_v27 = vmax.f32 %v1974_v41, 0.0  ;;  %3581 = vmatprep.subr.bf16.mxu0 %v3927_v14 }
 0x557   :  { %v1767_v63 = vpop.f32.mrb[100].mxu1 }
 0x558   :  { %v2078_v40 = vpack.c.bf16 %v2056_v27, %v2055_v0  ;;  %v1768_v48 = vadd.f32 %v4958_v56, %v1767_v63  ;;  %v3435_v45 = vpop.f32.mrb[101].mxu1  ;;  %v3838_v0 = vld [vmem:[#allocation2 + $0xf8] sm:$0xff]  }
 0x559   :  { %v1770_v8 = vpop.f32.mrb[102].mxu1  ;;  %3582 = vmatpush3.bf16.msra.mxu0 %v3835_v58 }
 0x55a   :  { %v1798_v24 = vmax.f32 %v1768_v48, 0.0  ;;  %v1771_v17 = vadd.f32 %v4958_v56, %v1770_v8  ;;  %v3436_v52 = vpop.f32.mrb[103].mxu1  ;;  %3534 = vmatmul.mubr.bf16.gmra.mrb[116].mxu1 %v2078_v40  ;;  %3583 = vmatprep.subr.bf16.mxu0 %v3927_v14 }
 0x55b   :  { %3537 = vmatprep.mubr.msk.bf16.mxu1 %vm3928_vm0, %v3927_v14 }
 0x55c   :  { %v1799_v54 = vmax.f32 %v1771_v17, 0.0  ;;  %v5148_v15 = vadd.f32 %v1798_v24, %v4913_v62 }
 0x55d   :  { %3584 = vmatpush3.bf16.msra.mxu0 %v3836_v1 }
 0x55e   :  { %v5151_v26 = vadd.f32 %v1799_v54, %v4917_v12  ;;  %3585 = vmatprep.subr.bf16.mxu0 %v3927_v14 }
 0x560   :  { %v1838_v33 = vpack.c.bf16 %v5151_v26, %v5148_v15 }
 0x561   :  { %3586 = vmatpush3.bf16.msra.mxu0 %v3837_v50 }
 0x562   :  { %3502 = vmatmul.mubr.bf16.gmra.mrb[152].mxu0 %v1838_v33  ;;  %3587 = vmatprep.subr.bf16.mxu0 %v3927_v14 }
 0x563   :  { %3589 = vmatprep.mubr.msk.bf16.mxu0 %vm3928_vm0, %v3927_v14 }
 0x565   :  { %3588 = vmatpush3.bf16.msra.mxu0 %v3838_v0 }
 0x56d   :  { %v1978_v56 = vpop.f32.mrb[120].mxu0 }
 0x56e   :  { %v1979_v39 = vadd.f32 %v5103_v59, %v1978_v56  ;;  %v3471_v7 = vpop.f32.mrb[121].mxu0 }
 0x56f   :  { %v1981_v25 = vpop.f32.mrb[122].mxu0 }
 0x570   :  { %v1982_v22 = vadd.f32 %v5103_v59, %v1981_v25  ;;  %v3472_v62 = vpop.f32.mrb[123].mxu0  ;;  %v2057_v12 = vmax.f32 %v1979_v39, 0.0 }
 0x572   :  { %v2058_v49 = vmax.f32 %v1982_v22, 0.0 }
 0x574   :  { %v2079_v20 = vpack.c.bf16 %v2058_v49, %v2057_v12 }
 0x576   :  { %3538 = vmatmul.mubr.bf16.gmra.mrb[120].mxu1 %v2079_v20 }
 0x577   :  { %3541 = vmatprep.mubr.msk.bf16.mxu1 %vm3928_vm0, %v3927_v14 }
 0x585   :  { %v1986_v28 = vpop.f32.mrb[124].mxu0 }
 0x586   :  { %v1987_v13 = vadd.f32 %v5103_v59, %v1986_v28  ;;  %v3475_v46 = vpop.f32.mrb[125].mxu0 }
 0x587   :  { %v1989_v4 = vpop.f32.mrb[126].mxu0 }
 0x588   :  { %v1990_v47 = vadd.f32 %v5103_v59, %v1989_v4  ;;  %v3476_v60 = vpop.f32.mrb[127].mxu0  ;;  %v2059_v41 = vmax.f32 %v1987_v13, 0.0 }
 0x58a   :  { %v2060_v10 = vmax.f32 %v1990_v47, 0.0 }
 0x58c   :  { %v2080_v27 = vpack.c.bf16 %v2060_v10, %v2059_v41 }
 0x58e   :  { %3542 = vmatmul.mubr.bf16.gmra.mrb[124].mxu1 %v2080_v27 }
 0x58f   :  { %3545 = vmatprep.mubr.msk.bf16.mxu1 %vm3928_vm0, %v3927_v14 }
 0x59d   :  { %v1994_v63 = vpop.f32.mrb[128].mxu0 }
 0x59e   :  { %v1995_v40 = vadd.f32 %v5103_v59, %v1994_v63  ;;  %v3479_v48 = vpop.f32.mrb[129].mxu0  ;;  %v5191_v63 = vld [vmem:[%s5496_s6 + $0x2] ss:$0 sm:$0xff] }
 0x59f   :  { %v1997_v45 = vpop.f32.mrb[130].mxu0 }
 0x5a0   :  { %v1998_v8 = vadd.f32 %v5103_v59, %v1997_v45  ;;  %v3480_v24 = vpop.f32.mrb[131].mxu0  ;;  %v2061_v17 = vmax.f32 %v1995_v40, 0.0 }
 0x5a2   :  { %v2062_v52 = vmax.f32 %v1998_v8, 0.0 }
 0x5a4   :  { %v2081_v54 = vpack.c.bf16 %v2062_v52, %v2061_v17 }
 0x5a6   :  { %3546 = vmatmul.mubr.bf16.gmra.mrb[128].mxu1 %v2081_v54 }
 0x5a7   :  { %3549 = vmatprep.mubr.msk.bf16.mxu1 %vm3928_vm0, %v3927_v14 }
 0x5b9   :  { %v2002_v33 = vpop.f32.mrb[132].mxu0 }
 0x5ba   :  { %v2003_v56 = vadd.f32 %v5103_v59, %v2002_v33  ;;  %v3483_v39 = vpop.f32.mrb[133].mxu0 }
 0x5bb   :  { %v2005_v7 = vpop.f32.mrb[134].mxu0 }
 0x5bc   :  { %v2006_v38 = vadd.f32 %v5103_v59, %v2005_v7  ;;  %v3484_v25 = vpop.f32.mrb[135].mxu0  ;;  %v2063_v22 = vmax.f32 %v2003_v56, 0.0 }
 0x5be   :  { %v2064_v62 = vmax.f32 %v2006_v38, 0.0 }
 0x5c0   :  { %v2082_v12 = vpack.c.bf16 %v2064_v62, %v2063_v22 }
 0x5c2   :  { %3550 = vmatmul.mubr.bf16.gmra.mrb[132].mxu1 %v2082_v12 }
 0x5c3   :  { %3553 = vmatprep.mubr.msk.bf16.mxu1 %vm3928_vm0, %v3927_v14 }
 0x5d1   :  { %v2010_v49 = vpop.f32.mrb[136].mxu0 }
 0x5d2   :  { %v2011_v35 = vadd.f32 %v5103_v59, %v2010_v49  ;;  %v3487_v20 = vpop.f32.mrb[137].mxu0 }
 0x5d3   :  { %v2013_v30 = vpop.f32.mrb[138].mxu0 }
 0x5d4   :  { %v2014_v18 = vadd.f32 %v5103_v59, %v2013_v30  ;;  %v3488_v58 = vpop.f32.mrb[139].mxu0  ;;  %v2065_v1 = vmax.f32 %v2011_v35, 0.0 }
 0x5d6   :  { %v2066_v28 = vmax.f32 %v2014_v18, 0.0 }
 0x5d8   :  { %v2083_v13 = vpack.c.bf16 %v2066_v28, %v2065_v1 }
 0x5da   :  { %3554 = vmatmul.mubr.bf16.gmra.mrb[136].mxu1 %v2083_v13 }
 0x5db   :  { %3557 = vmatprep.mubr.msk.bf16.mxu1 %vm3928_vm0, %v3927_v14 }
 0x5e9   :  { %v2018_v46 = vpop.f32.mrb[140].mxu0 }
 0x5ea   :  { %v2019_v50 = vadd.f32 %v5103_v59, %v2018_v46  ;;  %v3491_v4 = vpop.f32.mrb[141].mxu0 }
 0x5eb   :  { %v2021_v47 = vpop.f32.mrb[142].mxu0 }
 0x5ec   :  { %v2022_v60 = vadd.f32 %v5103_v59, %v2021_v47  ;;  %v3492_v41 = vpop.f32.mrb[143].mxu0  ;;  %v2067_v10 = vmax.f32 %v2019_v50, 0.0 }
 0x5ee   :  { %v2068_v0 = vmax.f32 %v2022_v60, 0.0 }
 0x5f0   :  { %v2084_v27 = vpack.c.bf16 %v2068_v0, %v2067_v10 }
 0x5f2   :  { %3558 = vmatmul.mubr.bf16.gmra.mrb[140].mxu1 %v2084_v27 }
 0x5f3   :  { %3561 = vmatprep.mubr.msk.bf16.mxu1 %vm3928_vm0, %v3927_v14 }
 0x604   :  { %v2195_v40 = vpop.f32.mrb[104].mxu1 }
 0x605   :  { %v2196_v48 = vadd.f32 %v5191_v63, %v2195_v40  ;;  %v2026_v45 = vpop.f32.mrb[144].mxu0  ;;  %v3523_v8 = vpop.f32.mrb[105].mxu1 }
 0x606   :  { %v2027_v24 = vadd.f32 %v5103_v59, %v2026_v45  ;;  %v3495_v17 = vpop.f32.mrb[145].mxu0  ;;  %v2198_v52 = vpop.f32.mrb[106].mxu1 }
 0x607   :  { %v2298_v54 = vmax.f32 %v2196_v48, 0.0  ;;  %v2199_v33 = vadd.f32 %v5191_v63, %v2198_v52  ;;  %v2029_v56 = vpop.f32.mrb[146].mxu0  ;;  %v3524_v39 = vpop.f32.mrb[107].mxu1 }
 0x608   :  { %v2030_v7 = vadd.f32 %v5103_v59, %v2029_v56  ;;  %v3496_v38 = vpop.f32.mrb[147].mxu0  ;;  %v2069_v22 = vmax.f32 %v2027_v24, 0.0 }
 0x609   :  { %v2299_v25 = vmax.f32 %v2199_v33, 0.0  ;;  %v5198_v12 = vadd.f32 %v2298_v54, %v4965_v34 }
 0x60a   :  { %v2070_v62 = vmax.f32 %v2030_v7, 0.0 }
 0x60b   :  { %v5201_v49 = vadd.f32 %v2299_v25, %v4968_v2 }
 0x60c   :  { %v2085_v35 = vpack.c.bf16 %v2070_v62, %v2069_v22 }
 0x60d   :  { %v2350_v20 = vpack.c.bf16 %v5201_v49, %v5198_v12 }
 0x60e   :  { %3562 = vmatmul.mubr.bf16.gmra.mrb[144].mxu1 %v2085_v35 }
 0x60f   :  { %3590 = vmatmul.mubr.bf16.vlgmr.msra.gmra.mrb[156].mxu0 %v2350_v20  ;;  %3565 = vmatprep.mubr.msk.bf16.mxu1 %vm3928_vm0, %v3927_v14 }
 0x610   :  { %3593 = vmatprep.mubr.msk.bf16.mxu0 %vm3928_vm0, %v3927_v14 }
 0x61d   :  { %v2034_v30 = vpop.f32.mrb[148].mxu0  ;;  %v2203_v18 = vpop.f32.mrb[108].mxu1 }
 0x61e   :  { %v2035_v34 = vadd.f32 %v5103_v59, %v2034_v30  ;;  %v2204_v58 = vadd.f32 %v5191_v63, %v2203_v18  ;;  %v3499_v2 = vpop.f32.mrb[149].mxu0  ;;  %v3527_v1 = vpop.f32.mrb[109].mxu1 }
 0x61f   :  { %v2037_v28 = vpop.f32.mrb[150].mxu0  ;;  %v2206_v13 = vpop.f32.mrb[110].mxu1 }
 0x620   :  { %v2300_v46 = vmax.f32 %v2204_v58, 0.0  ;;  %v2038_v50 = vadd.f32 %v5103_v59, %v2037_v28  ;;  %v2207_v4 = vadd.f32 %v5191_v63, %v2206_v13  ;;  %v3500_v47 = vpop.f32.mrb[151].mxu0  ;;  %v3528_v60 = vpop.f32.mrb[111].mxu1  ;;  %v2071_v41 = vmax.f32 %v2035_v34, 0.0 }
 0x622   :  { %v2072_v10 = vmax.f32 %v2038_v50, 0.0  ;;  %v2301_v0 = vmax.f32 %v2207_v4, 0.0  ;;  %v5214_v27 = vadd.f32 %v2300_v46, %v4981_v23 }
 0x624   :  { %v2086_v40 = vpack.c.bf16 %v2072_v10, %v2071_v41  ;;  %v5217_v48 = vadd.f32 %v2301_v0, %v4984_v21  ;;  %v3839_v41 = vld [vmem:[#allocation5 + $0xc0] sm:$0xff]  }
 0x625   :  { %v2211_v45 = vpop.f32.mrb[112].mxu1  ;;  %3642 = vmatpush3.bf16.msra.mxu1 %v3839_v41 }
 0x626   :  { %v2212_v8 = vadd.f32 %v5191_v63, %v2211_v45  ;;  %v3531_v24 = vpop.f32.mrb[113].mxu1  ;;  %3566 = vmatmul.mubr.bf16.gmra.mrb[148].mxu1 %v2086_v40  ;;  %v2351_v17 = vpack.c.bf16 %v5217_v48, %v5214_v27  ;;  %3643 = vmatprep.subr.bf16.mxu1 %v3927_v14 }
 0x627   :  { %v2214_v52 = vpop.f32.mrb[114].mxu1  ;;  %3569 = vmatprep.mubr.msk.bf16.mxu1 %vm3928_vm0, %v3927_v14 }
 0x628   :  { %v2302_v54 = vmax.f32 %v2212_v8, 0.0  ;;  %v2215_v23 = vadd.f32 %v5191_v63, %v2214_v52  ;;  %v3532_v33 = vpop.f32.mrb[115].mxu1  ;;  %3594 = vmatmul.mubr.bf16.gmra.mrb[160].mxu0 %v2351_v17  ;;  %v3840_v8 = vld [vmem:[#allocation5 + $0xc8] sm:$0xff]   ;;  %v3841_v52 = vld [vmem:[#allocation5 + $0xd0] sm:$0xff]  }
 0x629   :  { %3597 = vmatprep.mubr.msk.bf16.mxu0 %vm3928_vm0, %v3927_v14  ;;  %3644 = vmatpush3.bf16.msra.mxu1 %v3840_v8 }
 0x62a   :  { %v2303_v21 = vmax.f32 %v2215_v23, 0.0  ;;  %v5228_v56 = vadd.f32 %v2302_v54, %v4995_v36  ;;  %3645 = vmatprep.subr.bf16.mxu1 %v3927_v14  ;;  %v3842_v23 = vld [vmem:[#allocation5 + $0xd8] sm:$0xff]  }
 0x62c   :  { %v5231_v39 = vadd.f32 %v2303_v21, %v4998_v57 }
 0x62d   :  { %v2219_v7 = vpop.f32.mrb[116].mxu1  ;;  %3646 = vmatpush3.bf16.msra.mxu1 %v3841_v52 }
 0x62e   :  { %v2220_v38 = vadd.f32 %v5191_v63, %v2219_v7  ;;  %v3535_v25 = vpop.f32.mrb[117].mxu1  ;;  %v2352_v22 = vpack.c.bf16 %v5231_v39, %v5228_v56  ;;  %3647 = vmatprep.subr.bf16.mxu1 %v3927_v14 }
 0x62f   :  { %v2222_v62 = vpop.f32.mrb[118].mxu1 }
 0x630   :  { %v2304_v35 = vmax.f32 %v2220_v38, 0.0  ;;  %v2223_v20 = vadd.f32 %v5191_v63, %v2222_v62  ;;  %v3536_v30 = vpop.f32.mrb[119].mxu1  ;;  %3598 = vmatmul.mubr.bf16.gmra.mrb[164].mxu0 %v2352_v22  ;;  %v3845_v38 = vld [vmem:[#allocation5 + $0xf0] sm:$0xff]  }
 0x631   :  { %3601 = vmatprep.mubr.msk.bf16.mxu0 %vm3928_vm0, %v3927_v14  ;;  %3648 = vmatpush3.bf16.msra.mxu1 %v3842_v23  ;;  %v3846_v30 = vld [vmem:[#allocation5 + $0xf8] sm:$0xff]  }
 0x632   :  { %v2305_v36 = vmax.f32 %v2223_v20, 0.0  ;;  %v5240_v57 = vadd.f32 %v2304_v35, %v5007_v37  ;;  %3649 = vmatprep.subr.bf16.mxu1 %v3927_v14 }
 0x634   :  { %v5243_v18 = vadd.f32 %v2305_v36, %v5010_v3 }
 0x635   :  { %v2042_v34 = vpop.f32.mrb[152].mxu0 }
 0x636   :  { %v2043_v58 = vadd.f32 %v5103_v59, %v2042_v34  ;;  %v3503_v2 = vpop.f32.mrb[153].mxu0  ;;  %v2353_v1 = vpack.c.bf16 %v5243_v18, %v5240_v57 }
 0x637   :  { %v2045_v28 = vpop.f32.mrb[154].mxu0 }
 0x638   :  { %v2046_v13 = vadd.f32 %v5103_v59, %v2045_v28  ;;  %v3504_v46 = vpop.f32.mrb[155].mxu0  ;;  %3602 = vmatmul.mubr.bf16.gmra.mrb[168].mxu0 %v2353_v1  ;;  %v2073_v37 = vmax.f32 %v2043_v58, 0.0 }
 0x639   :  { %3605 = vmatprep.mubr.msk.bf16.mxu0 %vm3928_vm0, %v3927_v14 }
 0x63a   :  { %v2074_v50 = vmax.f32 %v2046_v13, 0.0 }
 0x63c   :  { %v2087_v4 = vpack.c.bf16 %v2074_v50, %v2073_v37 }
 0x63e   :  { %3570 = vmatmul.mubr.bf16.gmra.mrb[152].mxu1 %v2087_v4 }
 0x63f   :  { %3657 = vmatprep.mubr.msk.bf16.mxu1 %vm3928_vm0, %v3927_v14 }
 0x649   :  { %v2227_v3 = vpop.f32.mrb[120].mxu1 }
 0x64a   :  { %v2228_v47 = vadd.f32 %v5191_v63, %v2227_v3  ;;  %v3539_v60 = vpop.f32.mrb[121].mxu1 }
 0x64b   :  { %v2230_v10 = vpop.f32.mrb[122].mxu1 }
 0x64c   :  { %v2306_v0 = vmax.f32 %v2228_v47, 0.0  ;;  %v2231_v59 = vadd.f32 %v5191_v63, %v2230_v10  ;;  %v3540_v40 = vpop.f32.mrb[123].mxu1 }
 0x64e   :  { %v2307_v45 = vmax.f32 %v2231_v59, 0.0  ;;  %v5257_v24 = vadd.f32 %v2306_v0, %v5024_v11  ;;  %v3843_v11 = vld [vmem:[#allocation5 + $0xe0] sm:$0xff]  }
 0x64f   :  { %3650 = vmatpush3.bf16.msra.mxu1 %v3843_v11 }
 0x650   :  { %v5260_v17 = vadd.f32 %v2307_v45, %v5027_v9  ;;  %v3844_v9 = vld [vmem:[#allocation5 + $0xe8] sm:$0xff]   ;;  %3651 = vmatprep.subr.bf16.mxu1 %v3927_v14 }
 0x652   :  { %v2354_v54 = vpack.c.bf16 %v5260_v17, %v5257_v24 }
 0x653   :  { %3652 = vmatpush3.bf16.msra.mxu1 %v3844_v9 }
 0x654   :  { %3606 = vmatmul.mubr.bf16.gmra.mrb[172].mxu0 %v2354_v54  ;;  %3653 = vmatprep.subr.bf16.mxu1 %v3927_v14 }
 0x655   :  { %3609 = vmatprep.mubr.msk.bf16.mxu0 %vm3928_vm0, %v3927_v14 }
 0x657   :  { %3654 = vmatpush3.bf16.msra.mxu1 %v3845_v38 }
 0x658   :  { %3655 = vmatprep.subr.bf16.mxu1 %v3927_v14 }
 0x65b   :  { %3656 = vmatpush3.bf16.msra.mxu1 %v3846_v30 }
 0x661   :  { %v2235_v33 = vpop.f32.mrb[124].mxu1 }
 0x662   :  { %v2236_v21 = vadd.f32 %v5191_v63, %v2235_v33  ;;  %v3543_v7 = vpop.f32.mrb[125].mxu1 }
 0x663   :  { %v2238_v25 = vpop.f32.mrb[126].mxu1 }
 0x664   :  { %v2308_v22 = vmax.f32 %v2236_v21, 0.0  ;;  %v2239_v62 = vadd.f32 %v5191_v63, %v2238_v25  ;;  %v3544_v35 = vpop.f32.mrb[127].mxu1 }
 0x666   :  { %v2309_v20 = vmax.f32 %v2239_v62, 0.0  ;;  %v5275_v36 = vadd.f32 %v2308_v22, %v5042_v16 }
 0x668   :  { %v5278_v34 = vadd.f32 %v2309_v20, %v5045_v51 }
 0x66a   :  { %v2355_v58 = vpack.c.bf16 %v5278_v34, %v5275_v36 }
 0x66c   :  { %3610 = vmatmul.mubr.bf16.gmra.mrb[176].mxu0 %v2355_v58 }
 0x66d   :  { %3613 = vmatprep.mubr.msk.bf16.mxu0 %vm3928_vm0, %v3927_v14 }
 0x679   :  { %v2243_v2 = vpop.f32.mrb[128].mxu1 }
 0x67a   :  { %v2244_v1 = vadd.f32 %v5191_v63, %v2243_v2  ;;  %v3547_v28 = vpop.f32.mrb[129].mxu1 }
 0x67b   :  { %v2246_v13 = vpop.f32.mrb[130].mxu1  ;;  %v5335_v28 = vld [vmem:[%s5494_s4 + $0x3] ss:$0 sm:$0xff] }
 0x67c   :  { %v2310_v46 = vmax.f32 %v2244_v1, 0.0  ;;  %v2247_v16 = vadd.f32 %v5191_v63, %v2246_v13  ;;  %v3548_v37 = vpop.f32.mrb[131].mxu1 }
 0x67e   :  { %v2311_v50 = vmax.f32 %v2247_v16, 0.0  ;;  %v5287_v51 = vadd.f32 %v2310_v46, %v5055_v55 }
 0x680   :  { %v5290_v4 = vadd.f32 %v2311_v50, %v5058_v31 }
 0x682   :  { %v2356_v3 = vpack.c.bf16 %v5290_v4, %v5287_v51 }
 0x684   :  { %3614 = vmatmul.mubr.bf16.gmra.mrb[180].mxu0 %v2356_v3 }
 0x685   :  { %3617 = vmatprep.mubr.msk.bf16.mxu0 %vm3928_vm0, %v3927_v14 }
 0x695   :  { %v2251_v47 = vpop.f32.mrb[132].mxu1 }
 0x696   :  { %v2252_v60 = vadd.f32 %v5191_v63, %v2251_v47  ;;  %v3551_v41 = vpop.f32.mrb[133].mxu1 }
 0x697   :  { %v2254_v10 = vpop.f32.mrb[134].mxu1 }
 0x698   :  { %v2312_v0 = vmax.f32 %v2252_v60, 0.0  ;;  %v2255_v59 = vadd.f32 %v5191_v63, %v2254_v10  ;;  %v3552_v55 = vpop.f32.mrb[135].mxu1 }
 0x69a   :  { %v2313_v40 = vmax.f32 %v2255_v59, 0.0  ;;  %v5299_v31 = vadd.f32 %v2312_v0, %v5067_v61 }
 0x69c   :  { %v5302_v45 = vadd.f32 %v2313_v40, %v5070_v19 }
 0x69e   :  { %v2357_v8 = vpack.c.bf16 %v5302_v45, %v5299_v31 }
 0x6a0   :  { %3618 = vmatmul.mubr.bf16.gmra.mrb[184].mxu0 %v2357_v8 }
 0x6a1   :  { %3621 = vmatprep.mubr.msk.bf16.mxu0 %vm3928_vm0, %v3927_v14 }
 0x6ad   :  { %v2259_v52 = vpop.f32.mrb[136].mxu1 }
 0x6ae   :  { %v2260_v54 = vadd.f32 %v5191_v63, %v2259_v52  ;;  %v3555_v23 = vpop.f32.mrb[137].mxu1 }
 0x6af   :  { %v2262_v11 = vpop.f32.mrb[138].mxu1 }
 0x6b0   :  { %v2314_v9 = vmax.f32 %v2260_v54, 0.0  ;;  %v2263_v33 = vadd.f32 %v5191_v63, %v2262_v11  ;;  %v3556_v61 = vpop.f32.mrb[139].mxu1 }
 0x6b2   :  { %v2315_v21 = vmax.f32 %v2263_v33, 0.0  ;;  %v5311_v19 = vadd.f32 %v2314_v9, %v5079_v32 }
 0x6b4   :  { %v5314_v7 = vadd.f32 %v2315_v21, %v5082_v43 }
 0x6b6   :  { %v2358_v38 = vpack.c.bf16 %v5314_v7, %v5311_v19 }
 0x6b8   :  { %3622 = vmatmul.mubr.bf16.gmra.mrb[188].mxu0 %v2358_v38 }
 0x6b9   :  { %3625 = vmatprep.mubr.msk.bf16.mxu0 %vm3928_vm0, %v3927_v14 }
 0x6c5   :  { %v2267_v25 = vpop.f32.mrb[140].mxu1 }
 0x6c6   :  { %v2268_v22 = vadd.f32 %v5191_v63, %v2267_v25  ;;  %v3559_v62 = vpop.f32.mrb[141].mxu1 }
 0x6c7   :  { %v2270_v35 = vpop.f32.mrb[142].mxu1 }
 0x6c8   :  { %v2316_v20 = vmax.f32 %v2268_v22, 0.0  ;;  %v2271_v30 = vadd.f32 %v5191_v63, %v2270_v35  ;;  %v3560_v32 = vpop.f32.mrb[143].mxu1 }
 0x6ca   :  { %v2317_v58 = vmax.f32 %v2271_v30, 0.0  ;;  %v5323_v43 = vadd.f32 %v2316_v20, %v5091_v29 }
 0x6cc   :  { %v5326_v2 = vadd.f32 %v2317_v58, %v5094_v44 }
 0x6ce   :  { %v2359_v1 = vpack.c.bf16 %v5326_v2, %v5323_v43 }
 0x6d0   :  { %3626 = vmatmul.mubr.bf16.gmra.mrb[192].mxu0 %v2359_v1 }
 0x6d1   :  { %3629 = vmatprep.mubr.msk.bf16.mxu0 %vm3928_vm0, %v3927_v14 }
 0x6e1   :  { %v2275_v13 = vpop.f32.mrb[144].mxu1 }
 0x6e2   :  { %v2276_v46 = vadd.f32 %v5191_v63, %v2275_v13  ;;  %v3563_v29 = vpop.f32.mrb[145].mxu1  ;;  %v2470_v16 = vpop.f32.mrb[156].mxu0 }
 0x6e3   :  { %v2471_v44 = vadd.f32 %v5335_v28, %v2470_v16  ;;  %v2278_v37 = vpop.f32.mrb[146].mxu1  ;;  %v3591_v50 = vpop.f32.mrb[157].mxu0 }
 0x6e4   :  { %v2318_v3 = vmax.f32 %v2276_v46, 0.0  ;;  %v2279_v47 = vadd.f32 %v5191_v63, %v2278_v37  ;;  %v3564_v60 = vpop.f32.mrb[147].mxu1  ;;  %v2473_v41 = vpop.f32.mrb[158].mxu0 }
 0x6e5   :  { %v2474_v10 = vadd.f32 %v5335_v28, %v2473_v41  ;;  %v3592_v0 = vpop.f32.mrb[159].mxu0  ;;  %v2573_v55 = vmax.f32 %v2471_v44, 0.0 }
 0x6e6   :  { %v2319_v59 = vmax.f32 %v2279_v47, 0.0  ;;  %v5342_v8 = vadd.f32 %v2318_v3, %v5110_v6 }
 0x6e7   :  { %v2574_v40 = vmax.f32 %v2474_v10, 0.0 }
 0x6e8   :  { %v5345_v52 = vadd.f32 %v2319_v59, %v5113_v53 }
 0x6e9   :  { %v2599_v54 = vpack.c.bf16 %v2574_v40, %v2573_v55 }
 0x6ea   :  { %v2360_v23 = vpack.c.bf16 %v5345_v52, %v5342_v8 }
 0x6eb   :  { %3658 = vmatmul.mubr.bf16.vlgmr.msra.gmra.mrb[156].mxu1 %v2599_v54 }
 0x6ec   :  { %3630 = vmatmul.mubr.bf16.gmra.mrb[196].mxu0 %v2360_v23  ;;  %3661 = vmatprep.mubr.msk.bf16.mxu1 %vm3928_vm0, %v3927_v14 }
 0x6ed   :  { %3633 = vmatprep.mubr.msk.bf16.mxu0 %vm3928_vm0, %v3927_v14 }
 0x6f9   :  { %v2283_v11 = vpop.f32.mrb[148].mxu1 }
 0x6fa   :  { %v2284_v9 = vadd.f32 %v5191_v63, %v2283_v11  ;;  %v3567_v6 = vpop.f32.mrb[149].mxu1 }
 0x6fb   :  { %v2286_v33 = vpop.f32.mrb[150].mxu1  ;;  %v2478_v61 = vpop.f32.mrb[160].mxu0 }
 0x6fc   :  { %v2320_v53 = vmax.f32 %v2284_v9, 0.0  ;;  %v2287_v21 = vadd.f32 %v5191_v63, %v2286_v33  ;;  %v2479_v38 = vadd.f32 %v5335_v28, %v2478_v61  ;;  %v3568_v25 = vpop.f32.mrb[151].mxu1  ;;  %v3595_v22 = vpop.f32.mrb[161].mxu0 }
 0x6fd   :  { %v2481_v62 = vpop.f32.mrb[162].mxu0 }
 0x6fe   :  { %v2321_v35 = vmax.f32 %v2287_v21, 0.0  ;;  %v2482_v20 = vadd.f32 %v5335_v28, %v2481_v62  ;;  %v3596_v30 = vpop.f32.mrb[163].mxu0  ;;  %v5358_v32 = vadd.f32 %v2320_v53, %v5126_v5  ;;  %v2575_v1 = vmax.f32 %v2479_v38, 0.0 }
 0x700   :  { %v5361_v58 = vadd.f32 %v2321_v35, %v5129_v42  ;;  %v2576_v13 = vmax.f32 %v2482_v20, 0.0 }
 0x702   :  { %v2600_v46 = vpack.c.bf16 %v2576_v13, %v2575_v1  ;;  %v2361_v29 = vpack.c.bf16 %v5361_v58, %v5358_v32 }
 0x703   :  { %v2486_v16 = vpop.f32.mrb[164].mxu0 }
 0x704   :  { %v2487_v44 = vadd.f32 %v5335_v28, %v2486_v16  ;;  %v3599_v37 = vpop.f32.mrb[165].mxu0  ;;  %3634 = vmatmul.mubr.bf16.gmra.mrb[200].mxu0 %v2361_v29  ;;  %3662 = vmatmul.mubr.bf16.gmra.mrb[160].mxu1 %v2600_v46 }
 0x705   :  { %v2489_v50 = vpop.f32.mrb[166].mxu0  ;;  %3665 = vmatprep.mubr.msk.bf16.mxu1 %vm3928_vm0, %v3927_v14  ;;  %3637 = vmatprep.mubr.msk.bf16.mxu0 %vm3928_vm0, %v3927_v14 }
 0x706   :  { %v2490_v5 = vadd.f32 %v5335_v28, %v2489_v50  ;;  %v3600_v42 = vpop.f32.mrb[167].mxu0  ;;  %v2577_v3 = vmax.f32 %v2487_v44, 0.0 }
 0x708   :  { %v2578_v47 = vmax.f32 %v2490_v5, 0.0 }
 0x70a   :  { %v2601_v60 = vpack.c.bf16 %v2578_v47, %v2577_v3 }
 0x70b   :  { %v2494_v41 = vpop.f32.mrb[168].mxu0 }
 0x70c   :  { %v2495_v10 = vadd.f32 %v5335_v28, %v2494_v41  ;;  %v3603_v0 = vpop.f32.mrb[169].mxu0  ;;  %3666 = vmatmul.mubr.bf16.gmra.mrb[164].mxu1 %v2601_v60 }
 0x70d   :  { %v2497_v59 = vpop.f32.mrb[170].mxu0  ;;  %3669 = vmatprep.mubr.msk.bf16.mxu1 %vm3928_vm0, %v3927_v14 }
 0x70e   :  { %v2498_v55 = vadd.f32 %v5335_v28, %v2497_v59  ;;  %v3604_v40 = vpop.f32.mrb[171].mxu0  ;;  %v2579_v54 = vmax.f32 %v2495_v10, 0.0 }
 0x710   :  { %v2580_v23 = vmax.f32 %v2498_v55, 0.0 }
 0x711   :  { %v2291_v11 = vpop.f32.mrb[152].mxu1 }
 0x712   :  { %v2602_v9 = vpack.c.bf16 %v2580_v23, %v2579_v54  ;;  %v2292_v6 = vadd.f32 %v5191_v63, %v2291_v11  ;;  %v3571_v33 = vpop.f32.mrb[153].mxu1 }
 0x713   :  { %v2294_v61 = vpop.f32.mrb[154].mxu1 }
 0x714   :  { %v2322_v53 = vmax.f32 %v2292_v6, 0.0  ;;  %v2295_v21 = vadd.f32 %v5191_v63, %v2294_v61  ;;  %v3572_v38 = vpop.f32.mrb[155].mxu1  ;;  %3670 = vmatmul.mubr.bf16.gmra.mrb[168].mxu1 %v2602_v9 }
 0x715   :  { %3673 = vmatprep.mubr.msk.bf16.mxu1 %vm3928_vm0, %v3927_v14 }
 0x716   :  { %v2323_v25 = vmax.f32 %v2295_v21, 0.0  ;;  %v5380_v22 = vadd.f32 %v2322_v53, %v5148_v15 }
 0x718   :  { %v5383_v62 = vadd.f32 %v2323_v25, %v5151_v26 }
 0x71a   :  { %v2362_v35 = vpack.c.bf16 %v5383_v62, %v5380_v22 }
 0x71c   :  { %3638 = vmatmul.mubr.bf16.gmra.mrb[204].mxu0 %v2362_v35 }
 0x727   :  { %v2502_v20 = vpop.f32.mrb[172].mxu0 }
 0x728   :  { %v2503_v30 = vadd.f32 %v5335_v28, %v2502_v20  ;;  %v3607_v63 = vpop.f32.mrb[173].mxu0 }
 0x729   :  { %v2505_v1 = vpop.f32.mrb[174].mxu0 }
 0x72a   :  { %v2506_v13 = vadd.f32 %v5335_v28, %v2505_v1  ;;  %v3608_v46 = vpop.f32.mrb[175].mxu0  ;;  %v2581_v29 = vmax.f32 %v2503_v30, 0.0 }
 0x72c   :  { %v2582_v16 = vmax.f32 %v2506_v13, 0.0 }
 0x72e   :  { %v2603_v44 = vpack.c.bf16 %v2582_v16, %v2581_v29 }
 0x730   :  { %3674 = vmatmul.mubr.bf16.gmra.mrb[172].mxu1 %v2603_v44 }
 0x731   :  { %3677 = vmatprep.mubr.msk.bf16.mxu1 %vm3928_vm0, %v3927_v14 }
 0x73f   :  { %v2510_v15 = vpop.f32.mrb[176].mxu0 }
 0x740   :  { %v2511_v26 = vadd.f32 %v5335_v28, %v2510_v15  ;;  %v3611_v37 = vpop.f32.mrb[177].mxu0 }
 0x741   :  { %v2513_v50 = vpop.f32.mrb[178].mxu0 }
 0x742   :  { %v2514_v5 = vadd.f32 %v5335_v28, %v2513_v50  ;;  %v3612_v42 = vpop.f32.mrb[179].mxu0  ;;  %v2583_v3 = vmax.f32 %v2511_v26, 0.0 }
 0x744   :  { %v2584_v47 = vmax.f32 %v2514_v5, 0.0 }
 0x746   :  { %v2604_v60 = vpack.c.bf16 %v2584_v47, %v2583_v3 }
 0x748   :  { %3678 = vmatmul.mubr.bf16.gmra.mrb[176].mxu1 %v2604_v60 }
 0x749   :  { %3681 = vmatprep.mubr.msk.bf16.mxu1 %vm3928_vm0, %v3927_v14 }
 0x757   :  { %v2518_v41 = vpop.f32.mrb[180].mxu0 }
 0x758   :  { %v2519_v10 = vadd.f32 %v5335_v28, %v2518_v41  ;;  %v3615_v0 = vpop.f32.mrb[181].mxu0  ;;  %v5414_v41 = vld [vmem:[%s5496_s6 + $0x3] ss:$0 sm:$0xff]  ;;  %s3929_s6 = smov [#allocation7]  }
 0x759   :  { %v2521_v59 = vpop.f32.mrb[182].mxu0  ;;  %s2905_s20 = sshll.u32 %s3929_s6, 4  ;;  %s2906_s20 = int_to_ptr.vmem [resolvable:$true] %s2905_s20 }
 0x75a   :  { %v2522_v55 = vadd.f32 %v5335_v28, %v2521_v59  ;;  %v3616_v40 = vpop.f32.mrb[183].mxu0  ;;  %v2585_v54 = vmax.f32 %v2519_v10, 0.0  ;;  %s3891_s21 = scalar_lea.vmem %s2906_s20, 3328  ;;  %p3896_p3 = scmp.lt.s32.totalorder %s2906_s20, %s2906_s20 }
 0x75b   :  { %p3892_p2 = scmp.ne.s32.totalorder %s2906_s20, %s3891_s21  ;;  %p3897_p4 = scmp.lt.s32.totalorder %s3891_s21, %s3891_s21 }
 0x75c   :  { %v2586_v23 = vmax.f32 %v2522_v55, 0.0 }
 0x75d   :  { %p3898_p5 = por %p3897_p4, %p3896_p3 }
 0x75e   :  { %v2605_v11 = vpack.c.bf16 %v2586_v23, %v2585_v54 }
 0x75f   :  { %p3899_p6 = pnand %p3898_p5, %p3892_p2 }
 0x760   :  { %3682 = vmatmul.mubr.bf16.gmra.mrb[180].mxu1 %v2605_v11 }
 0x761   :  { %3685 = vmatprep.mubr.msk.bf16.mxu1 %vm3928_vm0, %v3927_v14 }
 0x773   :  { %v2526_v9 = vpop.f32.mrb[184].mxu0 }
 0x774   :  { %v2527_v6 = vadd.f32 %v5335_v28, %v2526_v9  ;;  %v3619_v33 = vpop.f32.mrb[185].mxu0 }
 0x775   :  { %v2529_v61 = vpop.f32.mrb[186].mxu0 }
 0x776   :  { %v2530_v53 = vadd.f32 %v5335_v28, %v2529_v61  ;;  %v3620_v21 = vpop.f32.mrb[187].mxu0  ;;  %v2587_v38 = vmax.f32 %v2527_v6, 0.0 }
 0x778   :  { %v2588_v25 = vmax.f32 %v2530_v53, 0.0 }
 0x77a   :  { %v2606_v35 = vpack.c.bf16 %v2588_v25, %v2587_v38 }
 0x77c   :  { %3686 = vmatmul.mubr.bf16.gmra.mrb[184].mxu1 %v2606_v35 }
 0x77d   :  { %3689 = vmatprep.mubr.msk.bf16.mxu1 %vm3928_vm0, %v3927_v14 }
 0x78b   :  { %v2534_v20 = vpop.f32.mrb[188].mxu0 }
 0x78c   :  { %v2535_v30 = vadd.f32 %v5335_v28, %v2534_v20  ;;  %v3623_v63 = vpop.f32.mrb[189].mxu0 }
 0x78d   :  { %v2537_v1 = vpop.f32.mrb[190].mxu0 }
 0x78e   :  { %v2538_v13 = vadd.f32 %v5335_v28, %v2537_v1  ;;  %v3624_v46 = vpop.f32.mrb[191].mxu0  ;;  %v2589_v29 = vmax.f32 %v2535_v30, 0.0 }
 0x790   :  { %v2590_v16 = vmax.f32 %v2538_v13, 0.0 }
 0x792   :  { %v2607_v44 = vpack.c.bf16 %v2590_v16, %v2589_v29 }
 0x794   :  { %3690 = vmatmul.mubr.bf16.gmra.mrb[188].mxu1 %v2607_v44 }
 0x795   :  { %3693 = vmatprep.mubr.msk.bf16.mxu1 %vm3928_vm0, %v3927_v14 }
 0x7a3   :  { %v2542_v15 = vpop.f32.mrb[192].mxu0 }
 0x7a4   :  { %v2543_v26 = vadd.f32 %v5335_v28, %v2542_v15  ;;  %v3627_v37 = vpop.f32.mrb[193].mxu0 }
 0x7a5   :  { %v2545_v50 = vpop.f32.mrb[194].mxu0 }
 0x7a6   :  { %v2546_v5 = vadd.f32 %v5335_v28, %v2545_v50  ;;  %v3628_v42 = vpop.f32.mrb[195].mxu0  ;;  %v2591_v3 = vmax.f32 %v2543_v26, 0.0 }
 0x7a8   :  { %v2592_v47 = vmax.f32 %v2546_v5, 0.0 }
 0x7aa   :  { %v2608_v60 = vpack.c.bf16 %v2592_v47, %v2591_v3 }
 0x7ac   :  { %3694 = vmatmul.mubr.bf16.gmra.mrb[192].mxu1 %v2608_v60 }
 0x7ad   :  { %3697 = vmatprep.mubr.msk.bf16.mxu1 %vm3928_vm0, %v3927_v14 }
 0x7be   :  { %v2719_v10 = vpop.f32.mrb[156].mxu1 }
 0x7bf   :  { %v2720_v0 = vadd.f32 %v5414_v41, %v2719_v10  ;;  %v2550_v59 = vpop.f32.mrb[196].mxu0  ;;  %v3659_v55 = vpop.f32.mrb[157].mxu1 }
 0x7c0   :  { %v2551_v40 = vadd.f32 %v5335_v28, %v2550_v59  ;;  %v3631_v54 = vpop.f32.mrb[197].mxu0  ;;  %v2722_v23 = vpop.f32.mrb[158].mxu1 }
 0x7c1   :  { %v2822_v11 = vmax.f32 %v2720_v0, 0.0  ;;  %v2723_v9 = vadd.f32 %v5414_v41, %v2722_v23  ;;  %v2553_v6 = vpop.f32.mrb[198].mxu0  ;;  %v3660_v33 = vpop.f32.mrb[159].mxu1 }
 0x7c2   :  { %v2554_v61 = vadd.f32 %v5335_v28, %v2553_v6  ;;  %v3632_v53 = vpop.f32.mrb[199].mxu0  ;;  %v2593_v25 = vmax.f32 %v2551_v40, 0.0 }
 0x7c3   :  { %v2848_v21 = vadd.f32 %v2822_v11, %v5198_v12  ;;  %v2823_v38 = vmax.f32 %v2723_v9, 0.0 }
 0x7c4   :  { %v2594_v35 = vmax.f32 %v2554_v61, 0.0 }
 0x7c5   :  { %2874 = vst [vmem:[#allocation7] sm:$0xff] %v2848_v21  ;;  %v2849_v20 = vadd.f32 %v2823_v38, %v5201_v49 }
 0x7c6   :  { %v2609_v30 = vpack.c.bf16 %v2594_v35, %v2593_v25 }
 0x7c7   :  { %2875 = vst [vmem:[#allocation7 + $0x8] sm:$0xff] %v2849_v20 }
 0x7c8   :  { %3698 = vmatmul.mubr.bf16.gmra.mrb[196].mxu1 %v2609_v30 }
 0x7c9   :  { %3701 = vmatprep.mubr.msk.bf16.mxu1 %vm3928_vm0, %v3927_v14 }
 0x7d7   :  { %v2558_v63 = vpop.f32.mrb[200].mxu0  ;;  %v2727_v1 = vpop.f32.mrb[160].mxu1 }
 0x7d8   :  { %v2559_v13 = vadd.f32 %v5335_v28, %v2558_v63  ;;  %v2728_v46 = vadd.f32 %v5414_v41, %v2727_v1  ;;  %v3635_v29 = vpop.f32.mrb[201].mxu0  ;;  %v3663_v12 = vpop.f32.mrb[161].mxu1 }
 0x7d9   :  { %v2561_v16 = vpop.f32.mrb[202].mxu0  ;;  %v2730_v44 = vpop.f32.mrb[162].mxu1 }
 0x7da   :  { %v2824_v15 = vmax.f32 %v2728_v46, 0.0  ;;  %v2562_v26 = vadd.f32 %v5335_v28, %v2561_v16  ;;  %v2731_v49 = vadd.f32 %v5414_v41, %v2730_v44  ;;  %v3636_v37 = vpop.f32.mrb[203].mxu0  ;;  %v3664_v50 = vpop.f32.mrb[163].mxu1  ;;  %v2595_v5 = vmax.f32 %v2559_v13, 0.0 }
 0x7dc   :  { %v2850_v42 = vadd.f32 %v2824_v15, %v5214_v27  ;;  %v2596_v3 = vmax.f32 %v2562_v26, 0.0  ;;  %v2825_v47 = vmax.f32 %v2731_v49, 0.0 }
 0x7de   :  { %2876 = vst [vmem:[#allocation7 + $0x10] sm:$0xff] %v2850_v42  ;;  %v2610_v60 = vpack.c.bf16 %v2596_v3, %v2595_v5  ;;  %v2851_v10 = vadd.f32 %v2825_v47, %v5217_v48 }
 0x7df   :  { %v2735_v0 = vpop.f32.mrb[164].mxu1 }
 0x7e0   :  { %2877 = vst [vmem:[#allocation7 + $0x18] sm:$0xff] %v2851_v10  ;;  %v2736_v59 = vadd.f32 %v5414_v41, %v2735_v0  ;;  %v3667_v55 = vpop.f32.mrb[165].mxu1  ;;  %3702 = vmatmul.mubr.bf16.gmra.mrb[200].mxu1 %v2610_v60 }
 0x7e1   :  { %v2738_v40 = vpop.f32.mrb[166].mxu1  ;;  %3705 = vmatprep.mubr.msk.bf16.mxu1 %vm3928_vm0, %v3927_v14 }
 0x7e2   :  { %v2826_v54 = vmax.f32 %v2736_v59, 0.0  ;;  %v2739_v23 = vadd.f32 %v5414_v41, %v2738_v40  ;;  %v3668_v27 = vpop.f32.mrb[167].mxu1 }
 0x7e4   :  { %v2852_v11 = vadd.f32 %v2826_v54, %v5228_v56  ;;  %v2827_v9 = vmax.f32 %v2739_v23, 0.0 }
 0x7e6   :  { %2878 = vst [vmem:[#allocation7 + $0x20] sm:$0xff] %v2852_v11  ;;  %v2853_v48 = vadd.f32 %v2827_v9, %v5231_v39 }
 0x7e7   :  { %v2743_v6 = vpop.f32.mrb[168].mxu1 }
 0x7e8   :  { %2879 = vst [vmem:[#allocation7 + $0x28] sm:$0xff] %v2853_v48  ;;  %v2744_v33 = vadd.f32 %v5414_v41, %v2743_v6  ;;  %v3671_v61 = vpop.f32.mrb[169].mxu1 }
 0x7e9   :  { %v2746_v53 = vpop.f32.mrb[170].mxu1 }
 0x7ea   :  { %v2828_v21 = vmax.f32 %v2744_v33, 0.0  ;;  %v2747_v38 = vadd.f32 %v5414_v41, %v2746_v53  ;;  %v3672_v14 = vpop.f32.mrb[171].mxu1 }
 0x7ec   :  { %v2854_v25 = vadd.f32 %v2828_v21, %v5240_v57  ;;  %v2829_v35 = vmax.f32 %v2747_v38, 0.0 }
 0x7ee   :  { %2880 = vst [vmem:[#allocation7 + $0x30] sm:$0xff] %v2854_v25  ;;  %v2855_v56 = vadd.f32 %v2829_v35, %v5243_v18 }
 0x7ef   :  { %v2566_v20 = vpop.f32.mrb[204].mxu0 }
 0x7f0   :  { %2881 = vst [vmem:[#allocation7 + $0x38] sm:$0xff] %v2855_v56  ;;  %v2567_v39 = vadd.f32 %v5335_v28, %v2566_v20  ;;  %v3639_v30 = vpop.f32.mrb[205].mxu0 }
 0x7f1   :  { %v2569_v63 = vpop.f32.mrb[206].mxu0 }
 0x7f2   :  { %v2570_v1 = vadd.f32 %v5335_v28, %v2569_v63  ;;  %v3640_v13 = vpop.f32.mrb[207].mxu0  ;;  %v2597_v46 = vmax.f32 %v2567_v39, 0.0 }
 0x7f4   :  { %v2598_v29 = vmax.f32 %v2570_v1, 0.0 }
 0x7f6   :  { %v2611_v12 = vpack.c.bf16 %v2598_v29, %v2597_v46 }
 0x7f8   :  { %3706 = vmatmul.mubr.bf16.gmra.mrb[204].mxu1 %v2611_v12 }
 0x803   :  { %v2751_v16 = vpop.f32.mrb[172].mxu1 }
 0x804   :  { %v2752_v57 = vadd.f32 %v5414_v41, %v2751_v16  ;;  %v3675_v44 = vpop.f32.mrb[173].mxu1 }
 0x805   :  { %v2754_v15 = vpop.f32.mrb[174].mxu1 }
 0x806   :  { %v2830_v26 = vmax.f32 %v2752_v57, 0.0  ;;  %v2755_v18 = vadd.f32 %v5414_v41, %v2754_v15  ;;  %v3676_v49 = vpop.f32.mrb[175].mxu1 }
 0x808   :  { %v2856_v37 = vadd.f32 %v2830_v26, %v5257_v24  ;;  %v2831_v50 = vmax.f32 %v2755_v18, 0.0 }
 0x80a   :  { %2882 = vst [vmem:[#allocation7 + $0x40] sm:$0xff] %v2856_v37  ;;  %v2857_v28 = vadd.f32 %v2831_v50, %v5260_v17 }
 0x80c   :  { %2883 = vst [vmem:[#allocation7 + $0x48] sm:$0xff] %v2857_v28 }
 0x81b   :  { %v2759_v5 = vpop.f32.mrb[176].mxu1 }
 0x81c   :  { %v2760_v42 = vadd.f32 %v5414_v41, %v2759_v5  ;;  %v3679_v3 = vpop.f32.mrb[177].mxu1 }
 0x81d   :  { %v2762_v47 = vpop.f32.mrb[178].mxu1 }
 0x81e   :  { %v2832_v60 = vmax.f32 %v2760_v42, 0.0  ;;  %v2763_v10 = vadd.f32 %v5414_v41, %v2762_v47  ;;  %v3680_v0 = vpop.f32.mrb[179].mxu1 }
 0x820   :  { %v2858_v59 = vadd.f32 %v2832_v60, %v5275_v36  ;;  %v2833_v55 = vmax.f32 %v2763_v10, 0.0 }
 0x822   :  { %2884 = vst [vmem:[#allocation7 + $0x50] sm:$0xff] %v2858_v59  ;;  %v2859_v24 = vadd.f32 %v2833_v55, %v5278_v34 }
 0x824   :  { %2885 = vst [vmem:[#allocation7 + $0x58] sm:$0xff] %v2859_v24 }
 0x833   :  { %v2767_v40 = vpop.f32.mrb[180].mxu1 }
 0x834   :  { %v2768_v17 = vadd.f32 %v5414_v41, %v2767_v40  ;;  %v3683_v54 = vpop.f32.mrb[181].mxu1 }
 0x835   :  { %v2770_v23 = vpop.f32.mrb[182].mxu1 }
 0x836   :  { %v2834_v27 = vmax.f32 %v2768_v17, 0.0  ;;  %v2771_v11 = vadd.f32 %v5414_v41, %v2770_v23  ;;  %v3684_v9 = vpop.f32.mrb[183].mxu1 }
 0x838   :  { %v2860_v48 = vadd.f32 %v2834_v27, %v5287_v51  ;;  %v2835_v6 = vmax.f32 %v2771_v11, 0.0 }
 0x83a   :  { %2886 = vst [vmem:[#allocation7 + $0x60] sm:$0xff] %v2860_v48  ;;  %v2861_v36 = vadd.f32 %v2835_v6, %v5290_v4 }
 0x83c   :  { %2887 = vst [vmem:[#allocation7 + $0x68] sm:$0xff] %v2861_v36 }
 0x84f   :  { %v2775_v33 = vpop.f32.mrb[184].mxu1 }
 0x850   :  { %v2776_v34 = vadd.f32 %v5414_v41, %v2775_v33  ;;  %v3687_v61 = vpop.f32.mrb[185].mxu1 }
 0x851   :  { %v2778_v53 = vpop.f32.mrb[186].mxu1 }
 0x852   :  { %v2836_v21 = vmax.f32 %v2776_v34, 0.0  ;;  %v2779_v38 = vadd.f32 %v5414_v41, %v2778_v53  ;;  %v3688_v14 = vpop.f32.mrb[187].mxu1 }
 0x854   :  { %v2862_v25 = vadd.f32 %v2836_v21, %v5299_v31  ;;  %v2837_v35 = vmax.f32 %v2779_v38, 0.0 }
 0x856   :  { %2888 = vst [vmem:[#allocation7 + $0x70] sm:$0xff] %v2862_v25  ;;  %v2863_v51 = vadd.f32 %v2837_v35, %v5302_v45 }
 0x858   :  { %2889 = vst [vmem:[#allocation7 + $0x78] sm:$0xff] %v2863_v51 }
 0x867   :  { %v2783_v56 = vpop.f32.mrb[188].mxu1 }
 0x868   :  { %v2784_v4 = vadd.f32 %v5414_v41, %v2783_v56  ;;  %v3691_v20 = vpop.f32.mrb[189].mxu1 }
 0x869   :  { %v2786_v39 = vpop.f32.mrb[190].mxu1 }
 0x86a   :  { %v2838_v30 = vmax.f32 %v2784_v4, 0.0  ;;  %v2787_v63 = vadd.f32 %v5414_v41, %v2786_v39  ;;  %v3692_v1 = vpop.f32.mrb[191].mxu1 }
 0x86c   :  { %v2864_v13 = vadd.f32 %v2838_v30, %v5311_v19  ;;  %v2839_v46 = vmax.f32 %v2787_v63, 0.0 }
 0x86e   :  { %2890 = vst [vmem:[#allocation7 + $0x80] sm:$0xff] %v2864_v13  ;;  %v2865_v31 = vadd.f32 %v2839_v46, %v5314_v7 }
 0x870   :  { %2891 = vst [vmem:[#allocation7 + $0x88] sm:$0xff] %v2865_v31 }
 0x87f   :  { %v2791_v29 = vpop.f32.mrb[192].mxu1 }
 0x880   :  { %v2792_v45 = vadd.f32 %v5414_v41, %v2791_v29  ;;  %v3695_v12 = vpop.f32.mrb[193].mxu1 }
 0x881   :  { %v2794_v16 = vpop.f32.mrb[194].mxu1 }
 0x882   :  { %v2840_v57 = vmax.f32 %v2792_v45, 0.0  ;;  %v2795_v44 = vadd.f32 %v5414_v41, %v2794_v16  ;;  %v3696_v15 = vpop.f32.mrb[195].mxu1 }
 0x884   :  { %v2866_v26 = vadd.f32 %v2840_v57, %v5323_v43  ;;  %v2841_v18 = vmax.f32 %v2795_v44, 0.0 }
 0x886   :  { %2892 = vst [vmem:[#allocation7 + $0x90] sm:$0xff] %v2866_v26  ;;  %v2867_v19 = vadd.f32 %v2841_v18, %v5326_v2 }
 0x888   :  { %2893 = vst [vmem:[#allocation7 + $0x98] sm:$0xff] %v2867_v19 }
 0x89b   :  { %v2799_v49 = vpop.f32.mrb[196].mxu1 }
 0x89c   :  { %v2800_v7 = vadd.f32 %v5414_v41, %v2799_v49  ;;  %v3699_v37 = vpop.f32.mrb[197].mxu1 }
 0x89d   :  { %v2802_v50 = vpop.f32.mrb[198].mxu1 }
 0x89e   :  { %v2842_v28 = vmax.f32 %v2800_v7, 0.0  ;;  %v2803_v5 = vadd.f32 %v5414_v41, %v2802_v50  ;;  %v3700_v42 = vpop.f32.mrb[199].mxu1 }
 0x8a0   :  { %v2868_v3 = vadd.f32 %v2842_v28, %v5342_v8  ;;  %v2843_v47 = vmax.f32 %v2803_v5, 0.0 }
 0x8a2   :  { %2894 = vst [vmem:[#allocation7 + $0xa0] sm:$0xff] %v2868_v3  ;;  %v2869_v43 = vadd.f32 %v2843_v47, %v5345_v52 }
 0x8a4   :  { %2895 = vst [vmem:[#allocation7 + $0xa8] sm:$0xff] %v2869_v43 }
 0x8b3   :  { %v2807_v60 = vpop.f32.mrb[200].mxu1 }
 0x8b4   :  { %v2808_v2 = vadd.f32 %v5414_v41, %v2807_v60  ;;  %v3703_v10 = vpop.f32.mrb[201].mxu1 }
 0x8b5   :  { %v2810_v0 = vpop.f32.mrb[202].mxu1 }
 0x8b6   :  { %v2844_v59 = vmax.f32 %v2808_v2, 0.0  ;;  %v2811_v55 = vadd.f32 %v5414_v41, %v2810_v0  ;;  %v3704_v24 = vpop.f32.mrb[203].mxu1 }
 0x8b8   :  { %v2870_v40 = vadd.f32 %v2844_v59, %v5358_v32  ;;  %v2845_v17 = vmax.f32 %v2811_v55, 0.0 }
 0x8ba   :  { %2896 = vst [vmem:[#allocation7 + $0xb0] sm:$0xff] %v2870_v40  ;;  %v2871_v8 = vadd.f32 %v2845_v17, %v5361_v58 }
 0x8bc   :  { %2897 = vst [vmem:[#allocation7 + $0xb8] sm:$0xff] %v2871_v8 }
 0x8cb   :  { %v2815_v54 = vpop.f32.mrb[204].mxu1 }
 0x8cc   :  { %v2816_v52 = vadd.f32 %v5414_v41, %v2815_v54  ;;  %v3707_v23 = vpop.f32.mrb[205].mxu1 }
 0x8cd   :  { %v2818_v27 = vpop.f32.mrb[206].mxu1 }
 0x8ce   :  { %v2846_v11 = vmax.f32 %v2816_v52, 0.0  ;;  %v2819_v9 = vadd.f32 %v5414_v41, %v2818_v27  ;;  %v3708_v48 = vpop.f32.mrb[207].mxu1 }
 0x8d0   :  { %v2872_v6 = vadd.f32 %v2846_v11, %v5380_v22  ;;  %v2847_v36 = vmax.f32 %v2819_v9, 0.0 }
 0x8d2   :  { %2898 = vst [vmem:[#allocation7 + $0xc0] sm:$0xff] %v2872_v6  ;;  %v2873_v32 = vadd.f32 %v2847_v36, %v5383_v62 }
 0x8d4   :  { %2899 = vst [vmem:[#allocation7 + $0xc8] sm:$0xff] %v2873_v32 }
 0x8d5   :  { %3902 = shalt.err (!%p3899_p6)
}
 0x8d6   :  { %s3903_s24 = scalar_lea.hbm %s5497_s7, 3328 }
 0x8d7   :  { %p3904_p7 = scmp.ne.s32.totalorder %s5497_s7, %s3903_s24  ;;  %p3907_p8 = scmp.lt.u32.totalorder %s3903_s24, %s5497_s7 }
 0x8d9   :  { %p3909_p9 = pnand %p3907_p8, %p3904_p7 }
 0x8db   :  { %3912 = shalt.err (!%p3909_p9)
}
 0x8dc   :  { %s3930_s1 = smov 128   ;;  %s3931_s2 = smov 8  }
 0x8dd   :  { %2911 = dma.vmem_to_hbm [thread:$0]  %s2906_s20, 3328, %s5497_s7, [#allocation4], %s3930_s1, %s3930_s1, %s3931_s2  }
 0x8de   :  { %3917 = dma.done.wait [#allocation4], 3328  }
 0x8df   :  { %3918 = vsyncadd [#allocation4], 4294963968 }
 0x8e0   :  { %2915 = vsyncpa [#allocation3], 1 }
 0x8e1   :  { %2916 = vsyncpa [#allocation6], 1 }
 0x8e2   :  { %2917 = vsyncpa [#allocation4], 1 }

</bundles_post_ra>
